<compile_context>
chip_gen: v6e
topology: v6e:2x2x1
jax: 0.10.0
libtpu: 0.0.40
codegen_flags: <defaults>
</compile_context>

<pallas_src>
import functools

import jax
import jax.numpy as jnp
import numpy as np
from jax import lax
from jax.experimental import pallas as pl
from jax.experimental.pallas import tpu as pltpu

EPS = 1e-5


# ----------------------------- in-kernel math -----------------------------

def _erf(x):
    # Abramowitz & Stegun 7.1.26 polynomial (|err| < 1.5e-7, f32-level).
    a1, a2, a3, a4, a5 = (0.254829592, -0.284496736, 1.421413741,
                          -1.453152027, 1.061405429)
    p = 0.3275911
    sign = jnp.where(x >= 0.0, 1.0, -1.0)
    ax = jnp.abs(x)
    d = 1.0 + p * ax
    r = pl.reciprocal(d, approx=True)      # EUP slot
    r = r * (2.0 - d * r)                  # one Newton step -> ~f32 accuracy
    poly = ((((a5 * r + a4) * r + a3) * r + a2) * r + a1) * r
    return sign * (1.0 - poly * jnp.exp(-ax * ax))


def _gelu(x):
    # exact (erf-based) GELU, matching torch.nn.functional.gelu's default
    return 0.5 * x * (1.0 + _erf(x * 0.7071067811865476))


def _layernorm(x, gamma):
    # x: (rows, C); normalize over the channel (lane) axis, biased variance.
    mu = jnp.mean(x, axis=-1, keepdims=True)
    var = jnp.mean((x - mu) ** 2, axis=-1, keepdims=True)
    return (x - mu) * lax.rsqrt(var + EPS) * gamma


# ------------------------------ fused kernel ------------------------------

def _fused_kernel(x_ref, g1_ref, w1_ref, b1_ref, g2_ref, w2_ref, b2_ref,
                  wout_ref, bout_ref, o_ref, hbuf, resbuf,
                  *, D, H, W, TD, Cin, Cout, project):
    i = pl.program_id(1)                   # D-slab index
    j = pl.program_id(2)                   # position inside slab (incl. halo)
    d_src = i * TD - 1 + j                 # D slice whose activation we build
    in_range = jnp.logical_and(d_src >= 0, d_src < D)
    slot = j % 3

    # Zero the halo buffer (incl. its permanent H/W zero borders) once per
    # slab, so every slot read below was written within this slab.
    @pl.when(j == 0)
    def _zero():
        hbuf[...] = jnp.zeros_like(hbuf)

    @pl.when(in_range)
    def _pointwise():
        x3 = x_ref[...]                                    # (H, W, Cin)
        x2 = x3.reshape(H * W, Cin)
        t = _gelu(_layernorm(x2, g1_ref[...]))
        y = (jnp.dot(t, w1_ref[...], preferred_element_type=jnp.float32)
             + b1_ref[...])
        h = _gelu(_layernorm(y, g2_ref[...]))              # (H*W, Cout)
        hbuf[slot, 1:H + 1, 1:W + 1, :] = h.reshape(H, W, Cout)
        if project:    # conv_out: 1x1x1 conv on the residual branch
            res = (jnp.dot(x2, wout_ref[...],
                           preferred_element_type=jnp.float32)
                   + bout_ref[...])
        else:          # Cin == Cout: identity residual
            res = x2
        resbuf[j % 2] = res.reshape(H, W, Cout)

    @pl.when(jnp.logical_not(in_range))
    def _halo_zero():                      # D-padding slice (d = -1 or d = D)
        hbuf[slot] = jnp.zeros((H + 2, W + 2, Cout), jnp.float32)

    # Once h[d-1], h[d], h[d+1] are resident, emit output slice d = i*TD + j-2.
    @pl.when(j >= 2)
    def _conv():
        acc = b2_ref[...] + jnp.zeros((H, W, Cout), jnp.float32)
        for kd in range(3):
            s = (j - 2 + kd) % 3
            for kh in range(3):
                for kw in range(3):
                    acc = acc + (hbuf[s, kh:kh + H, kw:kw + W, :]
                                 * w2_ref[kd * 9 + kh * 3 + kw])
        o_ref[...] = acc + resbuf[(j - 1) % 2]


# -------------------------------- wrapper ---------------------------------

def _choose_td(D, N):
    """Largest D-slab size that still leaves >= 2 parallel grid programs."""
    if N >= 2 or D <= 1:
        return D
    for td in range(max(D // 2, 1), 0, -1):
        if D % td == 0:
            return td
    return D


def depthwise_res_block(x, params):
    """x: NCDHW float32. Returns NCDHW float32 (N, Cout, D, H, W)."""
    N, Cin, D, H, W = x.shape
    g1 = params["gamma1"]
    w1 = params["w1"]          # (Cin, Cout)   conv1 weight (squeezed)
    b1 = params["b1"]          # (Cout,)
    g2 = params["gamma2"]
    w2 = params["w2"]          # (Cout, 3, 3, 3) depthwise weight (squeezed)
    b2 = params["b2"]          # (Cout,)
    wout = params["w_out"]     # (Cin, Cout)
    bout = params["b_out"]     # (Cout,)
    Cout = w1.shape[1]
    project = (Cin != Cout)

    TD = _choose_td(D, N)
    nblk = D // TD

    # NCDHW -> N D H W C (channels on the lane axis)
    xl = jnp.transpose(x, (0, 2, 3, 4, 1)).astype(jnp.float32)

    g1r = g1.reshape(1, Cin).astype(jnp.float32)
    g2r = g2.reshape(1, Cout).astype(jnp.float32)
    b1r = b1.reshape(1, Cout).astype(jnp.float32)
    b2r = b2.reshape(1, Cout).astype(jnp.float32)
    boutr = bout.reshape(1, Cout).astype(jnp.float32)
    w1r = w1.astype(jnp.float32)
    woutr = wout.astype(jnp.float32)
    # depthwise weight -> (27, 1, Cout); tap index k = kd*9 + kh*3 + kw
    w2r = w2.reshape(Cout, 27).T.reshape(27, 1, Cout).astype(jnp.float32)

    grid = (N, nblk, TD + 2)

    def x_map(n, i, j):
        return (n, jnp.clip(i * TD - 1 + j, 0, D - 1), 0, 0, 0)

    def out_map(n, i, j):
        return (n, i * TD + jnp.maximum(j - 2, 0), 0, 0, 0)

    const2 = lambda n, i, j: (0, 0)
    const3 = lambda n, i, j: (0, 0, 0)

    out_l = pl.pallas_call(
        functools.partial(_fused_kernel, D=D, H=H, W=W, TD=TD,
                          Cin=Cin, Cout=Cout, project=project),
        out_shape=jax.ShapeDtypeStruct((N, D, H, W, Cout), jnp.float32),
        grid=grid,
        in_specs=[
            pl.BlockSpec((None, None, H, W, Cin), x_map),   # x (one D slice)
            pl.BlockSpec((1, Cin), const2),                 # gamma1
            pl.BlockSpec((Cin, Cout), const2),              # w1
            pl.BlockSpec((1, Cout), const2),                # b1
            pl.BlockSpec((1, Cout), const2),                # gamma2
            pl.BlockSpec((27, 1, Cout), const3),            # w2 (27 taps)
            pl.BlockSpec((1, Cout), const2),                # b2
            pl.BlockSpec((Cin, Cout), const2),              # w_out
            pl.BlockSpec((1, Cout), const2),                # b_out
        ],
        out_specs=pl.BlockSpec((None, None, H, W, Cout), out_map),
        scratch_shapes=[
            pltpu.VMEM((3, H + 2, W + 2, Cout), jnp.float32),  # rolling h halo
            pltpu.VMEM((2, H, W, Cout), jnp.float32),          # rolling residual
        ],
        compiler_params=pltpu.CompilerParams(
            dimension_semantics=("parallel", "parallel", "arbitrary")),
    )(xl, g1r, w1r, b1r, g2r, w2r, b2r, woutr, boutr)

    # N D H W C -> NCDHW
    return jnp.transpose(out_l, (0, 4, 1, 2, 3))


# ------------------------------- reference --------------------------------

def reference_forward(x, params):
    """Pure-JAX reference mirroring the PyTorch module (NCDHW)."""
    g1, w1, b1 = params["gamma1"], params["w1"], params["b1"]
    g2, w2, b2 = params["gamma2"], params["w2"], params["b2"]
    wout, bout = params["w_out"], params["b_out"]
    N, Cin, D, H, W = x.shape
    Cout = w1.shape[1]

    def ln(v, gamma):
        mu = jnp.mean(v, axis=1, keepdims=True)
        var = jnp.mean((v - mu) ** 2, axis=1, keepdims=True)
        return (v - mu) / jnp.sqrt(var + EPS) * gamma.reshape(1, -1, 1, 1, 1)

    t = jax.nn.gelu(ln(x, g1), approximate=False)
    y = jnp.einsum('ncdhw,co->nodhw', t, w1) + b1.reshape(1, -1, 1, 1, 1)
    z = jax.nn.gelu(ln(y, g2), approximate=False)
    zp = jnp.pad(z, ((0, 0), (0, 0), (1, 1), (1, 1), (1, 1)))
    out = jnp.zeros_like(z) + b2.reshape(1, -1, 1, 1, 1)
    for kd in range(3):
        for kh in range(3):
            for kw in range(3):
                out = out + (zp[:, :, kd:kd + D, kh:kh + H, kw:kw + W]
                             * w2[:, kd, kh, kw].reshape(1, -1, 1, 1, 1))
    if Cin != Cout:
        xin = jnp.einsum('ncdhw,co->nodhw', x, wout) + bout.reshape(1, -1, 1, 1, 1)
    else:
        xin = x
    return out + xin


if __name__ == "__main__":
    key = jax.random.PRNGKey(0)
    kx, k1, k2, k3, k4, k5, k6 = jax.random.split(key, 7)
    N, Cin, Cout, D, H, W = 2, 4, 8, 4, 8, 8
    x = jax.random.normal(kx, (N, Cin, D, H, W), jnp.float32)

    # Deterministic synthetic parameters (shapes match the PyTorch module;
    # gammas initialized to ones as in LayerNorm.__init__).
    params = dict(
        gamma1=jnp.ones((Cin,), jnp.float32),
        w1=0.2 * jax.random.normal(k1, (Cin, Cout), jnp.float32),
        b1=0.1 * jax.random.normal(k2, (Cout,), jnp.float32),
        gamma2=jnp.ones((Cout,), jnp.float32),
        w2=0.2 * jax.random.normal(k3, (Cout, 3, 3, 3), jnp.float32),
        b2=0.1 * jax.random.normal(k4, (Cout,), jnp.float32),
        w_out=0.2 * jax.random.normal(k5, (Cin, Cout), jnp.float32),
        b_out=0.1 * jax.random.normal(k6, (Cout,), jnp.float32),
    )

    out = jax.block_until_ready(depthwise_res_block(x, params))
    assert out.shape == (N, Cout, D, H, W)

    ref = jax.block_until_ready(reference_forward(x, params))
    np.testing.assert_allclose(np.asarray(out), np.asarray(ref),
                               rtol=1e-3, atol=1e-3)
    print("KERNEL_OK")
</pallas_src>

<mosaic_0001>
module attributes {stable_mosaic.version = 11 : i64} {
  func.func @_fused_kernel(%arg0: i32, %arg1: i32, %arg2: i32, %arg3: memref<1x1x8x8x4xf32, #tpu.memory_space<vmem>>, %arg4: memref<1x4xf32, #tpu.memory_space<vmem>>, %arg5: memref<4x8xf32, #tpu.memory_space<vmem>>, %arg6: memref<1x8xf32, #tpu.memory_space<vmem>>, %arg7: memref<1x8xf32, #tpu.memory_space<vmem>>, %arg8: memref<27x1x8xf32, #tpu.memory_space<vmem>>, %arg9: memref<1x8xf32, #tpu.memory_space<vmem>>, %arg10: memref<4x8xf32, #tpu.memory_space<vmem>>, %arg11: memref<1x8xf32, #tpu.memory_space<vmem>>, %arg12: memref<1x1x8x8x8xf32, #tpu.memory_space<vmem>>, %arg13: memref<3x10x10x8xf32, #tpu.memory_space<vmem>>, %arg14: memref<2x8x8x8xf32, #tpu.memory_space<vmem>>) attributes {dimension_semantics = [#tpu.dimension_semantics<parallel>, #tpu.dimension_semantics<parallel>, #tpu.dimension_semantics<arbitrary>], iteration_bounds = array<i64: 2, 1, 6>, scalar_prefetch = 0 : i64, scratch_operands = 2 : i64, tpu.core_type = #tpu.core_type<tc>, window_params = [{transform_indices = @transform_0, window_bounds = array<i64: 1, 1, 8, 8, 4>}, {pipeline_mode = #tpu.pipeline_mode<synchronous>, transform_indices = @transform_1, window_bounds = array<i64: 1, 4>}, {pipeline_mode = #tpu.pipeline_mode<synchronous>, transform_indices = @transform_2, window_bounds = array<i64: 4, 8>}, {pipeline_mode = #tpu.pipeline_mode<synchronous>, transform_indices = @transform_3, window_bounds = array<i64: 1, 8>}, {pipeline_mode = #tpu.pipeline_mode<synchronous>, transform_indices = @transform_4, window_bounds = array<i64: 1, 8>}, {pipeline_mode = #tpu.pipeline_mode<synchronous>, transform_indices = @transform_5, window_bounds = array<i64: 27, 1, 8>}, {pipeline_mode = #tpu.pipeline_mode<synchronous>, transform_indices = @transform_6, window_bounds = array<i64: 1, 8>}, {pipeline_mode = #tpu.pipeline_mode<synchronous>, transform_indices = @transform_7, window_bounds = array<i64: 4, 8>}, {pipeline_mode = #tpu.pipeline_mode<synchronous>, transform_indices = @transform_8, window_bounds = array<i64: 1, 8>}, {transform_indices = @transform_9, window_bounds = array<i64: 1, 1, 8, 8, 8>}]} {
    %c4_i32 = arith.constant 4 : i32
    %0 = arith.muli %arg1, %c4_i32 : i32
    %c1_i32 = arith.constant 1 : i32
    %1 = arith.subi %0, %c1_i32 : i32
    %2 = arith.addi %1, %arg2 : i32
    %c0_i32 = arith.constant 0 : i32
    %3 = arith.cmpi sge, %2, %c0_i32 : i32
    %c4_i32_0 = arith.constant 4 : i32
    %4 = arith.cmpi slt, %2, %c4_i32_0 : i32
    %5 = arith.andi %3, %4 : i1
    %c3_i32 = arith.constant 3 : i32
    %c0_i32_1 = arith.constant 0 : i32
    %6 = arith.cmpi eq, %c3_i32, %c0_i32_1 : i32
    %c1_i32_2 = arith.constant 1 : i32
    %7 = arith.select %6, %c1_i32_2, %c3_i32 : i32
    %8 = arith.remsi %arg2, %7 : i32
    %c0_i32_3 = arith.constant 0 : i32
    %9 = arith.cmpi ne, %8, %c0_i32_3 : i32
    %c0_i32_4 = arith.constant 0 : i32
    %10 = arith.cmpi slt, %8, %c0_i32_4 : i32
    %c0_i32_5 = arith.constant 0 : i32
    %11 = arith.cmpi slt, %7, %c0_i32_5 : i32
    %12 = arith.xori %10, %11 : i1
    %13 = arith.andi %12, %9 : i1
    %14 = arith.addi %8, %7 : i32
    %15 = arith.select %13, %14, %8 : i32
    %c0_i32_6 = arith.constant 0 : i32
    %16 = arith.cmpi eq, %arg2, %c0_i32_6 : i32
    %17 = arith.extui %16 : i1 to i32
    %c0_i32_7 = arith.constant 0 : i32
    %18 = arith.cmpi ne, %17, %c0_i32_7 : i32
    scf.if %18 {
      %cst = arith.constant 0.000000e+00 : f32
      %27 = vector.broadcast %cst : f32 to vector<3x10x10x8xf32>
      %c0 = arith.constant 0 : index
      %c0_11 = arith.constant 0 : index
      %c0_12 = arith.constant 0 : index
      %c0_13 = arith.constant 0 : index
      %28 = vector.load %arg13[%c0, %c0_11, %c0_12, %c0_13] : memref<3x10x10x8xf32, #tpu.memory_space<vmem>>, vector<3x10x10x8xf32>
      tpu.vector_store %arg13[%c0, %c0_11, %c0_12, %c0_13], %27 {strides = array<i32>} : memref<3x10x10x8xf32, #tpu.memory_space<vmem>>, vector<3x10x10x8xf32>,
    } else {
    }
    %19 = arith.extui %5 : i1 to i32
    %c0_i32_8 = arith.constant 0 : i32
    %20 = arith.cmpi ne, %19, %c0_i32_8 : i32
    scf.if %20 {
      %c0 = arith.constant 0 : index
      %c0_11 = arith.constant 0 : index
      %c0_12 = arith.constant 0 : index
      %c0_13 = arith.constant 0 : index
      %c0_14 = arith.constant 0 : index
      %27 = vector.load %arg3[%c0, %c0_11, %c0_12, %c0_13, %c0_14] : memref<1x1x8x8x4xf32, #tpu.memory_space<vmem>>, vector<1x1x8x8x4xf32>
      %28 = vector.shape_cast %27 : vector<1x1x8x8x4xf32> to vector<8x8x4xf32>
      %29 = vector.shape_cast %28 : vector<8x8x4xf32> to vector<64x4xf32>
      %c0_15 = arith.constant 0 : index
      %c0_16 = arith.constant 0 : index
      %30 = vector.load %arg4[%c0_15, %c0_16] : memref<1x4xf32, #tpu.memory_space<vmem>>, vector<1x4xf32>
      %cst = arith.constant dense<0.000000e+00> : vector<64xf32>
      %31 = vector.multi_reduction <add>, %29, %cst [1] : vector<64x4xf32> to vector<64xf32>
      %32 = vector.shape_cast %31 : vector<64xf32> to vector<64x1xf32>
      %cst_17 = arith.constant 4.000000e+00 : f32
      %33 = vector.broadcast %cst_17 : f32 to vector<64x1xf32>
      %34 = arith.divf %32, %33 : vector<64x1xf32>
      %35 = vector.broadcast %34 : vector<64x1xf32> to vector<64x4xf32>
      %36 = arith.subf %29, %35 : vector<64x4xf32>
      %37 = arith.mulf %36, %36 : vector<64x4xf32>
      %cst_18 = arith.constant dense<0.000000e+00> : vector<64xf32>
      %38 = vector.multi_reduction <add>, %37, %cst_18 [1] : vector<64x4xf32> to vector<64xf32>
      %39 = vector.shape_cast %38 : vector<64xf32> to vector<64x1xf32>
      %cst_19 = arith.constant 4.000000e+00 : f32
      %40 = vector.broadcast %cst_19 : f32 to vector<64x1xf32>
      %41 = arith.divf %39, %40 : vector<64x1xf32>
      %42 = vector.broadcast %34 : vector<64x1xf32> to vector<64x4xf32>
      %43 = arith.subf %29, %42 : vector<64x4xf32>
      %cst_20 = arith.constant 9.99999974E-6 : f32
      %44 = vector.broadcast %cst_20 : f32 to vector<64x1xf32>
      %45 = arith.addf %41, %44 : vector<64x1xf32>
      %46 = math.rsqrt %45 : vector<64x1xf32>
      %47 = vector.broadcast %46 : vector<64x1xf32> to vector<64x4xf32>
      %48 = arith.mulf %43, %47 : vector<64x4xf32>
      %49 = vector.broadcast %30 : vector<1x4xf32> to vector<64x4xf32>
      %50 = arith.mulf %48, %49 : vector<64x4xf32>
      %cst_21 = arith.constant 5.000000e-01 : f32
      %51 = vector.broadcast %cst_21 : f32 to vector<64x4xf32>
      %52 = arith.mulf %51, %50 : vector<64x4xf32>
      %cst_22 = arith.constant 0.707106769 : f32
      %53 = vector.broadcast %cst_22 : f32 to vector<64x4xf32>
      %54 = arith.mulf %50, %53 : vector<64x4xf32>
      %cst_23 = arith.constant 0.000000e+00 : f32
      %55 = vector.broadcast %cst_23 : f32 to vector<64x4xf32>
      %56 = arith.cmpf oge, %54, %55 : vector<64x4xf32>
      %cst_24 = arith.constant 1.000000e+00 : f32
      %cst_25 = arith.constant -1.000000e+00 : f32
      %57 = vector.broadcast %cst_24 : f32 to vector<64x4xf32>
      %58 = vector.broadcast %cst_25 : f32 to vector<64x4xf32>
      %59 = arith.select %56, %57, %58 : vector<64x4xi1>, vector<64x4xf32>
      %60 = math.absf %54 : vector<64x4xf32>
      %cst_26 = arith.constant 0.327591091 : f32
      %61 = vector.broadcast %cst_26 : f32 to vector<64x4xf32>
      %62 = arith.mulf %61, %60 : vector<64x4xf32>
      %cst_27 = arith.constant 1.000000e+00 : f32
      %63 = vector.broadcast %cst_27 : f32 to vector<64x4xf32>
      %64 = arith.addf %63, %62 : vector<64x4xf32>
      %65 = tpu.reciprocal %64 {approx = true} : vector<64x4xf32> -> vector<64x4xf32>
      %66 = arith.mulf %64, %65 : vector<64x4xf32>
      %cst_28 = arith.constant 2.000000e+00 : f32
      %67 = vector.broadcast %cst_28 : f32 to vector<64x4xf32>
      %68 = arith.subf %67, %66 : vector<64x4xf32>
      %69 = arith.mulf %65, %68 : vector<64x4xf32>
      %cst_29 = arith.constant 1.06140542 : f32
      %70 = vector.broadcast %cst_29 : f32 to vector<64x4xf32>
      %71 = arith.mulf %70, %69 : vector<64x4xf32>
      %cst_30 = arith.constant -1.45315206 : f32
      %72 = vector.broadcast %cst_30 : f32 to vector<64x4xf32>
      %73 = arith.addf %71, %72 : vector<64x4xf32>
      %74 = arith.mulf %73, %69 : vector<64x4xf32>
      %cst_31 = arith.constant 1.42141378 : f32
      %75 = vector.broadcast %cst_31 : f32 to vector<64x4xf32>
      %76 = arith.addf %74, %75 : vector<64x4xf32>
      %77 = arith.mulf %76, %69 : vector<64x4xf32>
      %cst_32 = arith.constant -0.284496725 : f32
      %78 = vector.broadcast %cst_32 : f32 to vector<64x4xf32>
      %79 = arith.addf %77, %78 : vector<64x4xf32>
      %80 = arith.mulf %79, %69 : vector<64x4xf32>
      %cst_33 = arith.constant 0.254829586 : f32
      %81 = vector.broadcast %cst_33 : f32 to vector<64x4xf32>
      %82 = arith.addf %80, %81 : vector<64x4xf32>
      %83 = arith.mulf %82, %69 : vector<64x4xf32>
      %cst_34 = arith.constant 0.000000e+00 : f32
      %84 = vector.broadcast %cst_34 : f32 to vector<64x4xf32>
      %85 = arith.subf %84, %60 : vector<64x4xf32>
      %86 = arith.mulf %85, %60 : vector<64x4xf32>
      %87 = math.exp %86 : vector<64x4xf32>
      %88 = arith.mulf %83, %87 : vector<64x4xf32>
      %cst_35 = arith.constant 1.000000e+00 : f32
      %89 = vector.broadcast %cst_35 : f32 to vector<64x4xf32>
      %90 = arith.subf %89, %88 : vector<64x4xf32>
      %91 = arith.mulf %59, %90 : vector<64x4xf32>
      %cst_36 = arith.constant 1.000000e+00 : f32
      %92 = vector.broadcast %cst_36 : f32 to vector<64x4xf32>
      %93 = arith.addf %92, %91 : vector<64x4xf32>
      %94 = arith.mulf %52, %93 : vector<64x4xf32>
      %c0_37 = arith.constant 0 : index
      %c0_38 = arith.constant 0 : index
      %95 = vector.load %arg5[%c0_37, %c0_38] : memref<4x8xf32, #tpu.memory_space<vmem>>, vector<4x8xf32>
      %cst_39 = arith.constant dense<0.000000e+00> : vector<64x8xf32>
      %96 = tpu.matmul %94, %95, %cst_39 {dimension_numbers = #tpu.dot_dimension_numbers<[1], [0], [0], [1], [0, 0, 1, 1], [], []>} : vector<64x4xf32>, vector<4x8xf32>, vector<64x8xf32> -> vector<64x8xf32>
      %c0_40 = arith.constant 0 : index
      %c0_41 = arith.constant 0 : index
      %97 = vector.load %arg6[%c0_40, %c0_41] : memref<1x8xf32, #tpu.memory_space<vmem>>, vector<1x8xf32>
      %98 = vector.broadcast %97 : vector<1x8xf32> to vector<64x8xf32>
      %99 = arith.addf %96, %98 : vector<64x8xf32>
      %c0_42 = arith.constant 0 : index
      %c0_43 = arith.constant 0 : index
      %100 = vector.load %arg7[%c0_42, %c0_43] : memref<1x8xf32, #tpu.memory_space<vmem>>, vector<1x8xf32>
      %cst_44 = arith.constant dense<0.000000e+00> : vector<64xf32>
      %101 = vector.multi_reduction <add>, %99, %cst_44 [1] : vector<64x8xf32> to vector<64xf32>
      %102 = vector.shape_cast %101 : vector<64xf32> to vector<64x1xf32>
      %cst_45 = arith.constant 8.000000e+00 : f32
      %103 = vector.broadcast %cst_45 : f32 to vector<64x1xf32>
      %104 = arith.divf %102, %103 : vector<64x1xf32>
      %105 = vector.broadcast %104 : vector<64x1xf32> to vector<64x8xf32>
      %106 = arith.subf %99, %105 : vector<64x8xf32>
      %107 = arith.mulf %106, %106 : vector<64x8xf32>
      %cst_46 = arith.constant dense<0.000000e+00> : vector<64xf32>
      %108 = vector.multi_reduction <add>, %107, %cst_46 [1] : vector<64x8xf32> to vector<64xf32>
      %109 = vector.shape_cast %108 : vector<64xf32> to vector<64x1xf32>
      %cst_47 = arith.constant 8.000000e+00 : f32
      %110 = vector.broadcast %cst_47 : f32 to vector<64x1xf32>
      %111 = arith.divf %109, %110 : vector<64x1xf32>
      %112 = vector.broadcast %104 : vector<64x1xf32> to vector<64x8xf32>
      %113 = arith.subf %99, %112 : vector<64x8xf32>
      %cst_48 = arith.constant 9.99999974E-6 : f32
      %114 = vector.broadcast %cst_48 : f32 to vector<64x1xf32>
      %115 = arith.addf %111, %114 : vector<64x1xf32>
      %116 = math.rsqrt %115 : vector<64x1xf32>
      %117 = vector.broadcast %116 : vector<64x1xf32> to vector<64x8xf32>
      %118 = arith.mulf %113, %117 : vector<64x8xf32>
      %119 = vector.broadcast %100 : vector<1x8xf32> to vector<64x8xf32>
      %120 = arith.mulf %118, %119 : vector<64x8xf32>
      %cst_49 = arith.constant 5.000000e-01 : f32
      %121 = vector.broadcast %cst_49 : f32 to vector<64x8xf32>
      %122 = arith.mulf %121, %120 : vector<64x8xf32>
      %cst_50 = arith.constant 0.707106769 : f32
      %123 = vector.broadcast %cst_50 : f32 to vector<64x8xf32>
      %124 = arith.mulf %120, %123 : vector<64x8xf32>
      %cst_51 = arith.constant 0.000000e+00 : f32
      %125 = vector.broadcast %cst_51 : f32 to vector<64x8xf32>
      %126 = arith.cmpf oge, %124, %125 : vector<64x8xf32>
      %cst_52 = arith.constant 1.000000e+00 : f32
      %cst_53 = arith.constant -1.000000e+00 : f32
      %127 = vector.broadcast %cst_52 : f32 to vector<64x8xf32>
      %128 = vector.broadcast %cst_53 : f32 to vector<64x8xf32>
      %129 = arith.select %126, %127, %128 : vector<64x8xi1>, vector<64x8xf32>
      %130 = math.absf %124 : vector<64x8xf32>
      %cst_54 = arith.constant 0.327591091 : f32
      %131 = vector.broadcast %cst_54 : f32 to vector<64x8xf32>
      %132 = arith.mulf %131, %130 : vector<64x8xf32>
      %cst_55 = arith.constant 1.000000e+00 : f32
      %133 = vector.broadcast %cst_55 : f32 to vector<64x8xf32>
      %134 = arith.addf %133, %132 : vector<64x8xf32>
      %135 = tpu.reciprocal %134 {approx = true} : vector<64x8xf32> -> vector<64x8xf32>
      %136 = arith.mulf %134, %135 : vector<64x8xf32>
      %cst_56 = arith.constant 2.000000e+00 : f32
      %137 = vector.broadcast %cst_56 : f32 to vector<64x8xf32>
      %138 = arith.subf %137, %136 : vector<64x8xf32>
      %139 = arith.mulf %135, %138 : vector<64x8xf32>
      %cst_57 = arith.constant 1.06140542 : f32
      %140 = vector.broadcast %cst_57 : f32 to vector<64x8xf32>
      %141 = arith.mulf %140, %139 : vector<64x8xf32>
      %cst_58 = arith.constant -1.45315206 : f32
      %142 = vector.broadcast %cst_58 : f32 to vector<64x8xf32>
      %143 = arith.addf %141, %142 : vector<64x8xf32>
      %144 = arith.mulf %143, %139 : vector<64x8xf32>
      %cst_59 = arith.constant 1.42141378 : f32
      %145 = vector.broadcast %cst_59 : f32 to vector<64x8xf32>
      %146 = arith.addf %144, %145 : vector<64x8xf32>
      %147 = arith.mulf %146, %139 : vector<64x8xf32>
      %cst_60 = arith.constant -0.284496725 : f32
      %148 = vector.broadcast %cst_60 : f32 to vector<64x8xf32>
      %149 = arith.addf %147, %148 : vector<64x8xf32>
      %150 = arith.mulf %149, %139 : vector<64x8xf32>
      %cst_61 = arith.constant 0.254829586 : f32
      %151 = vector.broadcast %cst_61 : f32 to vector<64x8xf32>
      %152 = arith.addf %150, %151 : vector<64x8xf32>
      %153 = arith.mulf %152, %139 : vector<64x8xf32>
      %cst_62 = arith.constant 0.000000e+00 : f32
      %154 = vector.broadcast %cst_62 : f32 to vector<64x8xf32>
      %155 = arith.subf %154, %130 : vector<64x8xf32>
      %156 = arith.mulf %155, %130 : vector<64x8xf32>
      %157 = math.exp %156 : vector<64x8xf32>
      %158 = arith.mulf %153, %157 : vector<64x8xf32>
      %cst_63 = arith.constant 1.000000e+00 : f32
      %159 = vector.broadcast %cst_63 : f32 to vector<64x8xf32>
      %160 = arith.subf %159, %158 : vector<64x8xf32>
      %161 = arith.mulf %129, %160 : vector<64x8xf32>
      %cst_64 = arith.constant 1.000000e+00 : f32
      %162 = vector.broadcast %cst_64 : f32 to vector<64x8xf32>
      %163 = arith.addf %162, %161 : vector<64x8xf32>
      %164 = arith.mulf %122, %163 : vector<64x8xf32>
      %165 = vector.shape_cast %164 : vector<64x8xf32> to vector<8x8x8xf32>
      %166 = arith.index_cast %15 : i32 to index
      %c1 = arith.constant 1 : index
      %c1_65 = arith.constant 1 : index
      %c0_66 = arith.constant 0 : index
      %167 = vector.load %arg13[%166, %c1, %c1_65, %c0_66] : memref<3x10x10x8xf32, #tpu.memory_space<vmem>>, vector<1x8x8x8xf32>
      %168 = vector.shape_cast %167 : vector<1x8x8x8xf32> to vector<8x8x8xf32>
      %169 = vector.shape_cast %165 : vector<8x8x8xf32> to vector<1x8x8x8xf32>
      tpu.vector_store %arg13[%166, %c1, %c1_65, %c0_66], %169 {strides = array<i32>} : memref<3x10x10x8xf32, #tpu.memory_space<vmem>>, vector<1x8x8x8xf32>,
      %c0_67 = arith.constant 0 : index
      %c0_68 = arith.constant 0 : index
      %170 = vector.load %arg10[%c0_67, %c0_68] : memref<4x8xf32, #tpu.memory_space<vmem>>, vector<4x8xf32>
      %cst_69 = arith.constant dense<0.000000e+00> : vector<64x8xf32>
      %171 = tpu.matmul %29, %170, %cst_69 {dimension_numbers = #tpu.dot_dimension_numbers<[1], [0], [0], [1], [0, 0, 1, 1], [], []>} : vector<64x4xf32>, vector<4x8xf32>, vector<64x8xf32> -> vector<64x8xf32>
      %c0_70 = arith.constant 0 : index
      %c0_71 = arith.constant 0 : index
      %172 = vector.load %arg11[%c0_70, %c0_71] : memref<1x8xf32, #tpu.memory_space<vmem>>, vector<1x8xf32>
      %173 = vector.broadcast %172 : vector<1x8xf32> to vector<64x8xf32>
      %174 = arith.addf %171, %173 : vector<64x8xf32>
      %175 = vector.shape_cast %174 : vector<64x8xf32> to vector<8x8x8xf32>
      %c2_i32_72 = arith.constant 2 : i32
      %c0_i32_73 = arith.constant 0 : i32
      %176 = arith.cmpi eq, %c2_i32_72, %c0_i32_73 : i32
      %c1_i32_74 = arith.constant 1 : i32
      %177 = arith.select %176, %c1_i32_74, %c2_i32_72 : i32
      %178 = arith.remsi %arg2, %177 : i32
      %c0_i32_75 = arith.constant 0 : i32
      %179 = arith.cmpi ne, %178, %c0_i32_75 : i32
      %c0_i32_76 = arith.constant 0 : i32
      %180 = arith.cmpi slt, %178, %c0_i32_76 : i32
      %c0_i32_77 = arith.constant 0 : i32
      %181 = arith.cmpi slt, %177, %c0_i32_77 : i32
      %182 = arith.xori %180, %181 : i1
      %183 = arith.andi %182, %179 : i1
      %184 = arith.addi %178, %177 : i32
      %185 = arith.select %183, %184, %178 : i32
      %186 = arith.index_cast %185 : i32 to index
      %c0_78 = arith.constant 0 : index
      %c0_79 = arith.constant 0 : index
      %c0_80 = arith.constant 0 : index
      %187 = vector.load %arg14[%186, %c0_78, %c0_79, %c0_80] : memref<2x8x8x8xf32, #tpu.memory_space<vmem>>, vector<1x8x8x8xf32>
      %188 = vector.shape_cast %187 : vector<1x8x8x8xf32> to vector<8x8x8xf32>
      %189 = vector.shape_cast %175 : vector<8x8x8xf32> to vector<1x8x8x8xf32>
      tpu.vector_store %arg14[%186, %c0_78, %c0_79, %c0_80], %189 {strides = array<i32>} : memref<2x8x8x8xf32, #tpu.memory_space<vmem>>, vector<1x8x8x8xf32>,
    } else {
    }
    %true = arith.constant true
    %21 = arith.xori %5, %true : i1
    %22 = arith.extui %21 : i1 to i32
    %c0_i32_9 = arith.constant 0 : i32
    %23 = arith.cmpi ne, %22, %c0_i32_9 : i32
    scf.if %23 {
      %cst = arith.constant 0.000000e+00 : f32
      %27 = vector.broadcast %cst : f32 to vector<10x10x8xf32>
      %28 = arith.index_cast %15 : i32 to index
      %c0 = arith.constant 0 : index
      %c0_11 = arith.constant 0 : index
      %c0_12 = arith.constant 0 : index
      %29 = vector.load %arg13[%28, %c0, %c0_11, %c0_12] : memref<3x10x10x8xf32, #tpu.memory_space<vmem>>, vector<1x10x10x8xf32>
      %30 = vector.shape_cast %29 : vector<1x10x10x8xf32> to vector<10x10x8xf32>
      %31 = vector.shape_cast %27 : vector<10x10x8xf32> to vector<1x10x10x8xf32>
      tpu.vector_store %arg13[%28, %c0, %c0_11, %c0_12], %31 {strides = array<i32>} : memref<3x10x10x8xf32, #tpu.memory_space<vmem>>, vector<1x10x10x8xf32>,
    } else {
    }
    %c2_i32 = arith.constant 2 : i32
    %24 = arith.cmpi sge, %arg2, %c2_i32 : i32
    %25 = arith.extui %24 : i1 to i32
    %c0_i32_10 = arith.constant 0 : i32
    %26 = arith.cmpi ne, %25, %c0_i32_10 : i32
    scf.if %26 {
      %c0 = arith.constant 0 : index
      %c0_11 = arith.constant 0 : index
      %27 = vector.load %arg9[%c0, %c0_11] : memref<1x8xf32, #tpu.memory_space<vmem>>, vector<1x8xf32>
      %cst = arith.constant 0.000000e+00 : f32
      %28 = vector.broadcast %cst : f32 to vector<8x8x8xf32>
      %29 = vector.shape_cast %27 : vector<1x8xf32> to vector<1x1x8xf32>
      %30 = vector.broadcast %29 : vector<1x1x8xf32> to vector<8x8x8xf32>
      %31 = arith.addf %30, %28 : vector<8x8x8xf32>
      %c2_i32_12 = arith.constant 2 : i32
      %32 = arith.subi %arg2, %c2_i32_12 : i32
      %c0_i32_13 = arith.constant 0 : i32
      %33 = arith.addi %32, %c0_i32_13 : i32
      %c3_i32_14 = arith.constant 3 : i32
      %c0_i32_15 = arith.constant 0 : i32
      %34 = arith.cmpi eq, %c3_i32_14, %c0_i32_15 : i32
      %c1_i32_16 = arith.constant 1 : i32
      %35 = arith.select %34, %c1_i32_16, %c3_i32_14 : i32
      %36 = arith.remsi %33, %35 : i32
      %c0_i32_17 = arith.constant 0 : i32
      %37 = arith.cmpi ne, %36, %c0_i32_17 : i32
      %c0_i32_18 = arith.constant 0 : i32
      %38 = arith.cmpi slt, %36, %c0_i32_18 : i32
      %c0_i32_19 = arith.constant 0 : i32
      %39 = arith.cmpi slt, %35, %c0_i32_19 : i32
      %40 = arith.xori %38, %39 : i1
      %41 = arith.andi %40, %37 : i1
      %42 = arith.addi %36, %35 : i32
      %43 = arith.select %41, %42, %36 : i32
      %44 = arith.index_cast %43 : i32 to index
      %c0_20 = arith.constant 0 : index
      %c0_21 = arith.constant 0 : index
      %c0_22 = arith.constant 0 : index
      %45 = vector.load %arg13[%44, %c0_20, %c0_21, %c0_22] : memref<3x10x10x8xf32, #tpu.memory_space<vmem>>, vector<1x8x8x8xf32>
      %46 = vector.shape_cast %45 : vector<1x8x8x8xf32> to vector<8x8x8xf32>
      %c0_23 = arith.constant 0 : index
      %c0_24 = arith.constant 0 : index
      %c0_25 = arith.constant 0 : index
      %47 = vector.load %arg8[%c0_23, %c0_24, %c0_25] : memref<27x1x8xf32, #tpu.memory_space<vmem>>, vector<1x1x8xf32>
      %48 = vector.shape_cast %47 : vector<1x1x8xf32> to vector<1x8xf32>
      %49 = vector.shape_cast %48 : vector<1x8xf32> to vector<1x1x8xf32>
      %50 = vector.broadcast %49 : vector<1x1x8xf32> to vector<8x8x8xf32>
      %51 = arith.mulf %46, %50 : vector<8x8x8xf32>
      %52 = arith.addf %31, %51 : vector<8x8x8xf32>
      %53 = arith.index_cast %43 : i32 to index
      %c0_26 = arith.constant 0 : index
      %c1 = arith.constant 1 : index
      %c0_27 = arith.constant 0 : index
      %54 = vector.load %arg13[%53, %c0_26, %c1, %c0_27] : memref<3x10x10x8xf32, #tpu.memory_space<vmem>>, vector<1x8x8x8xf32>
      %55 = vector.shape_cast %54 : vector<1x8x8x8xf32> to vector<8x8x8xf32>
      %c1_28 = arith.constant 1 : index
      %c0_29 = arith.constant 0 : index
      %c0_30 = arith.constant 0 : index
      %56 = vector.load %arg8[%c1_28, %c0_29, %c0_30] : memref<27x1x8xf32, #tpu.memory_space<vmem>>, vector<1x1x8xf32>
      %57 = vector.shape_cast %56 : vector<1x1x8xf32> to vector<1x8xf32>
      %58 = vector.shape_cast %57 : vector<1x8xf32> to vector<1x1x8xf32>
      %59 = vector.broadcast %58 : vector<1x1x8xf32> to vector<8x8x8xf32>
      %60 = arith.mulf %55, %59 : vector<8x8x8xf32>
      %61 = arith.addf %52, %60 : vector<8x8x8xf32>
      %62 = arith.index_cast %43 : i32 to index
      %c0_31 = arith.constant 0 : index
      %c2 = arith.constant 2 : index
      %c0_32 = arith.constant 0 : index
      %63 = vector.load %arg13[%62, %c0_31, %c2, %c0_32] : memref<3x10x10x8xf32, #tpu.memory_space<vmem>>, vector<1x8x8x8xf32>
      %64 = vector.shape_cast %63 : vector<1x8x8x8xf32> to vector<8x8x8xf32>
      %c2_33 = arith.constant 2 : index
      %c0_34 = arith.constant 0 : index
      %c0_35 = arith.constant 0 : index
      %65 = vector.load %arg8[%c2_33, %c0_34, %c0_35] : memref<27x1x8xf32, #tpu.memory_space<vmem>>, vector<1x1x8xf32>
      %66 = vector.shape_cast %65 : vector<1x1x8xf32> to vector<1x8xf32>
      %67 = vector.shape_cast %66 : vector<1x8xf32> to vector<1x1x8xf32>
      %68 = vector.broadcast %67 : vector<1x1x8xf32> to vector<8x8x8xf32>
      %69 = arith.mulf %64, %68 : vector<8x8x8xf32>
      %70 = arith.addf %61, %69 : vector<8x8x8xf32>
      %71 = arith.index_cast %43 : i32 to index
      %c1_36 = arith.constant 1 : index
      %c0_37 = arith.constant 0 : index
      %c0_38 = arith.constant 0 : index
      %72 = vector.load %arg13[%71, %c1_36, %c0_37, %c0_38] : memref<3x10x10x8xf32, #tpu.memory_space<vmem>>, vector<1x8x8x8xf32>
      %73 = vector.shape_cast %72 : vector<1x8x8x8xf32> to vector<8x8x8xf32>
      %c3 = arith.constant 3 : index
      %c0_39 = arith.constant 0 : index
      %c0_40 = arith.constant 0 : index
      %74 = vector.load %arg8[%c3, %c0_39, %c0_40] : memref<27x1x8xf32, #tpu.memory_space<vmem>>, vector<1x1x8xf32>
      %75 = vector.shape_cast %74 : vector<1x1x8xf32> to vector<1x8xf32>
      %76 = vector.shape_cast %75 : vector<1x8xf32> to vector<1x1x8xf32>
      %77 = vector.broadcast %76 : vector<1x1x8xf32> to vector<8x8x8xf32>
      %78 = arith.mulf %73, %77 : vector<8x8x8xf32>
      %79 = arith.addf %70, %78 : vector<8x8x8xf32>
      %80 = arith.index_cast %43 : i32 to index
      %c1_41 = arith.constant 1 : index
      %c1_42 = arith.constant 1 : index
      %c0_43 = arith.constant 0 : index
      %81 = vector.load %arg13[%80, %c1_41, %c1_42, %c0_43] : memref<3x10x10x8xf32, #tpu.memory_space<vmem>>, vector<1x8x8x8xf32>
      %82 = vector.shape_cast %81 : vector<1x8x8x8xf32> to vector<8x8x8xf32>
      %c4 = arith.constant 4 : index
      %c0_44 = arith.constant 0 : index
      %c0_45 = arith.constant 0 : index
      %83 = vector.load %arg8[%c4, %c0_44, %c0_45] : memref<27x1x8xf32, #tpu.memory_space<vmem>>, vector<1x1x8xf32>
      %84 = vector.shape_cast %83 : vector<1x1x8xf32> to vector<1x8xf32>
      %85 = vector.shape_cast %84 : vector<1x8xf32> to vector<1x1x8xf32>
      %86 = vector.broadcast %85 : vector<1x1x8xf32> to vector<8x8x8xf32>
      %87 = arith.mulf %82, %86 : vector<8x8x8xf32>
      %88 = arith.addf %79, %87 : vector<8x8x8xf32>
      %89 = arith.index_cast %43 : i32 to index
      %c1_46 = arith.constant 1 : index
      %c2_47 = arith.constant 2 : index
      %c0_48 = arith.constant 0 : index
      %90 = vector.load %arg13[%89, %c1_46, %c2_47, %c0_48] : memref<3x10x10x8xf32, #tpu.memory_space<vmem>>, vector<1x8x8x8xf32>
      %91 = vector.shape_cast %90 : vector<1x8x8x8xf32> to vector<8x8x8xf32>
      %c5 = arith.constant 5 : index
      %c0_49 = arith.constant 0 : index
      %c0_50 = arith.constant 0 : index
      %92 = vector.load %arg8[%c5, %c0_49, %c0_50] : memref<27x1x8xf32, #tpu.memory_space<vmem>>, vector<1x1x8xf32>
      %93 = vector.shape_cast %92 : vector<1x1x8xf32> to vector<1x8xf32>
      %94 = vector.shape_cast %93 : vector<1x8xf32> to vector<1x1x8xf32>
      %95 = vector.broadcast %94 : vector<1x1x8xf32> to vector<8x8x8xf32>
      %96 = arith.mulf %91, %95 : vector<8x8x8xf32>
      %97 = arith.addf %88, %96 : vector<8x8x8xf32>
      %98 = arith.index_cast %43 : i32 to index
      %c2_51 = arith.constant 2 : index
      %c0_52 = arith.constant 0 : index
      %c0_53 = arith.constant 0 : index
      %99 = vector.load %arg13[%98, %c2_51, %c0_52, %c0_53] : memref<3x10x10x8xf32, #tpu.memory_space<vmem>>, vector<1x8x8x8xf32>
      %100 = vector.shape_cast %99 : vector<1x8x8x8xf32> to vector<8x8x8xf32>
      %c6 = arith.constant 6 : index
      %c0_54 = arith.constant 0 : index
      %c0_55 = arith.constant 0 : index
      %101 = vector.load %arg8[%c6, %c0_54, %c0_55] : memref<27x1x8xf32, #tpu.memory_space<vmem>>, vector<1x1x8xf32>
      %102 = vector.shape_cast %101 : vector<1x1x8xf32> to vector<1x8xf32>
      %103 = vector.shape_cast %102 : vector<1x8xf32> to vector<1x1x8xf32>
      %104 = vector.broadcast %103 : vector<1x1x8xf32> to vector<8x8x8xf32>
      %105 = arith.mulf %100, %104 : vector<8x8x8xf32>
      %106 = arith.addf %97, %105 : vector<8x8x8xf32>
      %107 = arith.index_cast %43 : i32 to index
      %c2_56 = arith.constant 2 : index
      %c1_57 = arith.constant 1 : index
      %c0_58 = arith.constant 0 : index
      %108 = vector.load %arg13[%107, %c2_56, %c1_57, %c0_58] : memref<3x10x10x8xf32, #tpu.memory_space<vmem>>, vector<1x8x8x8xf32>
      %109 = vector.shape_cast %108 : vector<1x8x8x8xf32> to vector<8x8x8xf32>
      %c7 = arith.constant 7 : index
      %c0_59 = arith.constant 0 : index
      %c0_60 = arith.constant 0 : index
      %110 = vector.load %arg8[%c7, %c0_59, %c0_60] : memref<27x1x8xf32, #tpu.memory_space<vmem>>, vector<1x1x8xf32>
      %111 = vector.shape_cast %110 : vector<1x1x8xf32> to vector<1x8xf32>
      %112 = vector.shape_cast %111 : vector<1x8xf32> to vector<1x1x8xf32>
      %113 = vector.broadcast %112 : vector<1x1x8xf32> to vector<8x8x8xf32>
      %114 = arith.mulf %109, %113 : vector<8x8x8xf32>
      %115 = arith.addf %106, %114 : vector<8x8x8xf32>
      %116 = arith.index_cast %43 : i32 to index
      %c2_61 = arith.constant 2 : index
      %c2_62 = arith.constant 2 : index
      %c0_63 = arith.constant 0 : index
      %117 = vector.load %arg13[%116, %c2_61, %c2_62, %c0_63] : memref<3x10x10x8xf32, #tpu.memory_space<vmem>>, vector<1x8x8x8xf32>
      %118 = vector.shape_cast %117 : vector<1x8x8x8xf32> to vector<8x8x8xf32>
      %c8 = arith.constant 8 : index
      %c0_64 = arith.constant 0 : index
      %c0_65 = arith.constant 0 : index
      %119 = vector.load %arg8[%c8, %c0_64, %c0_65] : memref<27x1x8xf32, #tpu.memory_space<vmem>>, vector<1x1x8xf32>
      %120 = vector.shape_cast %119 : vector<1x1x8xf32> to vector<1x8xf32>
      %121 = vector.shape_cast %120 : vector<1x8xf32> to vector<1x1x8xf32>
      %122 = vector.broadcast %121 : vector<1x1x8xf32> to vector<8x8x8xf32>
      %123 = arith.mulf %118, %122 : vector<8x8x8xf32>
      %124 = arith.addf %115, %123 : vector<8x8x8xf32>
      %c2_i32_66 = arith.constant 2 : i32
      %125 = arith.subi %arg2, %c2_i32_66 : i32
      %c1_i32_67 = arith.constant 1 : i32
      %126 = arith.addi %125, %c1_i32_67 : i32
      %c3_i32_68 = arith.constant 3 : i32
      %c0_i32_69 = arith.constant 0 : i32
      %127 = arith.cmpi eq, %c3_i32_68, %c0_i32_69 : i32
      %c1_i32_70 = arith.constant 1 : i32
      %128 = arith.select %127, %c1_i32_70, %c3_i32_68 : i32
      %129 = arith.remsi %126, %128 : i32
      %c0_i32_71 = arith.constant 0 : i32
      %130 = arith.cmpi ne, %129, %c0_i32_71 : i32
      %c0_i32_72 = arith.constant 0 : i32
      %131 = arith.cmpi slt, %129, %c0_i32_72 : i32
      %c0_i32_73 = arith.constant 0 : i32
      %132 = arith.cmpi slt, %128, %c0_i32_73 : i32
      %133 = arith.xori %131, %132 : i1
      %134 = arith.andi %133, %130 : i1
      %135 = arith.addi %129, %128 : i32
      %136 = arith.select %134, %135, %129 : i32
      %137 = arith.index_cast %136 : i32 to index
      %c0_74 = arith.constant 0 : index
      %c0_75 = arith.constant 0 : index
      %c0_76 = arith.constant 0 : index
      %138 = vector.load %arg13[%137, %c0_74, %c0_75, %c0_76] : memref<3x10x10x8xf32, #tpu.memory_space<vmem>>, vector<1x8x8x8xf32>
      %139 = vector.shape_cast %138 : vector<1x8x8x8xf32> to vector<8x8x8xf32>
      %c9 = arith.constant 9 : index
      %c0_77 = arith.constant 0 : index
      %c0_78 = arith.constant 0 : index
      %140 = vector.load %arg8[%c9, %c0_77, %c0_78] : memref<27x1x8xf32, #tpu.memory_space<vmem>>, vector<1x1x8xf32>
      %141 = vector.shape_cast %140 : vector<1x1x8xf32> to vector<1x8xf32>
      %142 = vector.shape_cast %141 : vector<1x8xf32> to vector<1x1x8xf32>
      %143 = vector.broadcast %142 : vector<1x1x8xf32> to vector<8x8x8xf32>
      %144 = arith.mulf %139, %143 : vector<8x8x8xf32>
      %145 = arith.addf %124, %144 : vector<8x8x8xf32>
      %146 = arith.index_cast %136 : i32 to index
      %c0_79 = arith.constant 0 : index
      %c1_80 = arith.constant 1 : index
      %c0_81 = arith.constant 0 : index
      %147 = vector.load %arg13[%146, %c0_79, %c1_80, %c0_81] : memref<3x10x10x8xf32, #tpu.memory_space<vmem>>, vector<1x8x8x8xf32>
      %148 = vector.shape_cast %147 : vector<1x8x8x8xf32> to vector<8x8x8xf32>
      %c10 = arith.constant 10 : index
      %c0_82 = arith.constant 0 : index
      %c0_83 = arith.constant 0 : index
      %149 = vector.load %arg8[%c10, %c0_82, %c0_83] : memref<27x1x8xf32, #tpu.memory_space<vmem>>, vector<1x1x8xf32>
      %150 = vector.shape_cast %149 : vector<1x1x8xf32> to vector<1x8xf32>
      %151 = vector.shape_cast %150 : vector<1x8xf32> to vector<1x1x8xf32>
      %152 = vector.broadcast %151 : vector<1x1x8xf32> to vector<8x8x8xf32>
      %153 = arith.mulf %148, %152 : vector<8x8x8xf32>
      %154 = arith.addf %145, %153 : vector<8x8x8xf32>
      %155 = arith.index_cast %136 : i32 to index
      %c0_84 = arith.constant 0 : index
      %c2_85 = arith.constant 2 : index
      %c0_86 = arith.constant 0 : index
      %156 = vector.load %arg13[%155, %c0_84, %c2_85, %c0_86] : memref<3x10x10x8xf32, #tpu.memory_space<vmem>>, vector<1x8x8x8xf32>
      %157 = vector.shape_cast %156 : vector<1x8x8x8xf32> to vector<8x8x8xf32>
      %c11 = arith.constant 11 : index
      %c0_87 = arith.constant 0 : index
      %c0_88 = arith.constant 0 : index
      %158 = vector.load %arg8[%c11, %c0_87, %c0_88] : memref<27x1x8xf32, #tpu.memory_space<vmem>>, vector<1x1x8xf32>
      %159 = vector.shape_cast %158 : vector<1x1x8xf32> to vector<1x8xf32>
      %160 = vector.shape_cast %159 : vector<1x8xf32> to vector<1x1x8xf32>
      %161 = vector.broadcast %160 : vector<1x1x8xf32> to vector<8x8x8xf32>
      %162 = arith.mulf %157, %161 : vector<8x8x8xf32>
      %163 = arith.addf %154, %162 : vector<8x8x8xf32>
      %164 = arith.index_cast %136 : i32 to index
      %c1_89 = arith.constant 1 : index
      %c0_90 = arith.constant 0 : index
      %c0_91 = arith.constant 0 : index
      %165 = vector.load %arg13[%164, %c1_89, %c0_90, %c0_91] : memref<3x10x10x8xf32, #tpu.memory_space<vmem>>, vector<1x8x8x8xf32>
      %166 = vector.shape_cast %165 : vector<1x8x8x8xf32> to vector<8x8x8xf32>
      %c12 = arith.constant 12 : index
      %c0_92 = arith.constant 0 : index
      %c0_93 = arith.constant 0 : index
      %167 = vector.load %arg8[%c12, %c0_92, %c0_93] : memref<27x1x8xf32, #tpu.memory_space<vmem>>, vector<1x1x8xf32>
      %168 = vector.shape_cast %167 : vector<1x1x8xf32> to vector<1x8xf32>
      %169 = vector.shape_cast %168 : vector<1x8xf32> to vector<1x1x8xf32>
      %170 = vector.broadcast %169 : vector<1x1x8xf32> to vector<8x8x8xf32>
      %171 = arith.mulf %166, %170 : vector<8x8x8xf32>
      %172 = arith.addf %163, %171 : vector<8x8x8xf32>
      %173 = arith.index_cast %136 : i32 to index
      %c1_94 = arith.constant 1 : index
      %c1_95 = arith.constant 1 : index
      %c0_96 = arith.constant 0 : index
      %174 = vector.load %arg13[%173, %c1_94, %c1_95, %c0_96] : memref<3x10x10x8xf32, #tpu.memory_space<vmem>>, vector<1x8x8x8xf32>
      %175 = vector.shape_cast %174 : vector<1x8x8x8xf32> to vector<8x8x8xf32>
      %c13 = arith.constant 13 : index
      %c0_97 = arith.constant 0 : index
      %c0_98 = arith.constant 0 : index
      %176 = vector.load %arg8[%c13, %c0_97, %c0_98] : memref<27x1x8xf32, #tpu.memory_space<vmem>>, vector<1x1x8xf32>
      %177 = vector.shape_cast %176 : vector<1x1x8xf32> to vector<1x8xf32>
      %178 = vector.shape_cast %177 : vector<1x8xf32> to vector<1x1x8xf32>
      %179 = vector.broadcast %178 : vector<1x1x8xf32> to vector<8x8x8xf32>
      %180 = arith.mulf %175, %179 : vector<8x8x8xf32>
      %181 = arith.addf %172, %180 : vector<8x8x8xf32>
      %182 = arith.index_cast %136 : i32 to index
      %c1_99 = arith.constant 1 : index
      %c2_100 = arith.constant 2 : index
      %c0_101 = arith.constant 0 : index
      %183 = vector.load %arg13[%182, %c1_99, %c2_100, %c0_101] : memref<3x10x10x8xf32, #tpu.memory_space<vmem>>, vector<1x8x8x8xf32>
      %184 = vector.shape_cast %183 : vector<1x8x8x8xf32> to vector<8x8x8xf32>
      %c14 = arith.constant 14 : index
      %c0_102 = arith.constant 0 : index
      %c0_103 = arith.constant 0 : index
      %185 = vector.load %arg8[%c14, %c0_102, %c0_103] : memref<27x1x8xf32, #tpu.memory_space<vmem>>, vector<1x1x8xf32>
      %186 = vector.shape_cast %185 : vector<1x1x8xf32> to vector<1x8xf32>
      %187 = vector.shape_cast %186 : vector<1x8xf32> to vector<1x1x8xf32>
      %188 = vector.broadcast %187 : vector<1x1x8xf32> to vector<8x8x8xf32>
      %189 = arith.mulf %184, %188 : vector<8x8x8xf32>
      %190 = arith.addf %181, %189 : vector<8x8x8xf32>
      %191 = arith.index_cast %136 : i32 to index
      %c2_104 = arith.constant 2 : index
      %c0_105 = arith.constant 0 : index
      %c0_106 = arith.constant 0 : index
      %192 = vector.load %arg13[%191, %c2_104, %c0_105, %c0_106] : memref<3x10x10x8xf32, #tpu.memory_space<vmem>>, vector<1x8x8x8xf32>
      %193 = vector.shape_cast %192 : vector<1x8x8x8xf32> to vector<8x8x8xf32>
      %c15 = arith.constant 15 : index
      %c0_107 = arith.constant 0 : index
      %c0_108 = arith.constant 0 : index
      %194 = vector.load %arg8[%c15, %c0_107, %c0_108] : memref<27x1x8xf32, #tpu.memory_space<vmem>>, vector<1x1x8xf32>
      %195 = vector.shape_cast %194 : vector<1x1x8xf32> to vector<1x8xf32>
      %196 = vector.shape_cast %195 : vector<1x8xf32> to vector<1x1x8xf32>
      %197 = vector.broadcast %196 : vector<1x1x8xf32> to vector<8x8x8xf32>
      %198 = arith.mulf %193, %197 : vector<8x8x8xf32>
      %199 = arith.addf %190, %198 : vector<8x8x8xf32>
      %200 = arith.index_cast %136 : i32 to index
      %c2_109 = arith.constant 2 : index
      %c1_110 = arith.constant 1 : index
      %c0_111 = arith.constant 0 : index
      %201 = vector.load %arg13[%200, %c2_109, %c1_110, %c0_111] : memref<3x10x10x8xf32, #tpu.memory_space<vmem>>, vector<1x8x8x8xf32>
      %202 = vector.shape_cast %201 : vector<1x8x8x8xf32> to vector<8x8x8xf32>
      %c16 = arith.constant 16 : index
      %c0_112 = arith.constant 0 : index
      %c0_113 = arith.constant 0 : index
      %203 = vector.load %arg8[%c16, %c0_112, %c0_113] : memref<27x1x8xf32, #tpu.memory_space<vmem>>, vector<1x1x8xf32>
      %204 = vector.shape_cast %203 : vector<1x1x8xf32> to vector<1x8xf32>
      %205 = vector.shape_cast %204 : vector<1x8xf32> to vector<1x1x8xf32>
      %206 = vector.broadcast %205 : vector<1x1x8xf32> to vector<8x8x8xf32>
      %207 = arith.mulf %202, %206 : vector<8x8x8xf32>
      %208 = arith.addf %199, %207 : vector<8x8x8xf32>
      %209 = arith.index_cast %136 : i32 to index
      %c2_114 = arith.constant 2 : index
      %c2_115 = arith.constant 2 : index
      %c0_116 = arith.constant 0 : index
      %210 = vector.load %arg13[%209, %c2_114, %c2_115, %c0_116] : memref<3x10x10x8xf32, #tpu.memory_space<vmem>>, vector<1x8x8x8xf32>
      %211 = vector.shape_cast %210 : vector<1x8x8x8xf32> to vector<8x8x8xf32>
      %c17 = arith.constant 17 : index
      %c0_117 = arith.constant 0 : index
      %c0_118 = arith.constant 0 : index
      %212 = vector.load %arg8[%c17, %c0_117, %c0_118] : memref<27x1x8xf32, #tpu.memory_space<vmem>>, vector<1x1x8xf32>
      %213 = vector.shape_cast %212 : vector<1x1x8xf32> to vector<1x8xf32>
      %214 = vector.shape_cast %213 : vector<1x8xf32> to vector<1x1x8xf32>
      %215 = vector.broadcast %214 : vector<1x1x8xf32> to vector<8x8x8xf32>
      %216 = arith.mulf %211, %215 : vector<8x8x8xf32>
      %217 = arith.addf %208, %216 : vector<8x8x8xf32>
      %c2_i32_119 = arith.constant 2 : i32
      %218 = arith.subi %arg2, %c2_i32_119 : i32
      %c2_i32_120 = arith.constant 2 : i32
      %219 = arith.addi %218, %c2_i32_120 : i32
      %c3_i32_121 = arith.constant 3 : i32
      %c0_i32_122 = arith.constant 0 : i32
      %220 = arith.cmpi eq, %c3_i32_121, %c0_i32_122 : i32
      %c1_i32_123 = arith.constant 1 : i32
      %221 = arith.select %220, %c1_i32_123, %c3_i32_121 : i32
      %222 = arith.remsi %219, %221 : i32
      %c0_i32_124 = arith.constant 0 : i32
      %223 = arith.cmpi ne, %222, %c0_i32_124 : i32
      %c0_i32_125 = arith.constant 0 : i32
      %224 = arith.cmpi slt, %222, %c0_i32_125 : i32
      %c0_i32_126 = arith.constant 0 : i32
      %225 = arith.cmpi slt, %221, %c0_i32_126 : i32
      %226 = arith.xori %224, %225 : i1
      %227 = arith.andi %226, %223 : i1
      %228 = arith.addi %222, %221 : i32
      %229 = arith.select %227, %228, %222 : i32
      %230 = arith.index_cast %229 : i32 to index
      %c0_127 = arith.constant 0 : index
      %c0_128 = arith.constant 0 : index
      %c0_129 = arith.constant 0 : index
      %231 = vector.load %arg13[%230, %c0_127, %c0_128, %c0_129] : memref<3x10x10x8xf32, #tpu.memory_space<vmem>>, vector<1x8x8x8xf32>
      %232 = vector.shape_cast %231 : vector<1x8x8x8xf32> to vector<8x8x8xf32>
      %c18 = arith.constant 18 : index
      %c0_130 = arith.constant 0 : index
      %c0_131 = arith.constant 0 : index
      %233 = vector.load %arg8[%c18, %c0_130, %c0_131] : memref<27x1x8xf32, #tpu.memory_space<vmem>>, vector<1x1x8xf32>
      %234 = vector.shape_cast %233 : vector<1x1x8xf32> to vector<1x8xf32>
      %235 = vector.shape_cast %234 : vector<1x8xf32> to vector<1x1x8xf32>
      %236 = vector.broadcast %235 : vector<1x1x8xf32> to vector<8x8x8xf32>
      %237 = arith.mulf %232, %236 : vector<8x8x8xf32>
      %238 = arith.addf %217, %237 : vector<8x8x8xf32>
      %239 = arith.index_cast %229 : i32 to index
      %c0_132 = arith.constant 0 : index
      %c1_133 = arith.constant 1 : index
      %c0_134 = arith.constant 0 : index
      %240 = vector.load %arg13[%239, %c0_132, %c1_133, %c0_134] : memref<3x10x10x8xf32, #tpu.memory_space<vmem>>, vector<1x8x8x8xf32>
      %241 = vector.shape_cast %240 : vector<1x8x8x8xf32> to vector<8x8x8xf32>
      %c19 = arith.constant 19 : index
      %c0_135 = arith.constant 0 : index
      %c0_136 = arith.constant 0 : index
      %242 = vector.load %arg8[%c19, %c0_135, %c0_136] : memref<27x1x8xf32, #tpu.memory_space<vmem>>, vector<1x1x8xf32>
      %243 = vector.shape_cast %242 : vector<1x1x8xf32> to vector<1x8xf32>
      %244 = vector.shape_cast %243 : vector<1x8xf32> to vector<1x1x8xf32>
      %245 = vector.broadcast %244 : vector<1x1x8xf32> to vector<8x8x8xf32>
      %246 = arith.mulf %241, %245 : vector<8x8x8xf32>
      %247 = arith.addf %238, %246 : vector<8x8x8xf32>
      %248 = arith.index_cast %229 : i32 to index
      %c0_137 = arith.constant 0 : index
      %c2_138 = arith.constant 2 : index
      %c0_139 = arith.constant 0 : index
      %249 = vector.load %arg13[%248, %c0_137, %c2_138, %c0_139] : memref<3x10x10x8xf32, #tpu.memory_space<vmem>>, vector<1x8x8x8xf32>
      %250 = vector.shape_cast %249 : vector<1x8x8x8xf32> to vector<8x8x8xf32>
      %c20 = arith.constant 20 : index
      %c0_140 = arith.constant 0 : index
      %c0_141 = arith.constant 0 : index
      %251 = vector.load %arg8[%c20, %c0_140, %c0_141] : memref<27x1x8xf32, #tpu.memory_space<vmem>>, vector<1x1x8xf32>
      %252 = vector.shape_cast %251 : vector<1x1x8xf32> to vector<1x8xf32>
      %253 = vector.shape_cast %252 : vector<1x8xf32> to vector<1x1x8xf32>
      %254 = vector.broadcast %253 : vector<1x1x8xf32> to vector<8x8x8xf32>
      %255 = arith.mulf %250, %254 : vector<8x8x8xf32>
      %256 = arith.addf %247, %255 : vector<8x8x8xf32>
      %257 = arith.index_cast %229 : i32 to index
      %c1_142 = arith.constant 1 : index
      %c0_143 = arith.constant 0 : index
      %c0_144 = arith.constant 0 : index
      %258 = vector.load %arg13[%257, %c1_142, %c0_143, %c0_144] : memref<3x10x10x8xf32, #tpu.memory_space<vmem>>, vector<1x8x8x8xf32>
      %259 = vector.shape_cast %258 : vector<1x8x8x8xf32> to vector<8x8x8xf32>
      %c21 = arith.constant 21 : index
      %c0_145 = arith.constant 0 : index
      %c0_146 = arith.constant 0 : index
      %260 = vector.load %arg8[%c21, %c0_145, %c0_146] : memref<27x1x8xf32, #tpu.memory_space<vmem>>, vector<1x1x8xf32>
      %261 = vector.shape_cast %260 : vector<1x1x8xf32> to vector<1x8xf32>
      %262 = vector.shape_cast %261 : vector<1x8xf32> to vector<1x1x8xf32>
      %263 = vector.broadcast %262 : vector<1x1x8xf32> to vector<8x8x8xf32>
      %264 = arith.mulf %259, %263 : vector<8x8x8xf32>
      %265 = arith.addf %256, %264 : vector<8x8x8xf32>
      %266 = arith.index_cast %229 : i32 to index
      %c1_147 = arith.constant 1 : index
      %c1_148 = arith.constant 1 : index
      %c0_149 = arith.constant 0 : index
      %267 = vector.load %arg13[%266, %c1_147, %c1_148, %c0_149] : memref<3x10x10x8xf32, #tpu.memory_space<vmem>>, vector<1x8x8x8xf32>
      %268 = vector.shape_cast %267 : vector<1x8x8x8xf32> to vector<8x8x8xf32>
      %c22 = arith.constant 22 : index
      %c0_150 = arith.constant 0 : index
      %c0_151 = arith.constant 0 : index
      %269 = vector.load %arg8[%c22, %c0_150, %c0_151] : memref<27x1x8xf32, #tpu.memory_space<vmem>>, vector<1x1x8xf32>
      %270 = vector.shape_cast %269 : vector<1x1x8xf32> to vector<1x8xf32>
      %271 = vector.shape_cast %270 : vector<1x8xf32> to vector<1x1x8xf32>
      %272 = vector.broadcast %271 : vector<1x1x8xf32> to vector<8x8x8xf32>
      %273 = arith.mulf %268, %272 : vector<8x8x8xf32>
      %274 = arith.addf %265, %273 : vector<8x8x8xf32>
      %275 = arith.index_cast %229 : i32 to index
      %c1_152 = arith.constant 1 : index
      %c2_153 = arith.constant 2 : index
      %c0_154 = arith.constant 0 : index
      %276 = vector.load %arg13[%275, %c1_152, %c2_153, %c0_154] : memref<3x10x10x8xf32, #tpu.memory_space<vmem>>, vector<1x8x8x8xf32>
      %277 = vector.shape_cast %276 : vector<1x8x8x8xf32> to vector<8x8x8xf32>
      %c23 = arith.constant 23 : index
      %c0_155 = arith.constant 0 : index
      %c0_156 = arith.constant 0 : index
      %278 = vector.load %arg8[%c23, %c0_155, %c0_156] : memref<27x1x8xf32, #tpu.memory_space<vmem>>, vector<1x1x8xf32>
      %279 = vector.shape_cast %278 : vector<1x1x8xf32> to vector<1x8xf32>
      %280 = vector.shape_cast %279 : vector<1x8xf32> to vector<1x1x8xf32>
      %281 = vector.broadcast %280 : vector<1x1x8xf32> to vector<8x8x8xf32>
      %282 = arith.mulf %277, %281 : vector<8x8x8xf32>
      %283 = arith.addf %274, %282 : vector<8x8x8xf32>
      %284 = arith.index_cast %229 : i32 to index
      %c2_157 = arith.constant 2 : index
      %c0_158 = arith.constant 0 : index
      %c0_159 = arith.constant 0 : index
      %285 = vector.load %arg13[%284, %c2_157, %c0_158, %c0_159] : memref<3x10x10x8xf32, #tpu.memory_space<vmem>>, vector<1x8x8x8xf32>
      %286 = vector.shape_cast %285 : vector<1x8x8x8xf32> to vector<8x8x8xf32>
      %c24 = arith.constant 24 : index
      %c0_160 = arith.constant 0 : index
      %c0_161 = arith.constant 0 : index
      %287 = vector.load %arg8[%c24, %c0_160, %c0_161] : memref<27x1x8xf32, #tpu.memory_space<vmem>>, vector<1x1x8xf32>
      %288 = vector.shape_cast %287 : vector<1x1x8xf32> to vector<1x8xf32>
      %289 = vector.shape_cast %288 : vector<1x8xf32> to vector<1x1x8xf32>
      %290 = vector.broadcast %289 : vector<1x1x8xf32> to vector<8x8x8xf32>
      %291 = arith.mulf %286, %290 : vector<8x8x8xf32>
      %292 = arith.addf %283, %291 : vector<8x8x8xf32>
      %293 = arith.index_cast %229 : i32 to index
      %c2_162 = arith.constant 2 : index
      %c1_163 = arith.constant 1 : index
      %c0_164 = arith.constant 0 : index
      %294 = vector.load %arg13[%293, %c2_162, %c1_163, %c0_164] : memref<3x10x10x8xf32, #tpu.memory_space<vmem>>, vector<1x8x8x8xf32>
      %295 = vector.shape_cast %294 : vector<1x8x8x8xf32> to vector<8x8x8xf32>
      %c25 = arith.constant 25 : index
      %c0_165 = arith.constant 0 : index
      %c0_166 = arith.constant 0 : index
      %296 = vector.load %arg8[%c25, %c0_165, %c0_166] : memref<27x1x8xf32, #tpu.memory_space<vmem>>, vector<1x1x8xf32>
      %297 = vector.shape_cast %296 : vector<1x1x8xf32> to vector<1x8xf32>
      %298 = vector.shape_cast %297 : vector<1x8xf32> to vector<1x1x8xf32>
      %299 = vector.broadcast %298 : vector<1x1x8xf32> to vector<8x8x8xf32>
      %300 = arith.mulf %295, %299 : vector<8x8x8xf32>
      %301 = arith.addf %292, %300 : vector<8x8x8xf32>
      %302 = arith.index_cast %229 : i32 to index
      %c2_167 = arith.constant 2 : index
      %c2_168 = arith.constant 2 : index
      %c0_169 = arith.constant 0 : index
      %303 = vector.load %arg13[%302, %c2_167, %c2_168, %c0_169] : memref<3x10x10x8xf32, #tpu.memory_space<vmem>>, vector<1x8x8x8xf32>
      %304 = vector.shape_cast %303 : vector<1x8x8x8xf32> to vector<8x8x8xf32>
      %c26 = arith.constant 26 : index
      %c0_170 = arith.constant 0 : index
      %c0_171 = arith.constant 0 : index
      %305 = vector.load %arg8[%c26, %c0_170, %c0_171] : memref<27x1x8xf32, #tpu.memory_space<vmem>>, vector<1x1x8xf32>
      %306 = vector.shape_cast %305 : vector<1x1x8xf32> to vector<1x8xf32>
      %307 = vector.shape_cast %306 : vector<1x8xf32> to vector<1x1x8xf32>
      %308 = vector.broadcast %307 : vector<1x1x8xf32> to vector<8x8x8xf32>
      %309 = arith.mulf %304, %308 : vector<8x8x8xf32>
      %310 = arith.addf %301, %309 : vector<8x8x8xf32>
      %c1_i32_172 = arith.constant 1 : i32
      %311 = arith.subi %arg2, %c1_i32_172 : i32
      %c2_i32_173 = arith.constant 2 : i32
      %c0_i32_174 = arith.constant 0 : i32
      %312 = arith.cmpi eq, %c2_i32_173, %c0_i32_174 : i32
      %c1_i32_175 = arith.constant 1 : i32
      %313 = arith.select %312, %c1_i32_175, %c2_i32_173 : i32
      %314 = arith.remsi %311, %313 : i32
      %c0_i32_176 = arith.constant 0 : i32
      %315 = arith.cmpi ne, %314, %c0_i32_176 : i32
      %c0_i32_177 = arith.constant 0 : i32
      %316 = arith.cmpi slt, %314, %c0_i32_177 : i32
      %c0_i32_178 = arith.constant 0 : i32
      %317 = arith.cmpi slt, %313, %c0_i32_178 : i32
      %318 = arith.xori %316, %317 : i1
      %319 = arith.andi %318, %315 : i1
      %320 = arith.addi %314, %313 : i32
      %321 = arith.select %319, %320, %314 : i32
      %322 = arith.index_cast %321 : i32 to index
      %c0_179 = arith.constant 0 : index
      %c0_180 = arith.constant 0 : index
      %c0_181 = arith.constant 0 : index
      %323 = vector.load %arg14[%322, %c0_179, %c0_180, %c0_181] : memref<2x8x8x8xf32, #tpu.memory_space<vmem>>, vector<1x8x8x8xf32>
      %324 = vector.shape_cast %323 : vector<1x8x8x8xf32> to vector<8x8x8xf32>
      %325 = arith.addf %310, %324 : vector<8x8x8xf32>
      %c0_182 = arith.constant 0 : index
      %c0_183 = arith.constant 0 : index
      %c0_184 = arith.constant 0 : index
      %c0_185 = arith.constant 0 : index
      %c0_186 = arith.constant 0 : index
      %326 = vector.load %arg12[%c0_182, %c0_183, %c0_184, %c0_185, %c0_186] : memref<1x1x8x8x8xf32, #tpu.memory_space<vmem>>, vector<1x1x8x8x8xf32>
      %327 = vector.shape_cast %326 : vector<1x1x8x8x8xf32> to vector<8x8x8xf32>
      %328 = vector.shape_cast %325 : vector<8x8x8xf32> to vector<1x1x8x8x8xf32>
      tpu.vector_store %arg12[%c0_182, %c0_183, %c0_184, %c0_185, %c0_186], %328 {strides = array<i32>} : memref<1x1x8x8x8xf32, #tpu.memory_space<vmem>>, vector<1x1x8x8x8xf32>,
    } else {
    }
    return
  }
  func.func @transform_0(%arg0: i32, %arg1: i32, %arg2: i32) -> (i32, i32, i32, i32, i32) {
    %c4_i32 = arith.constant 4 : i32
    %0 = arith.muli %arg1, %c4_i32 : i32
    %c1_i32 = arith.constant 1 : i32
    %1 = arith.subi %0, %c1_i32 : i32
    %2 = arith.addi %1, %arg2 : i32
    %c0_i32 = arith.constant 0 : i32
    %c3_i32 = arith.constant 3 : i32
    %3 = arith.maxsi %c0_i32, %2 : i32
    %4 = arith.minsi %c3_i32, %3 : i32
    %c0_i32_0 = arith.constant 0 : i32
    %c0_i32_1 = arith.constant 0 : i32
    %c0_i32_2 = arith.constant 0 : i32
    %c0_i32_3 = arith.constant 0 : i32
    return %arg0, %4, %c0_i32_0, %c0_i32_1, %c0_i32_2 : i32, i32, i32, i32, i32
  }
  func.func @transform_1(%arg0: i32, %arg1: i32, %arg2: i32) -> (i32, i32) {
    %c0_i32 = arith.constant 0 : i32
    %c0_i32_0 = arith.constant 0 : i32
    %c0_i32_1 = arith.constant 0 : i32
    return %c0_i32, %c0_i32_0 : i32, i32
  }
  func.func @transform_2(%arg0: i32, %arg1: i32, %arg2: i32) -> (i32, i32) {
    %c0_i32 = arith.constant 0 : i32
    %c0_i32_0 = arith.constant 0 : i32
    %c0_i32_1 = arith.constant 0 : i32
    return %c0_i32, %c0_i32_0 : i32, i32
  }
  func.func @transform_3(%arg0: i32, %arg1: i32, %arg2: i32) -> (i32, i32) {
    %c0_i32 = arith.constant 0 : i32
    %c0_i32_0 = arith.constant 0 : i32
    %c0_i32_1 = arith.constant 0 : i32
    return %c0_i32, %c0_i32_0 : i32, i32
  }
  func.func @transform_4(%arg0: i32, %arg1: i32, %arg2: i32) -> (i32, i32) {
    %c0_i32 = arith.constant 0 : i32
    %c0_i32_0 = arith.constant 0 : i32
    %c0_i32_1 = arith.constant 0 : i32
    return %c0_i32, %c0_i32_0 : i32, i32
  }
  func.func @transform_5(%arg0: i32, %arg1: i32, %arg2: i32) -> (i32, i32, i32) {
    %c0_i32 = arith.constant 0 : i32
    %c0_i32_0 = arith.constant 0 : i32
    %c0_i32_1 = arith.constant 0 : i32
    %c0_i32_2 = arith.constant 0 : i32
    return %c0_i32, %c0_i32_0, %c0_i32_1 : i32, i32, i32
  }
  func.func @transform_6(%arg0: i32, %arg1: i32, %arg2: i32) -> (i32, i32) {
    %c0_i32 = arith.constant 0 : i32
    %c0_i32_0 = arith.constant 0 : i32
    %c0_i32_1 = arith.constant 0 : i32
    return %c0_i32, %c0_i32_0 : i32, i32
  }
  func.func @transform_7(%arg0: i32, %arg1: i32, %arg2: i32) -> (i32, i32) {
    %c0_i32 = arith.constant 0 : i32
    %c0_i32_0 = arith.constant 0 : i32
    %c0_i32_1 = arith.constant 0 : i32
    return %c0_i32, %c0_i32_0 : i32, i32
  }
  func.func @transform_8(%arg0: i32, %arg1: i32, %arg2: i32) -> (i32, i32) {
    %c0_i32 = arith.constant 0 : i32
    %c0_i32_0 = arith.constant 0 : i32
    %c0_i32_1 = arith.constant 0 : i32
    return %c0_i32, %c0_i32_0 : i32, i32
  }
  func.func @transform_9(%arg0: i32, %arg1: i32, %arg2: i32) -> (i32, i32, i32, i32, i32) {
    %c4_i32 = arith.constant 4 : i32
    %0 = arith.muli %arg1, %c4_i32 : i32
    %c2_i32 = arith.constant 2 : i32
    %1 = arith.subi %arg2, %c2_i32 : i32
    %c0_i32 = arith.constant 0 : i32
    %2 = arith.maxsi %1, %c0_i32 : i32
    %3 = arith.addi %0, %2 : i32
    %c0_i32_0 = arith.constant 0 : i32
    %c0_i32_1 = arith.constant 0 : i32
    %c0_i32_2 = arith.constant 0 : i32
    %c0_i32_3 = arith.constant 0 : i32
    return %arg0, %3, %c0_i32_0, %c0_i32_1, %c0_i32_2 : i32, i32, i32, i32, i32
  }
}

</mosaic_0001>

<bundles_post_ra>
// kernel: tpu_custom_call.1
= control target key start
LH: loop header
LB: loop body
LE: loop exit
PB: predicated region body
PF: predicated region fallthrough
CT: control target
= control target key end

     0   :  { %14 = vsyncpa [#allocation5], 0  ;;  %s4925_s0 = inlined_call_operand.vmem [shape: f32[2,4,8,8,4], index: 0, kind: input, shape index: {}]   ;;  %s4926_s1 = inlined_call_operand.vmem [shape: f32[1,4], index: 1, kind: input, shape index: {}]   ;;  %s4927_s2 = inlined_call_operand.vmem [shape: f32[4,8], index: 2, kind: input, shape index: {}]   ;;  %s4928_s3 = inlined_call_operand.vmem [shape: f32[1,8], index: 3, kind: input, shape index: {}]   ;;  %s4929_s4 = inlined_call_operand.vmem [shape: f32[1,8], index: 4, kind: input, shape index: {}]   ;;  %s4930_s5 = inlined_call_operand.vmem [shape: f32[27,1,8], index: 5, kind: input, shape index: {}]   ;;  %s4931_s6 = inlined_call_operand.vmem [shape: f32[1,8], index: 6, kind: input, shape index: {}]   ;;  %s4932_s7 = inlined_call_operand.vmem [shape: f32[4,8], index: 7, kind: input, shape index: {}]   ;;  %s4933_s8 = inlined_call_operand.vmem [shape: f32[1,8], index: 8, kind: input, shape index: {}]   ;;  %s4934_s9 = inlined_call_operand.hbm [shape: f32[2,4,8,8,8], index: 9, kind: output, shape index: {}]  }
   0x1   :  { %16 = vsyncpa [#allocation5 + $0x1], 0  ;;  %s3344_s30 = smov 0   ;;  %s3346_s10 = smov 0  }
   0x2   :  { %s3348_s11 = smov 0   ;;  %s3350_s12 = smov 0  }
   0x3   :  { %s3352_s13 = smov 0   ;;  %s3354_s14 = smov 0  }
   0x4   :  { %s3356_s15 = smov 0   ;;  %s3358_s16 = smov 0  }
   0x5 LB: > { %4960 = sst [smem:[#allocation7_spill]] %s3258_s30  ;;  %s2678_s17 = sadd.s32 4294967295, %s3286_s16   ;;  %s3286_s16 = sphi %s3358_s16, %s22_s16   ;;  %s3282_s15 = sphi %s3356_s15, %s5091_s15   ;;  %s3278_s14 = sphi %s3354_s14, %s5090_s14   ;;  %s3274_s13 = sphi %s3352_s13, %s5094_s13   ;;  %s3270_s12 = sphi %s3350_s12, %s5088_s12   ;;  %s3266_s11 = sphi %s3348_s11, %s5087_s11   ;;  %s3262_s10 = sphi %s3346_s10, %s5093_s10   ;;  %s3258_s30 = sphi %s3344_s30, %s5092_s30  }
   0x6   : > { %4961 = sst [smem:[#allocation8_spill]] %s3266_s11  ;;  %s2679_s18 = sadd.s32 4294967294, %s3286_s16  }
   0x7   : > { %4962 = sst [smem:[#allocation9_spill]] %s3278_s14  ;;  %s34_s19 = sadd.s32 1, %s3278_s14 }
   0x8   : > { %4963 = sst [smem:[#allocation10_spill]] %s3282_s15  ;;  %s41_s20 = sadd.s32 1, %s3282_s15 }
   0x9   : > { %p35_p0 = scmp.ge.s32.totalorder %s34_s19, 6  ;;  %s2690_s21 = sadd.s32 4294967294, %s3278_s14 }
   0xa   : > { %p257_p1 = scmp.gt.s32.totalorder %s2690_s21, 0  ;;  %s270_s22 = sadd.s32 1, %s3266_s11 }
   0xb   : > { %s5096_s19 = smov (%p35_p0, %s34_s19), 0  ;;  %s5098_s20 = smov (!%p35_p0, %s41_s20), %s3282_s15 }
   0xc   : > { %4964 = sst [smem:[#allocation11_spill]] %s5096_s19  ;;  %s5100_s21 = smov (!%p257_p1, %s2690_s21), 0 }
   0xd   : > { %p43_p2 = scmp.ge.s32.totalorder %s5098_s20, 2  ;;  %s2691_s23 = sadd.s32 4294967294, %s5096_s19 }
   0xe   : > { %p262_p3 = scmp.gt.s32.totalorder %s2691_s23, 0  ;;  %p280_p4 = scmp.ne.s32.totalorder %s3266_s11, %s3262_s10 }
   0xf   : > { %s5102_s20 = smov (%p43_p2, %s5098_s20), 0  ;;  %p281_p5 = scmp.eq.s32.totalorder %s2678_s17, 11 }
  0x10   : > { %4965 = sst [smem:[#allocation12_spill]] %s5102_s20  ;;  %s5104_s23 = smov (!%p262_p3, %s2691_s23), 0 }
  0x11   : > { %s265_s24 = ssub.s32 %s3282_s15, %s5102_s20  ;;  %s266_s25 = ssub.s32 %s5100_s21, %s5104_s23 }
  0x12   : > { %p286_p6 = scmp.ne.s32.totalorder %s3262_s10, %s3258_s30  ;;  %s267_s26 = sor.u32 %s266_s25, %s265_s24 }
  0x13   : > { %p3402_p7 = por %p281_p5, %p280_p4  ;;  %p268_p8 = scmp.eq.s32.totalorder %s267_s26, 0 }
  0x14   : > { %p287_p9 = scmp.eq.s32.totalorder %s2679_s18, 11  ;;  %p2694_p10 = scmp.ge.s32.totalorder %s3286_s16, 1 }
  0x15   : > { %p355_p11 = scmp.lt.s32.totalorder %s3286_s16, 13 }
  0x16   : > { %s3409_s28 = scalar_select %p268_p8, %s3266_s11, %s270_s22  }
  0x17   : > { %p3411_p12 = por %p287_p9, %p286_p6  ;;  %p356_p13 = pnand %p2694_p10, %p355_p11 }
  0x18   : > { %4967 = sst [smem:[#allocation13_spill]] %s3409_s28  ;;  %s4936_s17 = sand.u32 (!%p356_p13), 1, %s3262_s10  }
  0x19   : > { %s4968_s29 = scalar_select %p3411_p12, 1, 0 }
  0x1a   : > { %359 = sbr.rel (%p356_p13) target bundleno = 1223 (0x4c7), region = 56  ;;  %s3417_s21 = sadd.s32 (!%p356_p13), 4294967295, %s3270_s12 }
  0x1b   : > { %4969 = sst [smem:[#allocation14_spill]] %s4968_s29  ;;  %s2695_s18 = sshll.u32 (!%p356_p13), %s4936_s17, 6 }
  0x1c   : > { %p405_p0 = scmp.gt.s32.totalorder (!%p356_p13), %s3417_s21, 0  ;;  %p2696_p1 = scmp.lt.s32.totalorder (!%p356_p13), %s3417_s21, 3 }
  0x1d   : > { %p409_p2 = scmp.lt.s32.totalorder (!%p356_p13), %s3274_s13, 1  ;;  %p433_p3 = scmp.ge.s32.totalorder (!%p356_p13), %s3417_s21, 0 }
  0x1e   : > { %p434_p5 = scmp.lt.s32.totalorder (!%p356_p13), %s3417_s21, 4  ;;  %s438_s26 = ssub.s32 (!%p356_p13), 0, %s3270_s12 }
  0x1f   : > { %s406_s22 = scalar_select %p405_p0, %s3417_s21, 0 }
  0x20   : > { %s410_s23 = scalar_select %p409_p2, %s3274_s13, 1 }
  0x21   : > { %s5106_s22 = smov (!%p2696_p1, %s406_s22), 3  ;;  %p3428_p6 = pnand %p434_p5, %p433_p3 }
  0x22   : > { %p411_p4 = scmp.lt.s32.totalorder %s5106_s22, 3  ;;  %s2702_s24 = sshll.u32 %s410_s23, 5 }
  0x23   : > { %s3434_s17 = smin.u32 %s3270_s12, %s438_s26  ;;  %p437_p8 = scmp.lt.s32.totalorder %s3270_s12, 0 }
  0x24   : > { %s5108_s22 = smov (!%p411_p4, %s5106_s22), 3  ;;  %3090 = sdivrem.u32 %s3434_s17, 3 }
  0x25   : > { %s2701_s20 = sshll.u32 %s5108_s22, 3  ;;  %s3447_s22 = scalar_lea.vmem [#allocation4], %s2695_s18 }
  0x26   : > { %s415_s19 = sadd.s32 %s2702_s24, %s2701_s20  ;;  %p2707_p10 = scmp.ne.s32.totalorder %s3270_s12, 0 }
  0x27   : > { %s2703_s15 = sshll.u32 %s415_s19, 3 }
  0x28   : > { %s3440_s11 = scalar_lea.vmem %s4925_s0, %s2703_s15 }
  0x2d   : > { %s3091_s23 = spop.drf %3090 }
  0x2e   : > { %s442_s29 = ssub.s32 0, %s3091_s23  ;;  %453 = sbr.rel (%p2707_p10) target bundleno = 82 (0x52), region = 60 }
  0x2f   : > { %s5110_s29 = smov (!%p437_p8, %s442_s29), %s3091_s23 }
  0x30   : > { %p2706_p9 = scmp.lt.s32.totalorder %s5110_s29, 0  ;;  %s448_s30 = sadd.s32 3, %s5110_s29 }
  0x32   : > { %s5112_s30 = smov (!%p2706_p9, %s448_s30), %s5110_s29 }
  0x33   : > { %vm454_vm0 = vcmask 64512   ;;  %vm456_vm1 = vcmask 58368   ;;  %v3288_v0 = vmov 0.0  }
  0x34   : > { %455 = vst.msk [vmem:[#allocation2] sm:$0xff] %vm454_vm0, %v3288_v0  ;;  %458 = vst.msk [vmem:[#allocation2 + $0x10] sm:$0xff] %vm454_vm0, %v3288_v0 }
  0x35   : > { %460 = vst.msk [vmem:[#allocation2 + $0x20] sm:$0xff] %vm454_vm0, %v3288_v0  ;;  %462 = vst.msk [vmem:[#allocation2 + $0x30] sm:$0xff] %vm454_vm0, %v3288_v0 }
  0x36   : > { %464 = vst.msk [vmem:[#allocation2 + $0x40] sm:$0xff] %vm454_vm0, %v3288_v0  ;;  %466 = vst.msk [vmem:[#allocation2 + $0x50] sm:$0xff] %vm454_vm0, %v3288_v0 }
  0x37   : > { %468 = vst.msk [vmem:[#allocation2 + $0x60] sm:$0xff] %vm454_vm0, %v3288_v0  ;;  %470 = vst.msk [vmem:[#allocation2 + $0x70] sm:$0xff] %vm454_vm0, %v3288_v0 }
  0x38   : > { %472 = vst.msk [vmem:[#allocation2 + $0x80] sm:$0xff] %vm454_vm0, %v3288_v0  ;;  %474 = vst.msk [vmem:[#allocation2 + $0x90] sm:$0xff] %vm454_vm0, %v3288_v0 }
  0x39   : > { %476 = vst.msk [vmem:[#allocation2 + $0xa0] sm:$0xff] %vm454_vm0, %v3288_v0  ;;  %478 = vst.msk [vmem:[#allocation2 + $0xb0] sm:$0xff] %vm454_vm0, %v3288_v0 }
  0x3a   : > { %480 = vst.msk [vmem:[#allocation2 + $0xc0] sm:$0xff] %vm454_vm0, %v3288_v0  ;;  %482 = vst.msk [vmem:[#allocation2 + $0xd0] sm:$0xff] %vm454_vm0, %v3288_v0 }
  0x3b   : > { %484 = vst.msk [vmem:[#allocation2 + $0xe0] sm:$0xff] %vm454_vm0, %v3288_v0  ;;  %486 = vst.msk [vmem:[#allocation2 + $0xf0] sm:$0xff] %vm454_vm0, %v3288_v0 }
  0x3c   : > { %488 = vst.msk [vmem:[#allocation2 + $0x100] sm:$0xff] %vm454_vm0, %v3288_v0  ;;  %490 = vst.msk [vmem:[#allocation2 + $0x110] sm:$0xff] %vm454_vm0, %v3288_v0 }
  0x3d   : > { %492 = vst.msk [vmem:[#allocation2 + $0x120] sm:$0xff] %vm454_vm0, %v3288_v0  ;;  %494 = vst.msk [vmem:[#allocation2 + $0x130] sm:$0xff] %vm454_vm0, %v3288_v0 }
  0x3e   : > { %496 = vst.msk [vmem:[#allocation2 + $0x140] sm:$0xff] %vm454_vm0, %v3288_v0  ;;  %498 = vst.msk [vmem:[#allocation2 + $0x150] sm:$0xff] %vm454_vm0, %v3288_v0 }
  0x3f   : > { %500 = vst.msk [vmem:[#allocation2 + $0x160] sm:$0xff] %vm454_vm0, %v3288_v0  ;;  %502 = vst.msk [vmem:[#allocation2 + $0x170] sm:$0xff] %vm454_vm0, %v3288_v0 }
  0x40   : > { %504 = vst.msk [vmem:[#allocation2 + $0x180] sm:$0xff] %vm454_vm0, %v3288_v0  ;;  %506 = vst.msk [vmem:[#allocation2 + $0x190] sm:$0xff] %vm454_vm0, %v3288_v0 }
  0x41   : > { %508 = vst.msk [vmem:[#allocation2 + $0x1a0] sm:$0xff] %vm454_vm0, %v3288_v0  ;;  %510 = vst.msk [vmem:[#allocation2 + $0x1b0] sm:$0xff] %vm454_vm0, %v3288_v0 }
  0x42   : > { %512 = vst.msk [vmem:[#allocation2 + $0x1c0] sm:$0xff] %vm454_vm0, %v3288_v0  ;;  %514 = vst.msk [vmem:[#allocation2 + $0x1d0] sm:$0xff] %vm454_vm0, %v3288_v0 }
  0x43   : > { %457 = vst.msk [vmem:[#allocation2 + $0x8] sm:$0x3] %vm456_vm1, %v3288_v0  ;;  %459 = vst.msk [vmem:[#allocation2 + $0x18] sm:$0x3] %vm456_vm1, %v3288_v0 }
  0x44   : > { %461 = vst.msk [vmem:[#allocation2 + $0x28] sm:$0x3] %vm456_vm1, %v3288_v0  ;;  %463 = vst.msk [vmem:[#allocation2 + $0x38] sm:$0x3] %vm456_vm1, %v3288_v0 }
  0x45   : > { %465 = vst.msk [vmem:[#allocation2 + $0x48] sm:$0x3] %vm456_vm1, %v3288_v0  ;;  %467 = vst.msk [vmem:[#allocation2 + $0x58] sm:$0x3] %vm456_vm1, %v3288_v0 }
  0x46   : > { %469 = vst.msk [vmem:[#allocation2 + $0x68] sm:$0x3] %vm456_vm1, %v3288_v0  ;;  %471 = vst.msk [vmem:[#allocation2 + $0x78] sm:$0x3] %vm456_vm1, %v3288_v0 }
  0x47   : > { %473 = vst.msk [vmem:[#allocation2 + $0x88] sm:$0x3] %vm456_vm1, %v3288_v0  ;;  %475 = vst.msk [vmem:[#allocation2 + $0x98] sm:$0x3] %vm456_vm1, %v3288_v0 }
  0x48   : > { %477 = vst.msk [vmem:[#allocation2 + $0xa8] sm:$0x3] %vm456_vm1, %v3288_v0  ;;  %479 = vst.msk [vmem:[#allocation2 + $0xb8] sm:$0x3] %vm456_vm1, %v3288_v0 }
  0x49   : > { %481 = vst.msk [vmem:[#allocation2 + $0xc8] sm:$0x3] %vm456_vm1, %v3288_v0  ;;  %483 = vst.msk [vmem:[#allocation2 + $0xd8] sm:$0x3] %vm456_vm1, %v3288_v0 }
  0x4a   : > { %485 = vst.msk [vmem:[#allocation2 + $0xe8] sm:$0x3] %vm456_vm1, %v3288_v0  ;;  %487 = vst.msk [vmem:[#allocation2 + $0xf8] sm:$0x3] %vm456_vm1, %v3288_v0 }
  0x4b   : > { %489 = vst.msk [vmem:[#allocation2 + $0x108] sm:$0x3] %vm456_vm1, %v3288_v0  ;;  %491 = vst.msk [vmem:[#allocation2 + $0x118] sm:$0x3] %vm456_vm1, %v3288_v0 }
  0x4c   : > { %493 = vst.msk [vmem:[#allocation2 + $0x128] sm:$0x3] %vm456_vm1, %v3288_v0  ;;  %495 = vst.msk [vmem:[#allocation2 + $0x138] sm:$0x3] %vm456_vm1, %v3288_v0 }
  0x4d   : > { %497 = vst.msk [vmem:[#allocation2 + $0x148] sm:$0x3] %vm456_vm1, %v3288_v0  ;;  %499 = vst.msk [vmem:[#allocation2 + $0x158] sm:$0x3] %vm456_vm1, %v3288_v0 }
  0x4e   : > { %501 = vst.msk [vmem:[#allocation2 + $0x168] sm:$0x3] %vm456_vm1, %v3288_v0  ;;  %503 = vst.msk [vmem:[#allocation2 + $0x178] sm:$0x3] %vm456_vm1, %v3288_v0 }
  0x4f   : > { %505 = vst.msk [vmem:[#allocation2 + $0x188] sm:$0x3] %vm456_vm1, %v3288_v0  ;;  %507 = vst.msk [vmem:[#allocation2 + $0x198] sm:$0x3] %vm456_vm1, %v3288_v0 }
  0x50   : > { %509 = vst.msk [vmem:[#allocation2 + $0x1a8] sm:$0x3] %vm456_vm1, %v3288_v0  ;;  %511 = vst.msk [vmem:[#allocation2 + $0x1b8] sm:$0x3] %vm456_vm1, %v3288_v0 }
  0x51   : > { %513 = vst.msk [vmem:[#allocation2 + $0x1c8] sm:$0x3] %vm456_vm1, %v3288_v0  ;;  %515 = vst.msk [vmem:[#allocation2 + $0x1d8] sm:$0x3] %vm456_vm1, %v3288_v0 }
  0x52 PF: > { %517 = sbr.rel (%p3428_p6) target bundleno = 1041 (0x411), region = 64  ;;  %s1527_s24 = sand.u32 (!%p3428_p6), 1, %s3434_s17  }
  0x53   : > { %s1528_s26 = ssub.s32 (!%p3428_p6), 0, %s1527_s24  ;;  %s2597_s28 = smul.u32 (!%p3428_p6), 160, %s5112_s30 }
  0x55   : > { %s4039_s29 = scalar_lea.vmem (!%p3428_p6), [#allocation2], %s2597_s28 }
  0x57   : > { %v518_v1 = vld [vmem:[%s3440_s11] sm:$0xff]  ;;  %vm527_vm2 = vcmask 31744   ;;  %v3514_v2 = vld [vmem:[%s3440_s11 + $0x10] sm:$0xff]  ;;  %v3517_v3 = vld [vmem:[%s3440_s11 + $0x8] sm:$0xff]  ;;  %vm911_vm3 = vcmask 1043456   ;;  %vm1021_vm12 = vcmask 64512   ;;  %s5114_s26 = smov (!%p437_p8, %s1528_s26), %s1527_s24 }
  0x58   : > { %v528_v4 = vsel %vm527_vm2, %v518_v1, 0.0  ;;  %v534_v5 = vsel %vm527_vm2, %v3514_v2, 0.0  ;;  %v3523_v6 = vld [vmem:[%s3440_s11 + $0x18] sm:$0xff]  ;;  %3000 = vmatprep.mubr.msk.f32.mxu1 %vm527_vm2, %v518_v1  ;;  %v531_v7 = vsel %vm527_vm2, %v3517_v3, 0.0  ;;  %v3531_v9 = vld [vmem:[%s3440_s11 + $0x20] sm:$0xff]  ;;  %v3534_v10 = vld [vmem:[%s3440_s11 + $0x28] sm:$0xff] }
  0x59   : > { %529 = vadd.xlane.f32.xlu0 %v528_v4  ;;  %535 = vadd.xlane.f32.xlu1 %v534_v5  ;;  %v537_v8 = vsel %vm527_vm2, %v3523_v6, 0.0  ;;  %v540_v11 = vsel %vm527_vm2, %v3531_v9, 0.0  ;;  %v543_v12 = vsel %vm527_vm2, %v3534_v10, 0.0  ;;  %v3541_v13 = vld [vmem:[%s3440_s11 + $0x30] sm:$0xff]  ;;  %v3544_v14 = vld [vmem:[%s3440_s11 + $0x38] sm:$0xff]  ;;  %p2740_p11 = scmp.lt.s32.totalorder %s5114_s26, 0 }
  0x5a   : > { %v546_v15 = vsel %vm527_vm2, %v3541_v13, 0.0  ;;  %v549_v16 = vsel %vm527_vm2, %v3544_v14, 0.0  ;;  %v879_v57 = vld [vmem:[%s4927_s2] sm:$0xf]  ;;  %s1534_s23 = sadd.s32 2, %s5114_s26 }
  0x5b   : > { %2984 = vmatprep.subr.msk.mxu0 %vm911_vm3, %v879_v57  ;;  %s5116_s23 = smov (!%p2740_p11, %s1534_s23), %s5114_s26 }
  0x5c   : > { %2985 = vmatpush3.msk.msra.mxu0 %vm911_vm3, %v879_v57  ;;  %s2741_s15 = sshll.u32 %s5116_s23, 6 }
  0x5d   : > { %532 = vadd.xlane.f32.xlu0 %v531_v7  ;;  %538 = vadd.xlane.f32.xlu1 %v537_v8  ;;  %s1537_s19 = scalar_lea.vmem [#allocation3], %s2741_s15 }
  0x61   : > { %541 = vadd.xlane.f32.xlu0 %v540_v11  ;;  %544 = vadd.xlane.f32.xlu1 %v543_v12 }
  0x65   : > { %547 = vadd.xlane.f32.xlu0 %v546_v15  ;;  %550 = vadd.xlane.f32.xlu1 %v549_v16 }
  0xe2   : > { %v530_v17 = vpop.xlane.xlu0 %529  ;;  %v536_v18 = vpop.xlane.xlu1 %535 }
  0xe3   : > { %v553_v19 = vmul.f32 0.25, %v530_v17  ;;  %v555_v20 = vmul.f32 0.25, %v536_v18 }
  0xe5   : > { %v3550_v21 = vsub.f32 %v518_v1, %v553_v19  ;;  %v3553_v22 = vsub.f32 %v3514_v2, %v555_v20 }
  0xe6   : > { %v533_v23 = vpop.xlane.xlu0 %532  ;;  %v539_v24 = vpop.xlane.xlu1 %538 }
  0xe7   : > { %v554_v25 = vmul.f32 0.25, %v533_v23  ;;  %v556_v26 = vmul.f32 0.25, %v539_v24  ;;  %v569_v27 = vmul.f32 %v3550_v21, %v3550_v21  ;;  %v571_v28 = vmul.f32 %v3553_v22, %v3553_v22 }
  0xe9   : > { %v3560_v29 = vsub.f32 %v3517_v3, %v554_v25  ;;  %v3563_v30 = vsub.f32 %v3523_v6, %v556_v26  ;;  %v577_v31 = vsel %vm527_vm2, %v569_v27, 0.0  ;;  %v583_v34 = vsel %vm527_vm2, %v571_v28, 0.0  ;;  %v3605_v26 = vld [vmem:[%s4926_s1] ss:$0 sm:$0xff] }
  0xea   : > { %578 = vadd.xlane.f32.xlu0 %v577_v31  ;;  %v542_v32 = vpop.xlane.xlu0 %541  ;;  %v545_v33 = vpop.xlane.xlu1 %544 }
  0xeb   : > { %v557_v35 = vmul.f32 0.25, %v542_v32  ;;  %v558_v36 = vmul.f32 0.25, %v545_v33  ;;  %v570_v37 = vmul.f32 %v3560_v29, %v3560_v29  ;;  %v572_v38 = vmul.f32 %v3563_v30, %v3563_v30 }
  0xed   : > { %v3572_v39 = vsub.f32 %v3531_v9, %v557_v35  ;;  %v3575_v40 = vsub.f32 %v3534_v10, %v558_v36  ;;  %v580_v41 = vsel %vm527_vm2, %v570_v37, 0.0  ;;  %v586_v44 = vsel %vm527_vm2, %v572_v38, 0.0 }
  0xee   : > { %584 = vadd.xlane.f32.xlu0 %v583_v34  ;;  %581 = vadd.xlane.f32.xlu1 %v580_v41  ;;  %v548_v42 = vpop.xlane.xlu0 %547  ;;  %v551_v43 = vpop.xlane.xlu1 %550 }
  0xef   : > { %v559_v45 = vmul.f32 0.25, %v548_v42  ;;  %v560_v46 = vmul.f32 0.25, %v551_v43  ;;  %v573_v47 = vmul.f32 %v3572_v39, %v3572_v39  ;;  %v574_v48 = vmul.f32 %v3575_v40, %v3575_v40 }
  0xf1   : > { %v3584_v49 = vsub.f32 %v3541_v13, %v559_v45  ;;  %v3587_v50 = vsub.f32 %v3544_v14, %v560_v46  ;;  %v589_v51 = vsel %vm527_vm2, %v573_v47, 0.0  ;;  %v592_v52 = vsel %vm527_vm2, %v574_v48, 0.0 }
  0xf2   : > { %587 = vadd.xlane.f32.xlu1 %v586_v44  ;;  %590 = vadd.xlane.f32.xlu0 %v589_v51 }
  0xf3   : > { %v575_v53 = vmul.f32 %v3584_v49, %v3584_v49  ;;  %v576_v54 = vmul.f32 %v3587_v50, %v3587_v50 }
  0xf5   : > { %v595_v55 = vsel %vm527_vm2, %v575_v53, 0.0  ;;  %v598_v56 = vsel %vm527_vm2, %v576_v54, 0.0 }
  0xf6   : > { %593 = vadd.xlane.f32.xlu1 %v592_v52  ;;  %596 = vadd.xlane.f32.xlu0 %v595_v55 }
  0xfa   : > { %599 = vadd.xlane.f32.xlu1 %v598_v56 }
 0x173   : > { %v579_v58 = vpop.xlane.xlu0 %578 }
 0x174   : > { %v601_v59 = vmul.f32 0.25, %v579_v58 }
 0x176   : > { %v609_v60 = vadd.f32 1e-05, %v601_v59 }
 0x177   : > { %v582_v61 = vpop.xlane.xlu1 %581  ;;  %v585_v62 = vpop.xlane.xlu0 %584 }
 0x178   : > { %3092 = vrsqrt.f32 %v609_v60  ;;  %v602_v63 = vmul.f32 0.25, %v582_v61  ;;  %v603_v0 = vmul.f32 0.25, %v585_v62 }
 0x17a   : > { %v610_v1 = vadd.f32 1e-05, %v602_v63  ;;  %v611_v4 = vadd.f32 1e-05, %v603_v0 }
 0x17b   : > { %v588_v5 = vpop.xlane.xlu1 %587  ;;  %v591_v7 = vpop.xlane.xlu0 %590 }
 0x17c   : > { %3094 = vrsqrt.f32 %v610_v1  ;;  %v604_v8 = vmul.f32 0.25, %v588_v5  ;;  %v605_v11 = vmul.f32 0.25, %v591_v7 }
 0x17d   : > { %3096 = vrsqrt.f32 %v611_v4 }
 0x17e   : > { %v612_v12 = vadd.f32 1e-05, %v604_v8  ;;  %v613_v15 = vadd.f32 1e-05, %v605_v11 }
 0x17f   : > { %v594_v16 = vpop.xlane.xlu1 %593  ;;  %v597_v17 = vpop.xlane.xlu0 %596 }
 0x180   : > { %3098 = vrsqrt.f32 %v612_v12  ;;  %v606_v18 = vmul.f32 0.25, %v594_v16  ;;  %v607_v19 = vmul.f32 0.25, %v597_v17 }
 0x181   : > { %3100 = vrsqrt.f32 %v613_v15 }
 0x182   : > { %v614_v20 = vadd.f32 1e-05, %v606_v18  ;;  %v615_v25 = vadd.f32 1e-05, %v607_v19 }
 0x183   : > { %v600_v23 = vpop.xlane.xlu1 %599 }
 0x184   : > { %3102 = vrsqrt.f32 %v614_v20  ;;  %v608_v27 = vmul.f32 0.25, %v600_v23 }
 0x185   : > { %v3093_v24 = vpop.eup %3092  ;;  %3104 = vrsqrt.f32 %v615_v25  ;;  %v3289_v25 = vmov -1.0  }
 0x186   : > { %v625_v28 = vmul.f32 %v3093_v24, %v3550_v21  ;;  %v616_v34 = vadd.f32 1e-05, %v608_v27 }
 0x188   : > { %v639_v31 = vmul.f32 %v3605_v26, %v625_v28  ;;  %3106 = vrsqrt.f32 %v616_v34 }
 0x189   : > { %v3095_v32 = vpop.eup %3094 }
 0x18a   : > { %v3097_v33 = vpop.eup %3096  ;;  %v655_v35 = vmul.f32 0.70710677, %v639_v31  ;;  %v626_v36 = vmul.f32 %v3095_v32, %v3560_v29  ;;  %v3656_v19 = vmul.f32 0.5, %v639_v31 }
 0x18b   : > { %v627_v37 = vmul.f32 %v3097_v33, %v3553_v22 }
 0x18c   : > { %v679_v38 = vand.u32 2147483647, %v655_v35  ;;  %v640_v41 = vmul.f32 %v3605_v26, %v626_v36  ;;  %vm663_vm4 = vcmp.ge.f32.partialorder %v655_v35, 0.0 }
 0x18d   : > { %v3099_v42 = vpop.eup %3098  ;;  %v641_v43 = vmul.f32 %v3605_v26, %v627_v37  ;;  %v3662_v27 = vsel %vm663_vm4, 1.0, %v3289_v25 }
 0x18e   : > { %v3101_v44 = vpop.eup %3100  ;;  %v687_v21 = vmul.f32 0.3275911, %v679_v38  ;;  %v3613_v45 = vmul.f32 0.70710677, %v640_v41  ;;  %v628_v47 = vmul.f32 %v3099_v42, %v3563_v30  ;;  %v3665_v33 = vmul.f32 0.5, %v640_v41 }
 0x18f   : > { %v3615_v46 = vmul.f32 0.70710677, %v641_v43  ;;  %v629_v52 = vmul.f32 %v3101_v44, %v3572_v39  ;;  %v3670_v36 = vmul.f32 0.5, %v641_v43 }
 0x190   : > { %v695_v48 = vadd.f32 1.0, %v687_v21  ;;  %v680_v29 = vand.u32 2147483647, %v3613_v45  ;;  %v3621_v51 = vmul.f32 %v3605_v26, %v628_v47  ;;  %vm664_vm5 = vcmp.ge.f32.partialorder %v3613_v45, 0.0 }
 0x191   : > { %v681_v22 = vand.u32 2147483647, %v3615_v46  ;;  %v3103_v53 = vpop.eup %3102  ;;  %v3628_v30 = vmul.f32 %v3605_v26, %v629_v52  ;;  %vm665_vm6 = vcmp.ge.f32.partialorder %v3615_v46, 0.0 }
 0x192   : > { %3108 = vrcp.f32 %v695_v48  ;;  %v688_v54 = vmul.f32 0.3275911, %v680_v29  ;;  %v3625_v57 = vmul.f32 0.70710677, %v3621_v51  ;;  %v630_v59 = vmul.f32 %v3103_v53, %v3575_v40  ;;  %v3105_v60 = vpop.eup %3104 }
 0x193   : > { %v689_v55 = vmul.f32 0.3275911, %v681_v22  ;;  %v3633_v62 = vmul.f32 0.70710677, %v3628_v30  ;;  %v631_v0 = vmul.f32 %v3105_v60, %v3584_v49  ;;  %v807_v40 = vsub.f32 0.0, %v679_v38 }
 0x194   : > { %v696_v56 = vadd.f32 1.0, %v688_v54  ;;  %v682_v61 = vand.u32 2147483647, %v3625_v57  ;;  %v3636_v63 = vmul.f32 %v3605_v26, %v630_v59  ;;  %v808_v12 = vsub.f32 0.0, %v680_v29 }
 0x195   : > { %v697_v58 = vadd.f32 1.0, %v689_v55  ;;  %v683_v4 = vand.u32 2147483647, %v3633_v62  ;;  %v3107_v5 = vpop.eup %3106  ;;  %v3646_v8 = vmul.f32 %v3605_v26, %v631_v0  ;;  %v815_v20 = vmul.f32 %v807_v40, %v679_v38 }
 0x196   : > { %3110 = vrcp.f32 %v696_v56  ;;  %v690_v39 = vmul.f32 0.3275911, %v682_v61  ;;  %v3643_v7 = vmul.f32 0.70710677, %v3636_v63  ;;  %v632_v17 = vmul.f32 %v3107_v5, %v3587_v50 }
 0x197   : > { %3112 = vrcp.f32 %v697_v58  ;;  %v691_v11 = vmul.f32 0.3275911, %v683_v4  ;;  %v3651_v49 = vmul.f32 0.70710677, %v3646_v8  ;;  %v809_v32 = vsub.f32 0.0, %v681_v22 }
 0x198   : > { %v3639_v1 = vadd.f32 1.0, %v690_v39  ;;  %v684_v15 = vand.u32 2147483647, %v3643_v7  ;;  %v816_v34 = vmul.f32 %v808_v12, %v680_v29  ;;  %v810_v37 = vsub.f32 0.0, %v682_v61 }
 0x199   : > { %v3653_v16 = vadd.f32 1.0, %v691_v11  ;;  %v3659_v24 = vand.u32 2147483647, %v3651_v49  ;;  %v3673_v38 = vmul.f32 %v3605_v26, %v632_v17  ;;  %v823_v44 = vmul.f32 1.442695, %v815_v20 }
 0x19a   : > { %3114 = vrcp.f32 %v3639_v1  ;;  %v692_v23 = vmul.f32 0.3275911, %v684_v15  ;;  %v811_v21 = vsub.f32 0.0, %v683_v4  ;;  %v817_v52 = vmul.f32 %v809_v32, %v681_v22 }
 0x19b   : > { %3116 = vrcp.f32 %v3653_v16  ;;  %v693_v31 = vmul.f32 0.3275911, %v3659_v24  ;;  %v3681_v53 = vmul.f32 0.70710677, %v3673_v38  ;;  %v825_v43 = vmul.f32 1.442695, %v816_v34 }
 0x19c   : > { %v3667_v50 = vadd.f32 1.0, %v692_v23  ;;  %v812_v54 = vsub.f32 0.0, %v684_v15  ;;  %v818_v60 = vmul.f32 %v810_v37, %v682_v61  ;;  %v819_v0 = vmul.f32 %v811_v21, %v683_v4 }
 0x19d   : > { %v3676_v47 = vadd.f32 1.0, %v693_v31  ;;  %v686_v22 = vand.u32 2147483647, %v3681_v53  ;;  %v827_v40 = vmul.f32 1.442695, %v817_v52  ;;  %v813_v32 = vsub.f32 0.0, %v3659_v24 }
 0x19e   : > { %3118 = vrcp.f32 %v3667_v50  ;;  %v820_v12 = vmul.f32 %v812_v54, %v684_v15  ;;  %v829_v4 = vmul.f32 1.442695, %v818_v60  ;;  %vm666_vm7 = vcmp.ge.f32.partialorder %v3625_v57, 0.0 }
 0x19f   : > { %v3109_v18 = vpop.eup %3108  ;;  %3120 = vrcp.f32 %v3676_v47  ;;  %v694_v17 = vmul.f32 0.3275911, %v686_v22  ;;  %vm667_vm8 = vcmp.ge.f32.partialorder %v3633_v62, 0.0  ;;  %vm668_vm9 = vcmp.ge.f32.partialorder %v3643_v7, 0.0 }
 0x1a0   : > { %v711_v28 = vmul.f32 %v3109_v18, %v695_v48  ;;  %3122 = vpow2.f32 %v823_v44  ;;  %vm669_vm10 = vcmp.ge.f32.partialorder %v3651_v49, 0.0  ;;  %v651_v7 = vmul.f32 0.5, %v3628_v30 }
 0x1a1   : > { %3124 = vpow2.f32 %v825_v43  ;;  %v3697_v34 = vadd.f32 1.0, %v694_v17  ;;  %v3713_v43 = vsel %vm665_vm6, 1.0, %v3289_v25  ;;  %v653_v30 = vmul.f32 0.5, %v3646_v8  ;;  %v2709_v8 = vld [vmem:[%s4928_s3] ss:$0 sm:$0xff] }
 0x1a2   : > { %v719_v35 = vsub.f32 2.0, %v711_v28  ;;  %v831_v28 = vmul.f32 1.442695, %v819_v0  ;;  %3126 = vpow2.f32 %v827_v40  ;;  %vm670_vm11 = vcmp.ge.f32.partialorder %v3681_v53, 0.0 }
 0x1a3   : > { %v3111_v42 = vpop.eup %3110  ;;  %3128 = vrcp.f32 %v3697_v34 }
 0x1a4   : > { %v3113_v41 = vpop.eup %3112  ;;  %v3678_v48 = vmul.f32 %v3109_v18, %v719_v35  ;;  %v712_v29 = vmul.f32 %v3111_v42, %v696_v56  ;;  %3130 = vpow2.f32 %v829_v4 }
 0x1a5   : > { %v713_v26 = vmul.f32 %v3113_v41, %v697_v58  ;;  %3132 = vpow2.f32 %v831_v28 }
 0x1a6   : > { %v735_v55 = vmul.f32 1.0614054, %v3678_v48  ;;  %v720_v59 = vsub.f32 2.0, %v712_v29 }
 0x1a7   : > { %v721_v39 = vsub.f32 2.0, %v713_v26  ;;  %v3115_v11 = vpop.eup %3114  ;;  %v821_v26 = vmul.f32 %v813_v32, %v3659_v24 }
 0x1a8   : > { %v743_v56 = vadd.f32 -1.4531521, %v735_v55  ;;  %v3688_v5 = vmul.f32 %v3111_v42, %v720_v59  ;;  %v714_v20 = vmul.f32 %v3115_v11, %v3639_v1  ;;  %v3117_v15 = vpop.eup %3116  ;;  %v3702_v42 = vsel %vm664_vm5, 1.0, %v3289_v25 }
 0x1a9   : > { %v3690_v58 = vmul.f32 %v3113_v41, %v721_v39  ;;  %v833_v1 = vmul.f32 1.442695, %v820_v12  ;;  %v715_v52 = vmul.f32 %v3117_v15, %v3653_v16 }
 0x1aa   : > { %v751_v61 = vmul.f32 %v743_v56, %v3678_v48  ;;  %v736_v18 = vmul.f32 1.0614054, %v3688_v5  ;;  %v722_v37 = vsub.f32 2.0, %v714_v20  ;;  %v814_v56 = vsub.f32 0.0, %v686_v22 }
 0x1ab   : > { %v737_v23 = vmul.f32 1.0614054, %v3690_v58  ;;  %v3119_v54 = vpop.eup %3118  ;;  %v723_v0 = vsub.f32 2.0, %v715_v52  ;;  %3134 = vpow2.f32 %v833_v1 }
 0x1ac   : > { %v759_v31 = vadd.f32 1.4214138, %v751_v61  ;;  %v744_v35 = vadd.f32 -1.4531521, %v736_v18  ;;  %v3707_v29 = vmul.f32 %v3115_v11, %v722_v37  ;;  %v716_v16 = vmul.f32 %v3119_v54, %v3667_v50  ;;  %v3121_v12 = vpop.eup %3120 }
 0x1ad   : > { %v745_v44 = vadd.f32 -1.4531521, %v737_v23  ;;  %v3722_v17 = vmul.f32 %v3117_v15, %v723_v0  ;;  %v835_v18 = vmul.f32 1.442695, %v821_v26  ;;  %v717_v50 = vmul.f32 %v3121_v12, %v3676_v47  ;;  %v3123_v28 = vpop.eup %3122 }
 0x1ae   : > { %v767_v21 = vmul.f32 %v759_v31, %v3678_v48  ;;  %v752_v41 = vmul.f32 %v744_v35, %v3688_v5  ;;  %v738_v60 = vmul.f32 1.0614054, %v3707_v29  ;;  %v724_v61 = vsub.f32 2.0, %v716_v16 }
 0x1af   : > { %v753_v45 = vmul.f32 %v745_v44, %v3690_v58  ;;  %v739_v31 = vmul.f32 1.0614054, %v3722_v17  ;;  %v822_v37 = vmul.f32 %v814_v56, %v686_v22  ;;  %v3125_v44 = vpop.eup %3124  ;;  %3136 = vpow2.f32 %v835_v18 }
 0x1b0   : > { %v775_v55 = vadd.f32 -0.28449672, %v767_v21  ;;  %v760_v59 = vadd.f32 1.4214138, %v752_v41  ;;  %v746_v11 = vadd.f32 -1.4531521, %v738_v60  ;;  %v3727_v35 = vmul.f32 %v3119_v54, %v724_v61 }
 0x1b1   : > { %v761_v39 = vadd.f32 1.4214138, %v753_v45  ;;  %v725_v41 = vsub.f32 2.0, %v717_v50  ;;  %v747_v45 = vadd.f32 -1.4531521, %v739_v31 }
 0x1b2   : > { %v783_v46 = vmul.f32 %v775_v55, %v3678_v48  ;;  %v768_v40 = vmul.f32 %v760_v59, %v3688_v5  ;;  %v754_v23 = vmul.f32 %v746_v11, %v3707_v29  ;;  %v740_v47 = vmul.f32 1.0614054, %v3727_v35  ;;  %v3127_v59 = vpop.eup %3126 }
 0x1b3   : > { %v769_v24 = vmul.f32 %v761_v39, %v3690_v58  ;;  %v3735_v22 = vmul.f32 %v3121_v12, %v725_v41  ;;  %v755_v60 = vmul.f32 %v747_v45, %v3722_v17  ;;  %v837_v0 = vmul.f32 1.442695, %v822_v37  ;;  %v3129_v16 = vpop.eup %3128 }
 0x1b4   : > { %v791_v20 = vadd.f32 0.2548296, %v783_v46  ;;  %v776_v4 = vadd.f32 -0.28449672, %v768_v40  ;;  %v762_v21 = vadd.f32 1.4214138, %v754_v23  ;;  %v718_v12 = vmul.f32 %v3129_v16, %v3697_v34 }
 0x1b5   : > { %v777_v32 = vadd.f32 -0.28449672, %v769_v24  ;;  %v748_v39 = vadd.f32 -1.4531521, %v740_v47  ;;  %v741_v11 = vmul.f32 1.0614054, %v3735_v22  ;;  %3138 = vpow2.f32 %v837_v0 }
 0x1b6   : > { %v799_v1 = vmul.f32 %v791_v20, %v3678_v48  ;;  %v784_v15 = vmul.f32 %v776_v4, %v3688_v5  ;;  %v770_v54 = vmul.f32 %v762_v21, %v3707_v29  ;;  %v763_v61 = vadd.f32 1.4214138, %v755_v60  ;;  %v3131_v20 = vpop.eup %3130 }
 0x1b7   : > { %v785_v52 = vmul.f32 %v777_v32, %v3690_v58  ;;  %v756_v18 = vmul.f32 %v748_v39, %v3727_v35  ;;  %v3133_v32 = vpop.eup %3132 }
 0x1b8   : > { %v839_v26 = vmul.f32 %v3123_v28, %v799_v1  ;;  %v792_v55 = vadd.f32 0.2548296, %v784_v15  ;;  %v778_v40 = vadd.f32 -0.28449672, %v770_v54  ;;  %v749_v28 = vadd.f32 -1.4531521, %v741_v11 }
 0x1b9   : > { %v793_v48 = vadd.f32 0.2548296, %v785_v52  ;;  %v764_v37 = vadd.f32 1.4214138, %v756_v18  ;;  %v726_v1 = vsub.f32 2.0, %v718_v12  ;;  %v3135_v52 = vpop.eup %3134 }
 0x1ba   : > { %v847_v56 = vsub.f32 1.0, %v839_v26  ;;  %v800_v46 = vmul.f32 %v792_v55, %v3688_v5  ;;  %v786_v50 = vmul.f32 %v778_v40, %v3707_v29  ;;  %v771_v5 = vmul.f32 %v763_v61, %v3722_v17 }
 0x1bb   : > { %v801_v24 = vmul.f32 %v793_v48, %v3690_v58  ;;  %v757_v41 = vmul.f32 %v749_v28, %v3735_v22 }
 0x1bc   : > { %v855_v4 = vmul.f32 %v847_v56, %v3662_v27  ;;  %v840_v23 = vmul.f32 %v3125_v44, %v800_v46  ;;  %v794_v21 = vadd.f32 0.2548296, %v786_v50  ;;  %v779_v45 = vadd.f32 -0.28449672, %v771_v5  ;;  %v3137_v11 = vpop.eup %3136 }
 0x1bd   : > { %v841_v31 = vmul.f32 %v3127_v59, %v801_v24  ;;  %v772_v27 = vmul.f32 %v764_v37, %v3727_v35  ;;  %v3748_v44 = vmul.f32 %v3129_v16, %v726_v1  ;;  %v765_v54 = vadd.f32 1.4214138, %v757_v41 }
 0x1be   : > { %v863_v15 = vadd.f32 1.0, %v855_v4  ;;  %v848_v58 = vsub.f32 1.0, %v840_v23  ;;  %v802_v55 = vmul.f32 %v794_v21, %v3707_v29  ;;  %v787_v48 = vmul.f32 %v779_v45, %v3722_v17 }
 0x1bf   : > { %v849_v34 = vsub.f32 1.0, %v841_v31  ;;  %v780_v60 = vadd.f32 -0.28449672, %v772_v27  ;;  %v742_v39 = vmul.f32 1.0614054, %v3748_v44  ;;  %v674_v16 = vsel %vm666_vm7, 1.0, %v3289_v25 }
 0x1c0   : > { %v871_v47 = vmul.f32 %v863_v15, %v3656_v19  ;;  %v856_v26 = vmul.f32 %v848_v58, %v3702_v42  ;;  %v842_v19 = vmul.f32 %v3131_v20, %v802_v55  ;;  %v773_v42 = vmul.f32 %v765_v54, %v3735_v22 }
 0x1c1   : > { %v857_v59 = vmul.f32 %v849_v34, %v3713_v43  ;;  %v795_v29 = vadd.f32 0.2548296, %v787_v48  ;;  %v788_v40 = vmul.f32 %v780_v60, %v3727_v35  ;;  %v750_v43 = vadd.f32 -1.4531521, %v742_v39 }
 0x1c2   : > { %2986 = vmatprep.mubr.msk.f32.mxu0 %vm527_vm2, %v871_v47  ;;  %v864_v56 = vadd.f32 1.0, %v856_v26  ;;  %v850_v61 = vsub.f32 1.0, %v842_v19  ;;  %v781_v18 = vadd.f32 -0.28449672, %v773_v42  ;;  %v675_v58 = vsel %vm667_vm8, 1.0, %v3289_v25  ;;  %v3139_v48 = vpop.eup %3138 }
 0x1c3   : > { %v865_v46 = vadd.f32 1.0, %v857_v59  ;;  %v803_v4 = vmul.f32 %v795_v29, %v3722_v17  ;;  %v796_v57 = vadd.f32 0.2548296, %v788_v40  ;;  %v758_v20 = vmul.f32 %v750_v43, %v3748_v44 }
 0x1c4   : > { %v872_v24 = vmul.f32 %v864_v56, %v3665_v33  ;;  %v858_v23 = vmul.f32 %v850_v61, %v674_v16  ;;  %v789_v50 = vmul.f32 %v781_v18, %v3735_v22  ;;  %v652_v27 = vmul.f32 0.5, %v3636_v63 }
 0x1c5   : > { %v873_v12 = vmul.f32 %v865_v46, %v3670_v36  ;;  %v843_v33 = vmul.f32 %v3133_v32, %v803_v4  ;;  %v804_v28 = vmul.f32 %v796_v57, %v3727_v35  ;;  %v766_v0 = vadd.f32 1.4214138, %v758_v20 }
 0x1c6   : > { %2987 = vmatmul.mubr.msk.f32.vlgmr.msra.gmra.mxu0 %vm527_vm2, %v872_v24  ;;  %v650_v36 = vmul.f32 0.5, %v3621_v51  ;;  %v866_v31 = vadd.f32 1.0, %v858_v23  ;;  %v797_v17 = vadd.f32 0.2548296, %v789_v50  ;;  %v676_v51 = vsel %vm668_vm9, 1.0, %v3289_v25 }
 0x1c7   : > { %2989 = vmatprep.mubr.msk.f32.mxu0 %vm527_vm2, %v873_v12  ;;  %v851_v5 = vsub.f32 1.0, %v843_v33  ;;  %v844_v37 = vmul.f32 %v3135_v52, %v804_v28  ;;  %v774_v1 = vmul.f32 %v766_v0, %v3748_v44  ;;  %v677_v55 = vsel %vm669_vm10, 1.0, %v3289_v25 }
 0x1c8   : > { %v874_v15 = vmul.f32 %v866_v31, %v650_v36  ;;  %v805_v21 = vmul.f32 %v797_v17, %v3735_v22  ;;  %v678_v19 = vsel %vm670_vm11, 1.0, %v3289_v25  ;;  %v654_v46 = vmul.f32 0.5, %v3673_v38 }
 0x1c9   : > { %v859_v62 = vmul.f32 %v851_v5, %v675_v58  ;;  %v852_v32 = vsub.f32 1.0, %v844_v37  ;;  %v782_v41 = vadd.f32 -0.28449672, %v774_v1  ;;  %v1384_v58 = vld [vmem:[%s4932_s7] sm:$0xf] }
 0x1ca   : > { %2990 = vmatmul.mubr.msk.f32.gmra.mxu0 %vm527_vm2, %v874_v15  ;;  %v845_v35 = vmul.f32 %v3137_v11, %v805_v21  ;;  %2998 = vmatprep.subr.msk.mxu1 %vm911_vm3, %v1384_v58 }
 0x1cb   : > { %v867_v52 = vadd.f32 1.0, %v859_v62  ;;  %v860_v34 = vmul.f32 %v852_v32, %v676_v51  ;;  %v790_v45 = vmul.f32 %v782_v41, %v3748_v44  ;;  %2999 = vmatpush3.msk.msra.mxu1 %vm911_vm3, %v1384_v58 }
 0x1cc   : > { %v853_v47 = vsub.f32 1.0, %v845_v35  ;;  %3001 = vmatmul.mubr.msk.f32.vlgmr.msra.gmra.mxu1 %vm527_vm2, %v3517_v3 }
 0x1cd   : > { %v875_v22 = vmul.f32 %v867_v52, %v651_v7  ;;  %v868_v26 = vadd.f32 1.0, %v860_v34  ;;  %v798_v54 = vadd.f32 0.2548296, %v790_v45  ;;  %3003 = vmatprep.mubr.msk.f32.mxu1 %vm527_vm2, %v3514_v2 }
 0x1ce   : > { %v861_v59 = vmul.f32 %v853_v47, %v677_v55 }
 0x1cf   : > { %2992 = vmatprep.mubr.msk.f32.mxu0 %vm527_vm2, %v875_v22  ;;  %v876_v49 = vmul.f32 %v868_v26, %v652_v27  ;;  %v806_v60 = vmul.f32 %v798_v54, %v3748_v44 }
 0x1d0   : > { %v869_v39 = vadd.f32 1.0, %v861_v59  ;;  %3004 = vmatmul.mubr.msk.f32.gmra.mxu1 %vm527_vm2, %v3523_v6 }
 0x1d1   : > { %2993 = vmatmul.mubr.msk.f32.gmra.mxu0 %vm527_vm2, %v876_v49  ;;  %v846_v63 = vmul.f32 %v3139_v48, %v806_v60  ;;  %3006 = vmatprep.mubr.msk.f32.mxu1 %vm527_vm2, %v3531_v9 }
 0x1d2   : > { %v877_v56 = vmul.f32 %v869_v39, %v653_v30 }
 0x1d3   : > { %v854_v16 = vsub.f32 1.0, %v846_v63 }
 0x1d4   : > { %2995 = vmatprep.mubr.msk.f32.mxu0 %vm527_vm2, %v877_v56  ;;  %3007 = vmatmul.mubr.msk.f32.gmra.mxu1 %vm527_vm2, %v3534_v10 }
 0x1d5   : > { %v862_v42 = vmul.f32 %v854_v16, %v678_v19  ;;  %3009 = vmatprep.mubr.msk.f32.mxu1 %vm527_vm2, %v3541_v13 }
 0x1d7   : > { %v870_v29 = vadd.f32 1.0, %v862_v42 }
 0x1d8   : > { %3010 = vmatmul.mubr.msk.f32.gmra.mxu1 %vm527_vm2, %v3544_v14 }
 0x1d9   : > { %v878_v40 = vmul.f32 %v870_v29, %v654_v46 }
 0x1db   : > { %2996 = vmatmul.mubr.msk.f32.gmra.mxu0 %vm527_vm2, %v878_v40 }
 0x286   : > { %v2988_v44 = vpop.f32.mrf.mxu0 }
 0x287   : > { %v987_v53 = vadd.f32 %v2988_v44, %v2709_v8 }
 0x288   : > { %v981_v43 = vpop.f32.mrf.mxu0 }
 0x289   : > { %v982_v11 = vadd.f32 %v2709_v8, %v981_v43  ;;  %v1025_v24 = vsel %vm1021_vm12, %v987_v53, 0.0 }
 0x28a   : > { %1026 = vadd.xlane.f32.xlu1 %v1025_v24  ;;  %v2991_v18 = vpop.f32.mrf.mxu0 }
 0x28b   : > { %v1022_v61 = vsel %vm1021_vm12, %v982_v11, 0.0  ;;  %v997_v38 = vadd.f32 %v2991_v18, %v2709_v8 }
 0x28c   : > { %1023 = vadd.xlane.f32.xlu0 %v1022_v61  ;;  %v991_v12 = vpop.f32.mrf.mxu0  ;;  %v3002_v43 = vpop.f32.mrf.mxu1 }
 0x28d   : > { %v992_v4 = vadd.f32 %v2709_v8, %v991_v12  ;;  %v1031_v57 = vsel %vm1021_vm12, %v997_v38, 0.0 }
 0x28e   : > { %1032 = vadd.xlane.f32.xlu1 %v1031_v57  ;;  %v1485_v24 = vpop.f32.mrf.mxu1 }
 0x28f   : > { %v1028_v20 = vsel %vm1021_vm12, %v992_v4, 0.0 }
 0x290   : > { %1029 = vadd.xlane.f32.xlu0 %v1028_v20 }
 0x291   : > { %v2994_v23 = vpop.f32.mrf.mxu0 }
 0x292   : > { %v1007_v50 = vadd.f32 %v2994_v23, %v2709_v8 }
 0x293   : > { %v1001_v33 = vpop.f32.mrf.mxu0 }
 0x294   : > { %v1002_v28 = vadd.f32 %v2709_v8, %v1001_v33  ;;  %v1037_v0 = vsel %vm1021_vm12, %v1007_v50, 0.0 }
 0x295   : > { %1038 = vadd.xlane.f32.xlu1 %v1037_v0 }
 0x296   : > { %v1034_v36 = vsel %vm1021_vm12, %v1002_v28, 0.0 }
 0x297   : > { %1035 = vadd.xlane.f32.xlu0 %v1034_v36 }
 0x29b   : > { %v2997_v31 = vpop.f32.mrf.mxu0 }
 0x29c   : > { %v1017_v17 = vadd.f32 %v2997_v31, %v2709_v8 }
 0x29d   : > { %v1011_v5 = vpop.f32.mrf.mxu0 }
 0x29e   : > { %v1012_v37 = vadd.f32 %v2709_v8, %v1011_v5  ;;  %v1043_v1 = vsel %vm1021_vm12, %v1017_v17, 0.0 }
 0x29f   : > { %1044 = vadd.xlane.f32.xlu1 %v1043_v1 }
 0x2a0   : > { %v1040_v15 = vsel %vm1021_vm12, %v1012_v37, 0.0 }
 0x2a1   : > { %1041 = vadd.xlane.f32.xlu0 %v1040_v15 }
 0x313   : > { %v1027_v21 = vpop.xlane.xlu1 %1026 }
 0x314   : > { %v1048_v3 = vmul.f32 0.125, %v1027_v21 }
 0x315   : > { %v1024_v62 = vpop.xlane.xlu0 %1023 }
 0x316   : > { %v3822_v32 = vsub.f32 %v987_v53, %v1048_v3  ;;  %v1047_v2 = vmul.f32 0.125, %v1024_v62 }
 0x317   : > { %v1033_v9 = vpop.xlane.xlu1 %1032 }
 0x318   : > { %v3824_v41 = vsub.f32 %v982_v11, %v1047_v2  ;;  %v1064_v6 = vmul.f32 %v3822_v32, %v3822_v32  ;;  %v1050_v51 = vmul.f32 0.125, %v1033_v9  ;;  %v2728_v11 = vld [vmem:[%s4933_s8] ss:$0 sm:$0xff] }
 0x319   : > { %v1030_v35 = vpop.xlane.xlu0 %1029  ;;  %v1491_v61 = vadd.f32 %v3002_v43, %v2728_v11  ;;  %v1486_v18 = vadd.f32 %v2728_v11, %v1485_v24 }
 0x31a   : > { %v1074_v10 = vsel %vm1021_vm12, %v1064_v6, 0.0  ;;  %v1063_v13 = vmul.f32 %v3824_v41, %v3824_v41  ;;  %v3831_v14 = vsub.f32 %v997_v38, %v1050_v51  ;;  %v1049_v7 = vmul.f32 0.125, %v1030_v35  ;;  %v3005_v38 = vpop.f32.mrf.mxu1 }
 0x31b   : > { %1075 = vadd.xlane.f32.xlu1 %v1074_v10  ;;  %1539 = vst.msk [vmem:[%s1537_s19 + $0x8] sm:$0xff] %vm1021_vm12, %v1491_v61  ;;  %1538 = vst.msk [vmem:[%s1537_s19] sm:$0xff] %vm1021_vm12, %v1486_v18 }
 0x31c   : > { %v1071_v52 = vsel %vm1021_vm12, %v1063_v13, 0.0  ;;  %v3834_v34 = vsub.f32 %v992_v4, %v1049_v7  ;;  %v1066_v45 = vmul.f32 %v3831_v14, %v3831_v14  ;;  %v1495_v12 = vpop.f32.mrf.mxu1  ;;  %v1501_v4 = vadd.f32 %v3005_v38, %v2728_v11 }
 0x31d   : > { %1072 = vadd.xlane.f32.xlu0 %v1071_v52  ;;  %v1496_v57 = vadd.f32 %v2728_v11, %v1495_v12 }
 0x31e   : > { %v1039_v27 = vpop.xlane.xlu1 %1038  ;;  %v1080_v47 = vsel %vm1021_vm12, %v1066_v45, 0.0  ;;  %v1065_v22 = vmul.f32 %v3834_v34, %v3834_v34  ;;  %v3008_v20 = vpop.f32.mrf.mxu1  ;;  %1541 = vst.msk [vmem:[%s1537_s19 + $0x18] sm:$0xff] %vm1021_vm12, %v1501_v4  ;;  %v3879_v45 = vld [vmem:[%s4929_s4] ss:$0 sm:$0xff] }
 0x31f   : > { %v1052_v26 = vmul.f32 0.125, %v1039_v27  ;;  %1081 = vadd.xlane.f32.xlu1 %v1080_v47  ;;  %1540 = vst.msk [vmem:[%s1537_s19 + $0x10] sm:$0xff] %vm1021_vm12, %v1496_v57 }
 0x320   : > { %v1036_v55 = vpop.xlane.xlu0 %1035  ;;  %v1077_v54 = vsel %vm1021_vm12, %v1065_v22, 0.0  ;;  %v1505_v23 = vpop.f32.mrf.mxu1 }
 0x321   : > { %v3842_v59 = vsub.f32 %v1007_v50, %v1052_v26  ;;  %v1051_v48 = vmul.f32 0.125, %v1036_v55  ;;  %1078 = vadd.xlane.f32.xlu0 %v1077_v54  ;;  %v1511_v50 = vadd.f32 %v3008_v20, %v2728_v11  ;;  %v1506_v33 = vadd.f32 %v2728_v11, %v1505_v23 }
 0x323   : > { %v3844_v49 = vsub.f32 %v1002_v28, %v1051_v48  ;;  %v1068_v60 = vmul.f32 %v3842_v59, %v3842_v59  ;;  %v3011_v28 = vpop.f32.mrf.mxu1  ;;  %1543 = vst.msk [vmem:[%s1537_s19 + $0x28] sm:$0xff] %vm1021_vm12, %v1511_v50  ;;  %1542 = vst.msk [vmem:[%s1537_s19 + $0x20] sm:$0xff] %vm1021_vm12, %v1506_v33 }
 0x324   : > { %v1521_v36 = vadd.f32 %v3011_v28, %v2728_v11 }
 0x325   : > { %v1086_v30 = vsel %vm1021_vm12, %v1068_v60, 0.0  ;;  %v1067_v39 = vmul.f32 %v3844_v49, %v3844_v49  ;;  %v1515_v0 = vpop.f32.mrf.mxu1 }
 0x326   : > { %1087 = vadd.xlane.f32.xlu1 %v1086_v30  ;;  %v1516_v31 = vadd.f32 %v2728_v11, %v1515_v0  ;;  %1545 = vst.msk [vmem:[%s1537_s19 + $0x38] sm:$0xff] %vm1021_vm12, %v1521_v36 }
 0x327   : > { %v1083_v63 = vsel %vm1021_vm12, %v1067_v39, 0.0 }
 0x328   : > { %v1045_v56 = vpop.xlane.xlu1 %1044  ;;  %1084 = vadd.xlane.f32.xlu0 %v1083_v63  ;;  %1544 = vst.msk [vmem:[%s1537_s19 + $0x30] sm:$0xff] %vm1021_vm12, %v1516_v31 }
 0x329   : > { %v1054_v16 = vmul.f32 0.125, %v1045_v56 }
 0x32a   : > { %v1042_v19 = vpop.xlane.xlu0 %1041 }
 0x32b   : > { %v3852_v42 = vsub.f32 %v1017_v17, %v1054_v16  ;;  %v1053_v46 = vmul.f32 0.125, %v1042_v19 }
 0x32d   : > { %v3854_v29 = vsub.f32 %v1012_v37, %v1053_v46  ;;  %v1070_v40 = vmul.f32 %v3852_v42, %v3852_v42 }
 0x32f   : > { %v1092_v8 = vsel %vm1021_vm12, %v1070_v40, 0.0  ;;  %v1069_v44 = vmul.f32 %v3854_v29, %v3854_v29 }
 0x330   : > { %1093 = vadd.xlane.f32.xlu1 %v1092_v8 }
 0x331   : > { %v1089_v53 = vsel %vm1021_vm12, %v1069_v44, 0.0 }
 0x332   : > { %1090 = vadd.xlane.f32.xlu0 %v1089_v53 }
 0x3a4   : > { %v1076_v17 = vpop.xlane.xlu1 %1075 }
 0x3a5   : > { %v1096_v5 = vmul.f32 0.125, %v1076_v17 }
 0x3a6   : > { %v1073_v37 = vpop.xlane.xlu0 %1072 }
 0x3a7   : > { %v1104_v1 = vadd.f32 1e-05, %v1096_v5  ;;  %v1095_v15 = vmul.f32 0.125, %v1073_v37 }
 0x3a8   : > { %v1082_v21 = vpop.xlane.xlu1 %1081 }
 0x3a9   : > { %3140 = vrsqrt.f32 %v1104_v1  ;;  %v1103_v58 = vadd.f32 1e-05, %v1095_v15  ;;  %v1098_v3 = vmul.f32 0.125, %v1082_v21 }
 0x3aa   : > { %v1079_v62 = vpop.xlane.xlu0 %1078 }
 0x3ab   : > { %3142 = vrsqrt.f32 %v1103_v58  ;;  %v1106_v2 = vadd.f32 1e-05, %v1098_v3  ;;  %v1097_v6 = vmul.f32 0.125, %v1079_v62 }
 0x3ad   : > { %3144 = vrsqrt.f32 %v1106_v2  ;;  %v1105_v9 = vadd.f32 1e-05, %v1097_v6 }
 0x3af   : > { %3146 = vrsqrt.f32 %v1105_v9  ;;  %v1088_v51 = vpop.xlane.xlu1 %1087 }
 0x3b0   : > { %v1100_v10 = vmul.f32 0.125, %v1088_v51 }
 0x3b1   : > { %v1085_v13 = vpop.xlane.xlu0 %1084 }
 0x3b2   : > { %v1108_v35 = vadd.f32 1e-05, %v1100_v10  ;;  %v1099_v7 = vmul.f32 0.125, %v1085_v13 }
 0x3b4   : > { %3148 = vrsqrt.f32 %v1108_v35  ;;  %v1107_v27 = vadd.f32 1e-05, %v1099_v7 }
 0x3b6   : > { %v3141_v52 = vpop.eup %3140  ;;  %3150 = vrsqrt.f32 %v1107_v27 }
 0x3b7   : > { %v1120_v47 = vmul.f32 %v3141_v52, %v3822_v32 }
 0x3b8   : > { %v3143_v22 = vpop.eup %3142 }
 0x3b9   : > { %v1134_v26 = vmul.f32 %v3879_v45, %v1120_v47  ;;  %v1119_v55 = vmul.f32 %v3143_v22, %v3824_v41  ;;  %v1094_v60 = vpop.xlane.xlu1 %1093 }
 0x3ba   : > { %v3145_v30 = vpop.eup %3144  ;;  %v1102_v39 = vmul.f32 0.125, %v1094_v60 }
 0x3bb   : > { %v3884_v54 = vmul.f32 0.70710677, %v1134_v26  ;;  %v1133_v48 = vmul.f32 %v3879_v45, %v1119_v55  ;;  %v1091_v16 = vpop.xlane.xlu0 %1090  ;;  %v1122_v32 = vmul.f32 %v3145_v30, %v3831_v14  ;;  %v3939_v35 = vmul.f32 0.5, %v1134_v26 }
 0x3bc   : > { %v3147_v19 = vpop.eup %3146  ;;  %v1110_v46 = vadd.f32 1e-05, %v1102_v39  ;;  %v1101_v53 = vmul.f32 0.125, %v1091_v16 }
 0x3bd   : > { %v1174_v63 = vand.u32 2147483647, %v3884_v54  ;;  %v3888_v56 = vmul.f32 0.70710677, %v1133_v48  ;;  %v3893_v41 = vmul.f32 %v3879_v45, %v1122_v32  ;;  %v1121_v44 = vmul.f32 %v3147_v19, %v3834_v34 }
 0x3be   : > { %3152 = vrsqrt.f32 %v1110_v46  ;;  %v1109_v4 = vadd.f32 1e-05, %v1101_v53  ;;  %vm1158_vm13 = vcmp.ge.f32.partialorder %v3884_v54, 0.0  ;;  %v3941_v52 = vmul.f32 0.5, %v1133_v48 }
 0x3bf   : > { %v1182_v40 = vmul.f32 0.3275911, %v1174_v63  ;;  %v1173_v8 = vand.u32 2147483647, %v3888_v56  ;;  %v3897_v24 = vmul.f32 0.70710677, %v3893_v41  ;;  %v3900_v61 = vmul.f32 %v3879_v45, %v1121_v44 }
 0x3c0   : > { %v1302_v15 = vsub.f32 0.0, %v1174_v63  ;;  %vm1157_vm14 = vcmp.ge.f32.partialorder %v3888_v56, 0.0  ;;  %v3945_v27 = vsel %vm1158_vm13, 1.0, %v3289_v25  ;;  %v3959_v32 = vmul.f32 0.5, %v3893_v41 }
 0x3c1   : > { %v1190_v43 = vadd.f32 1.0, %v1182_v40  ;;  %v1181_v11 = vmul.f32 0.3275911, %v1173_v8  ;;  %v3149_v14 = vpop.eup %3148  ;;  %v1176_v38 = vand.u32 2147483647, %v3897_v24  ;;  %v1301_v9 = vsub.f32 0.0, %v1173_v8 }
 0x3c2   : > { %v3904_v12 = vmul.f32 0.70710677, %v3900_v61  ;;  %v1124_v57 = vmul.f32 %v3149_v14, %v3842_v59  ;;  %v1310_v51 = vmul.f32 %v1302_v15, %v1174_v63  ;;  %v3954_v48 = vsel %vm1157_vm14, 1.0, %v3289_v25 }
 0x3c3   : > { %3154 = vrcp.f32 %v1190_v43  ;;  %v1189_v18 = vadd.f32 1.0, %v1181_v11  ;;  %v3151_v34 = vpop.eup %3150  ;;  %v1184_v20 = vmul.f32 0.3275911, %v1176_v38  ;;  %v1304_v22 = vsub.f32 0.0, %v1176_v38 }
 0x3c4   : > { %v1175_v23 = vand.u32 2147483647, %v3904_v12  ;;  %v3909_v50 = vmul.f32 %v3879_v45, %v1124_v57  ;;  %v1123_v28 = vmul.f32 %v3151_v34, %v3844_v49  ;;  %v1309_v60 = vmul.f32 %v1301_v9, %v1173_v8 }
 0x3c5   : > { %3156 = vrcp.f32 %v1189_v18  ;;  %v1192_v33 = vadd.f32 1.0, %v1184_v20  ;;  %v1319_v39 = vmul.f32 1.442695, %v1310_v51  ;;  %v1312_v53 = vmul.f32 %v1304_v22, %v1176_v38 }
 0x3c6   : > { %3158 = vrsqrt.f32 %v1109_v4  ;;  %v1183_v0 = vmul.f32 0.3275911, %v1175_v23  ;;  %v3913_v36 = vmul.f32 0.70710677, %v3909_v50  ;;  %v3916_v31 = vmul.f32 %v3879_v45, %v1123_v28 }
 0x3c7   : > { %3160 = vrcp.f32 %v1192_v33  ;;  %v1303_v30 = vsub.f32 0.0, %v1175_v23  ;;  %v1317_v14 = vmul.f32 1.442695, %v1309_v60  ;;  %vm1160_vm15 = vcmp.ge.f32.partialorder %v3897_v24, 0.0 }
 0x3c8   : > { %v1191_v59 = vadd.f32 1.0, %v1183_v0  ;;  %v1178_v17 = vand.u32 2147483647, %v3913_v36  ;;  %v3920_v5 = vmul.f32 0.70710677, %v3916_v31  ;;  %vm1159_vm0 = vcmp.ge.f32.partialorder %v3904_v12, 0.0 }
 0x3c9   : > { %vm1162_vm1 = vcmp.ge.f32.partialorder %v3913_v36, 0.0 }
 0x3ca   : > { %3162 = vrcp.f32 %v1191_v59  ;;  %v1186_v1 = vmul.f32 0.3275911, %v1178_v17  ;;  %v3923_v49 = vand.u32 2147483647, %v3920_v5  ;;  %v1306_v46 = vsub.f32 0.0, %v1178_v17 }
 0x3cb   : > { %v3153_v37 = vpop.eup %3152  ;;  %vm1161_vm2 = vcmp.ge.f32.partialorder %v3920_v5, 0.0 }
 0x3cc   : > { %v1126_v58 = vmul.f32 %v3153_v37, %v3852_v42  ;;  %v3926_v21 = vadd.f32 1.0, %v1186_v1  ;;  %v1185_v62 = vmul.f32 0.3275911, %v3923_v49  ;;  %v1169_v36 = vsel %vm1161_vm2, 1.0, %v3289_v25 }
 0x3ce   : > { %v3930_v2 = vmul.f32 %v3879_v45, %v1126_v58  ;;  %3164 = vrcp.f32 %v3926_v21  ;;  %v3934_v10 = vadd.f32 1.0, %v1185_v62 }
 0x3d0   : > { %v3155_v3 = vpop.eup %3154  ;;  %v3937_v13 = vmul.f32 0.70710677, %v3930_v2  ;;  %3166 = vrcp.f32 %v3934_v10 }
 0x3d1   : > { %v1206_v6 = vmul.f32 %v3155_v3, %v1190_v43  ;;  %3168 = vpow2.f32 %v1319_v39 }
 0x3d2   : > { %v3157_v42 = vpop.eup %3156  ;;  %v3951_v26 = vand.u32 2147483647, %v3937_v13  ;;  %vm1164_vm3 = vcmp.ge.f32.partialorder %v3937_v13, 0.0 }
 0x3d3   : > { %v1214_v7 = vsub.f32 2.0, %v1206_v6  ;;  %v1205_v47 = vmul.f32 %v3157_v42, %v1189_v18  ;;  %v3159_v55 = vpop.eup %3158 }
 0x3d4   : > { %v1125_v56 = vmul.f32 %v3159_v55, %v3854_v29  ;;  %v3161_v16 = vpop.eup %3160  ;;  %v1188_v40 = vmul.f32 0.3275911, %v3951_v26  ;;  %v1311_v29 = vmul.f32 %v1303_v30, %v1175_v23  ;;  %v1323_v23 = vmul.f32 1.442695, %v1312_v53 }
 0x3d5   : > { %v3948_v54 = vmul.f32 %v3155_v3, %v1214_v7  ;;  %v1213_v63 = vsub.f32 2.0, %v1205_v47  ;;  %v1208_v44 = vmul.f32 %v3161_v16, %v1192_v33 }
 0x3d6   : > { %v3965_v43 = vmul.f32 %v3879_v45, %v1125_v56  ;;  %v3968_v18 = vadd.f32 1.0, %v1188_v40  ;;  %v1314_v45 = vmul.f32 %v1306_v46, %v1178_v17  ;;  %v1321_v15 = vmul.f32 1.442695, %v1311_v29 }
 0x3d7   : > { %v1230_v19 = vmul.f32 1.0614054, %v3948_v54  ;;  %v3962_v8 = vmul.f32 %v3157_v42, %v1213_v63  ;;  %v3163_v4 = vpop.eup %3162  ;;  %v1216_v34 = vsub.f32 2.0, %v1208_v44  ;;  %v1308_v63 = vsub.f32 0.0, %v3951_v26 }
 0x3d8   : > { %v3972_v57 = vmul.f32 0.70710677, %v3965_v43  ;;  %v1207_v20 = vmul.f32 %v3163_v4, %v1191_v59  ;;  %3170 = vrcp.f32 %v3968_v18  ;;  %v1305_v59 = vsub.f32 0.0, %v3923_v49 }
 0x3d9   : > { %v1238_v11 = vadd.f32 -1.4531521, %v1230_v19  ;;  %v1229_v41 = vmul.f32 1.0614054, %v3962_v8  ;;  %v3976_v28 = vmul.f32 %v3161_v16, %v1216_v34  ;;  %3172 = vpow2.f32 %v1317_v14 }
 0x3da   : > { %v3979_v0 = vand.u32 2147483647, %v3972_v57  ;;  %v1215_v1 = vsub.f32 2.0, %v1207_v20  ;;  %v1327_v42 = vmul.f32 1.442695, %v1314_v45  ;;  %3174 = vpow2.f32 %v1323_v23 }
 0x3db   : > { %v1246_v38 = vmul.f32 %v1238_v11, %v3948_v54  ;;  %v1237_v33 = vadd.f32 -1.4531521, %v1229_v41  ;;  %v3165_v58 = vpop.eup %3164  ;;  %v1232_v62 = vmul.f32 1.0614054, %v3976_v28  ;;  %v1313_v44 = vmul.f32 %v1305_v59, %v3923_v49 }
 0x3dc   : > { %v1187_v17 = vmul.f32 0.3275911, %v3979_v0  ;;  %v3986_v9 = vmul.f32 %v3163_v4, %v1215_v1  ;;  %v1210_v51 = vmul.f32 %v3165_v58, %v3926_v21  ;;  %v4004_v11 = vsel %vm1160_vm15, 1.0, %v3289_v25 }
 0x3dd   : > { %v1254_v37 = vadd.f32 1.4214138, %v1246_v38  ;;  %v1245_v3 = vmul.f32 %v1237_v33, %v3962_v8  ;;  %v1240_v47 = vadd.f32 -1.4531521, %v1232_v62  ;;  %v3167_v55 = vpop.eup %3166  ;;  %v1316_v49 = vmul.f32 %v1308_v63, %v3951_v26 }
 0x3de   : > { %v3989_v22 = vadd.f32 1.0, %v1187_v17  ;;  %v1231_v30 = vmul.f32 1.0614054, %v3986_v9  ;;  %v1218_v39 = vsub.f32 2.0, %v1210_v51  ;;  %v1209_v19 = vmul.f32 %v3167_v55, %v3934_v10  ;;  %v3169_v45 = vpop.eup %3168 }
 0x3df   : > { %v1262_v6 = vmul.f32 %v1254_v37, %v3948_v54  ;;  %v1253_v7 = vadd.f32 1.4214138, %v1245_v3  ;;  %v1248_v16 = vmul.f32 %v1240_v47, %v3976_v28  ;;  %v1325_v37 = vmul.f32 1.442695, %v1313_v44 }
 0x3e0   : > { %3176 = vrcp.f32 %v3989_v22  ;;  %v1239_v46 = vadd.f32 -1.4531521, %v1231_v30  ;;  %v3998_v40 = vmul.f32 %v3165_v58, %v1218_v39  ;;  %v1217_v29 = vsub.f32 2.0, %v1209_v19 }
 0x3e1   : > { %v1270_v60 = vadd.f32 -0.28449672, %v1262_v6  ;;  %v1261_v56 = vmul.f32 %v1253_v7, %v3962_v8  ;;  %v1256_v14 = vadd.f32 1.4214138, %v1248_v16  ;;  %3178 = vpow2.f32 %v1321_v15 }
 0x3e2   : > { %v1247_v10 = vmul.f32 %v1239_v46, %v3986_v9  ;;  %v1234_v41 = vmul.f32 1.0614054, %v3998_v40  ;;  %v4010_v20 = vmul.f32 %v3167_v55, %v1217_v29  ;;  %3180 = vpow2.f32 %v1327_v42 }
 0x3e3   : > { %v1278_v21 = vmul.f32 %v1270_v60, %v3948_v54  ;;  %v1269_v53 = vadd.f32 -0.28449672, %v1261_v56  ;;  %v1264_v38 = vmul.f32 %v1256_v14, %v3976_v28  ;;  %v1331_v47 = vmul.f32 1.442695, %v1316_v49 }
 0x3e4   : > { %v1255_v33 = vadd.f32 1.4214138, %v1247_v10  ;;  %v1242_v23 = vadd.f32 -1.4531521, %v1234_v41  ;;  %v1233_v15 = vmul.f32 1.0614054, %v4010_v20  ;;  %3182 = vpow2.f32 %v1325_v37 }
 0x3e5   : > { %v1286_v4 = vadd.f32 0.2548296, %v1278_v21  ;;  %v1277_v34 = vmul.f32 %v1269_v53, %v3962_v8  ;;  %v3171_v1 = vpop.eup %3170  ;;  %v1272_v3 = vadd.f32 -0.28449672, %v1264_v38  ;;  %3184 = vpow2.f32 %v1331_v47 }
 0x3e6   : > { %v1263_v59 = vmul.f32 %v1255_v33, %v3986_v9  ;;  %v1250_v17 = vmul.f32 %v1242_v23, %v3998_v40  ;;  %v1212_v26 = vmul.f32 %v3171_v1, %v3968_v18  ;;  %v3173_v6 = vpop.eup %3172  ;;  %v1241_v7 = vadd.f32 -1.4531521, %v1233_v15 }
 0x3e7   : > { %v1294_v24 = vmul.f32 %v1286_v4, %v3948_v54  ;;  %v1285_v58 = vadd.f32 0.2548296, %v1277_v34  ;;  %v1280_v51 = vmul.f32 %v1272_v3, %v3976_v28  ;;  %v3175_v18 = vpop.eup %3174  ;;  %v1307_v41 = vsub.f32 0.0, %v3979_v0 }
 0x3e8   : > { %v1271_v55 = vadd.f32 -0.28449672, %v1263_v59  ;;  %v1258_v60 = vadd.f32 1.4214138, %v1250_v17  ;;  %v1220_v30 = vsub.f32 2.0, %v1212_v26  ;;  %v1249_v56 = vmul.f32 %v1241_v7, %v4010_v20 }
 0x3e9   : > { %v1334_v62 = vmul.f32 %v3169_v45, %v1294_v24  ;;  %v1293_v54 = vmul.f32 %v1285_v58, %v3962_v8  ;;  %v1288_v63 = vadd.f32 0.2548296, %v1280_v51  ;;  %vm1163_vm4 = vcmp.ge.f32.partialorder %v3972_v57, 0.0 }
 0x3ea   : > { %v1279_v8 = vmul.f32 %v1271_v55, %v3986_v9  ;;  %v1266_v19 = vmul.f32 %v1258_v60, %v3998_v40  ;;  %v4026_v21 = vmul.f32 %v3171_v1, %v1220_v30  ;;  %v1257_v53 = vadd.f32 1.4214138, %v1249_v56 }
 0x3eb   : > { %v1342_v42 = vsub.f32 1.0, %v1334_v62  ;;  %v1333_v39 = vmul.f32 %v3173_v6, %v1293_v54  ;;  %v1296_v44 = vmul.f32 %v1288_v63, %v3976_v28  ;;  %v1167_v6 = vsel %vm1159_vm0, 1.0, %v3289_v25 }
 0x3ec   : > { %v1287_v4 = vadd.f32 0.2548296, %v1279_v8  ;;  %v1274_v10 = vadd.f32 -0.28449672, %v1266_v19  ;;  %v1265_v38 = vmul.f32 %v1257_v53, %v4010_v20  ;;  %v1236_v49 = vmul.f32 1.0614054, %v4026_v21 }
 0x3ed   : > { %v1350_v16 = vmul.f32 %v1342_v42, %v3945_v27  ;;  %v1341_v46 = vsub.f32 1.0, %v1333_v39  ;;  %v3177_v14 = vpop.eup %3176  ;;  %v1336_v34 = vmul.f32 %v3175_v18, %v1296_v44  ;;  %v1143_v63 = vmul.f32 0.5, %v3900_v61 }
 0x3ee   : > { %v1295_v28 = vmul.f32 %v1287_v4, %v3986_v9  ;;  %v1282_v24 = vmul.f32 %v1274_v10, %v3998_v40  ;;  %v1211_v33 = vmul.f32 %v3177_v14, %v3989_v22  ;;  %v3179_v23 = vpop.eup %3178  ;;  %v1273_v58 = vadd.f32 -0.28449672, %v1265_v38 }
 0x3ef   : > { %v1358_v29 = vadd.f32 1.0, %v1350_v16  ;;  %v1349_v27 = vmul.f32 %v1341_v46, %v3954_v48  ;;  %v1344_v1 = vsub.f32 1.0, %v1336_v34  ;;  %v1244_v3 = vadd.f32 -1.4531521, %v1236_v49  ;;  %v3181_v26 = vpop.eup %3180 }
 0x3f0   : > { %v1335_v48 = vmul.f32 %v3179_v23, %v1295_v28  ;;  %v1219_v15 = vsub.f32 2.0, %v1211_v33  ;;  %v1315_v9 = vmul.f32 %v1307_v41, %v3979_v0  ;;  %v1281_v59 = vmul.f32 %v1273_v58, %v4010_v20 }
 0x3f1   : > { %v1366_v45 = vmul.f32 %v1358_v29, %v3939_v35  ;;  %v1357_v37 = vadd.f32 1.0, %v1349_v27  ;;  %v1290_v35 = vadd.f32 0.2548296, %v1282_v24  ;;  %v1352_v22 = vmul.f32 %v1344_v1, %v4004_v11 }
 0x3f2   : > { %v1252_v17 = vmul.f32 %v1244_v3, %v4026_v21  ;;  %v1343_v54 = vsub.f32 1.0, %v1335_v48  ;;  %v1227_v7 = vmul.f32 %v3177_v14, %v1219_v15  ;;  %v1329_v60 = vmul.f32 1.442695, %v1315_v9 }
 0x3f3   : > { %2721 = vst.msk [vmem:[%s4039_s29 + $0x21] sm:$0xff] %vm1021_vm12, %v1366_v45  ;;  %v1365_v62 = vmul.f32 %v1357_v37, %v3941_v52  ;;  %v1298_v51 = vmul.f32 %v1290_v35, %v3998_v40  ;;  %v1360_v0 = vadd.f32 1.0, %v1352_v22  ;;  %v1289_v52 = vadd.f32 0.2548296, %v1281_v59  ;;  %v3183_v40 = vpop.eup %3182 }
 0x3f4   : > { %v1260_v11 = vadd.f32 1.4214138, %v1252_v17  ;;  %v1351_v47 = vmul.f32 %v1343_v54, %v1167_v6  ;;  %v1235_v55 = vmul.f32 1.0614054, %v1227_v7  ;;  %v1170_v8 = vsel %vm1162_vm1, 1.0, %v3289_v25 }
 0x3f5   : > { %2720 = vst.msk [vmem:[%s4039_s29 + $0x11] sm:$0xff] %vm1021_vm12, %v1365_v62  ;;  %v1338_v42 = vmul.f32 %v3181_v26, %v1298_v51  ;;  %v1368_v30 = vmul.f32 %v1360_v0, %v3959_v32  ;;  %v1297_v12 = vmul.f32 %v1289_v52, %v4010_v20  ;;  %v3185_v20 = vpop.eup %3184  ;;  %3186 = vpow2.f32 %v1329_v60 }
 0x3f6   : > { %v1268_v39 = vmul.f32 %v1260_v11, %v4026_v21  ;;  %v1359_v56 = vadd.f32 1.0, %v1351_v47  ;;  %v1243_v16 = vadd.f32 -1.4531521, %v1235_v55  ;;  %v1146_v29 = vmul.f32 0.5, %v3909_v50 }
 0x3f7   : > { %v1346_v18 = vsub.f32 1.0, %v1338_v42  ;;  %2723 = vst.msk [vmem:[%s4039_s29 + $0x41] sm:$0xff] %vm1021_vm12, %v1368_v30  ;;  %v1337_v32 = vmul.f32 %v3183_v40, %v1297_v12  ;;  %v1145_v38 = vmul.f32 0.5, %v3916_v31  ;;  %v1172_v37 = vsel %vm1164_vm3, 1.0, %v3289_v25 }
 0x3f8   : > { %v1276_v19 = vadd.f32 -0.28449672, %v1268_v39  ;;  %v1367_v46 = vmul.f32 %v1359_v56, %v1143_v63  ;;  %v1251_v53 = vmul.f32 %v1243_v16, %v1227_v7  ;;  %v1171_v9 = vsel %vm1163_vm4, 1.0, %v3289_v25 }
 0x3f9   : > { %v1354_v44 = vmul.f32 %v1346_v18, %v1170_v8  ;;  %v1345_v61 = vsub.f32 1.0, %v1337_v32  ;;  %v1147_v22 = vmul.f32 0.5, %v3965_v43 }
 0x3fa   : > { %v1284_v14 = vmul.f32 %v1276_v19, %v4026_v21  ;;  %2722 = vst.msk [vmem:[%s4039_s29 + $0x31] sm:$0xff] %vm1021_vm12, %v1367_v46  ;;  %v1259_v5 = vadd.f32 1.4214138, %v1251_v53 }
 0x3fb   : > { %v1362_v4 = vadd.f32 1.0, %v1354_v44  ;;  %v1353_v10 = vmul.f32 %v1345_v61, %v1169_v36 }
 0x3fc   : > { %v1292_v41 = vadd.f32 0.2548296, %v1284_v14  ;;  %v1267_v34 = vmul.f32 %v1259_v5, %v1227_v7 }
 0x3fd   : > { %v1370_v27 = vmul.f32 %v1362_v4, %v1146_v29  ;;  %v1361_v49 = vadd.f32 1.0, %v1353_v10 }
 0x3fe   : > { %v1300_v45 = vmul.f32 %v1292_v41, %v4026_v21  ;;  %v1275_v28 = vadd.f32 -0.28449672, %v1267_v34  ;;  %v1148_v21 = vmul.f32 0.5, %v3930_v2 }
 0x3ff   : > { %2725 = vst.msk [vmem:[%s4039_s29 + $0x61] sm:$0xff] %vm1021_vm12, %v1370_v27  ;;  %v1369_v24 = vmul.f32 %v1361_v49, %v1145_v38 }
 0x400   : > { %v1340_v50 = vmul.f32 %v3185_v20, %v1300_v45  ;;  %v1283_v33 = vmul.f32 %v1275_v28, %v1227_v7 }
 0x401   : > { %2724 = vst.msk [vmem:[%s4039_s29 + $0x51] sm:$0xff] %vm1021_vm12, %v1369_v24 }
 0x402   : > { %v1348_v23 = vsub.f32 1.0, %v1340_v50  ;;  %v1291_v1 = vadd.f32 0.2548296, %v1283_v33  ;;  %v3187_v3 = vpop.eup %3186 }
 0x404   : > { %v1356_v31 = vmul.f32 %v1348_v23, %v1172_v37  ;;  %v1299_v58 = vmul.f32 %v1291_v1, %v1227_v7 }
 0x406   : > { %v1364_v48 = vadd.f32 1.0, %v1356_v31  ;;  %v1339_v35 = vmul.f32 %v3187_v3, %v1299_v58 }
 0x408   : > { %v1372_v13 = vmul.f32 %v1364_v48, %v1148_v21  ;;  %v1347_v15 = vsub.f32 1.0, %v1339_v35 }
 0x40a   : > { %2727 = vst.msk [vmem:[%s4039_s29 + $0x81] sm:$0xff] %vm1021_vm12, %v1372_v13  ;;  %v1355_v62 = vmul.f32 %v1347_v15, %v1171_v9 }
 0x40c   : > { %v1363_v59 = vadd.f32 1.0, %v1355_v62 }
 0x40e   : > { %v1371_v17 = vmul.f32 %v1363_v59, %v1147_v22 }
 0x410   : > { %2726 = vst.msk [vmem:[%s4039_s29 + $0x71] sm:$0xff] %vm1021_vm12, %v1371_v17 }
 0x411 PF: > { %1548 = sbr.rel (!%p3428_p6) target bundleno = 1055 (0x41f), region = 68  ;;  %vm1551_vm5 = vcmask (%p3428_p6), 64512   ;;  %vm1553_vm6 = vcmask (%p3428_p6), 58368   ;;  %v3290_v2 = vmov (%p3428_p6), 0.0  }
 0x412   : > { %s1549_s18 = smul.u32 (%p3428_p6), 160, %s5112_s30 }
 0x414   : > { %s1550_s24 = scalar_lea.vmem (%p3428_p6), [#allocation2], %s1549_s18 }
 0x415   : > { %1552 = vst.msk [vmem:[%s1550_s24] sm:$0xff] (%p3428_p6), %vm1551_vm5, %v3290_v2  ;;  %1555 = vst.msk [vmem:[%s1550_s24 + $0x10] sm:$0xff] (%p3428_p6), %vm1551_vm5, %v3290_v2 }
 0x416   : > { %1557 = vst.msk [vmem:[%s1550_s24 + $0x20] sm:$0xff] %vm1551_vm5, %v3290_v2  ;;  %1559 = vst.msk [vmem:[%s1550_s24 + $0x30] sm:$0xff] %vm1551_vm5, %v3290_v2 }
 0x417   : > { %1561 = vst.msk [vmem:[%s1550_s24 + $0x40] sm:$0xff] %vm1551_vm5, %v3290_v2  ;;  %1563 = vst.msk [vmem:[%s1550_s24 + $0x50] sm:$0xff] %vm1551_vm5, %v3290_v2 }
 0x418   : > { %1565 = vst.msk [vmem:[%s1550_s24 + $0x60] sm:$0xff] %vm1551_vm5, %v3290_v2  ;;  %1567 = vst.msk [vmem:[%s1550_s24 + $0x70] sm:$0xff] %vm1551_vm5, %v3290_v2 }
 0x419   : > { %1569 = vst.msk [vmem:[%s1550_s24 + $0x80] sm:$0xff] %vm1551_vm5, %v3290_v2  ;;  %1571 = vst.msk [vmem:[%s1550_s24 + $0x90] sm:$0xff] %vm1551_vm5, %v3290_v2 }
 0x41a   : > { %1554 = vst.msk [vmem:[%s1550_s24 + $0x8] sm:$0x3] %vm1553_vm6, %v3290_v2  ;;  %1556 = vst.msk [vmem:[%s1550_s24 + $0x18] sm:$0x3] %vm1553_vm6, %v3290_v2 }
 0x41b   : > { %1558 = vst.msk [vmem:[%s1550_s24 + $0x28] sm:$0x3] %vm1553_vm6, %v3290_v2  ;;  %1560 = vst.msk [vmem:[%s1550_s24 + $0x38] sm:$0x3] %vm1553_vm6, %v3290_v2 }
 0x41c   : > { %1562 = vst.msk [vmem:[%s1550_s24 + $0x48] sm:$0x3] %vm1553_vm6, %v3290_v2  ;;  %1564 = vst.msk [vmem:[%s1550_s24 + $0x58] sm:$0x3] %vm1553_vm6, %v3290_v2 }
 0x41d   : > { %1566 = vst.msk [vmem:[%s1550_s24 + $0x68] sm:$0x3] %vm1553_vm6, %v3290_v2  ;;  %1568 = vst.msk [vmem:[%s1550_s24 + $0x78] sm:$0x3] %vm1553_vm6, %v3290_v2 }
 0x41e   : > { %1570 = vst.msk [vmem:[%s1550_s24 + $0x88] sm:$0x3] %vm1553_vm6, %v3290_v2  ;;  %1572 = vst.msk [vmem:[%s1550_s24 + $0x98] sm:$0x3] %vm1553_vm6, %v3290_v2 }
 0x41f PF: > { %p2742_p13 = scmp.lt.s32.totalorder %s3270_s12, 2 }
 0x421   : > { %1576 = sbr.rel (%p2742_p13) target bundleno = 1195 (0x4ab), region = 72 }
 0x426   : > { %s4101_s25 = sadd.s32 4294967294, %s3270_s12  ;;  %s1894_s11 = ssub.s32 0, %s3417_s21  ;;  %v2883_v25 = vld [vmem:[%s4930_s5 + $0x12] ss:$0 sm:$0xff]  ;;  %v4117_v43 = vld [vmem:[%s4930_s5 + $0x15] ss:$0 sm:$0xff] }
 0x427   : > { %s1587_s26 = ssub.s32 0, %s4101_s25  ;;  %s4107_s14 = smin.u32 %s1894_s11, %s3417_s21  ;;  %v2885_v57 = vld [vmem:[%s4930_s5 + $0x13] ss:$0 sm:$0xff]  ;;  %v2887_v42 = vld [vmem:[%s4930_s5 + $0x14] ss:$0 sm:$0xff]  ;;  %vm2525_vm7 = vcmask 64512  }
 0x428   : > { %s2745_s23 = smin.u32 %s4101_s25, %s1587_s26  ;;  %s2200_s15 = smul.u32 160, %s5112_s30  ;;  %v2907_v44 = vld [vmem:[%s4930_s5 + $0x16] ss:$0 sm:$0xff]  ;;  %v2917_v2 = vld [vmem:[%s4930_s5 + $0x17] ss:$0 sm:$0xff] }
 0x429   : > { %3188 = sdivrem.u32 %s2745_s23, 3  ;;  %p1586_p0 = scmp.lt.s32.totalorder %s4101_s25, 0 }
 0x42a   : > { %3190 = sdivrem.u32 %s4107_s14, 3  ;;  %s4123_s24 = scalar_lea.vmem [#allocation2], %s2200_s15 }
 0x42b   : > { %v2202_v26 = vld [vmem:[%s4123_s24] sm:$0xff]  ;;  %v2203_v6 = vld [vmem:[%s4123_s24 + $0x10] sm:$0xff]  ;;  %p1893_p2 = scmp.lt.s32.totalorder %s3417_s21, 0  ;;  %s2498_s29 = sand.u32 1, %s4107_s14  }
 0x42c   : > { %v4128_v54 = vld [vmem:[%s4123_s24 + $0x20] sm:$0xff]  ;;  %v4131_v51 = vld [vmem:[%s4123_s24 + $0x30] sm:$0xff]  ;;  %v4139_v52 = vmul.f32 %v2883_v25, %v2202_v26  ;;  %v4141_v11 = vmul.f32 %v2883_v25, %v2203_v6  ;;  %v4150_v55 = vmul.f32 %v4117_v43, %v2203_v6  ;;  %s2499_s14 = ssub.s32 0, %s2498_s29 }
 0x42d   : > { %v4134_v7 = vld [vmem:[%s4123_s24 + $0x40] sm:$0xff]  ;;  %v4137_v0 = vld [vmem:[%s4123_s24 + $0x50] sm:$0xff]  ;;  %v4144_v47 = vmul.f32 %v2883_v25, %v4128_v54  ;;  %v4159_v12 = vmul.f32 %v2883_v25, %v4131_v51  ;;  %v4170_v56 = vmul.f32 %v4117_v43, %v4128_v54  ;;  %v4185_v46 = vmul.f32 %v4117_v43, %v4131_v51  ;;  %s5126_s14 = smov (!%p1893_p2, %s2499_s14), %s2498_s29 }
 0x42e   : > { %4971 = vst [vmem:[#allocation15_spill] sm:$0xff] %v4150_v55  ;;  %v4153_v60 = vld [vmem:[%s4123_s24 + $0x60] sm:$0xff]  ;;  %v4156_v30 = vld [vmem:[%s4123_s24 + $0x70] sm:$0xff]  ;;  %v4162_v39 = vmul.f32 %v2883_v25, %v4134_v7  ;;  %v4165_v40 = vmul.f32 %v2883_v25, %v4137_v0  ;;  %v4211_v5 = vmul.f32 %v4117_v43, %v4134_v7  ;;  %v4229_v45 = vmul.f32 %v4117_v43, %v4137_v0  ;;  %p2951_p4 = scmp.lt.s32.totalorder %s5126_s14, 0  ;;  %s2505_s21 = sadd.s32 2, %s5126_s14 }
 0x42f   : > { %4972 = vst [vmem:[#allocation16_spill] sm:$0xff] %v4153_v60  ;;  %4973 = vst [vmem:[#allocation17_spill] sm:$0xff] %v4156_v30  ;;  %v2234_v63 = vld [vmem:[%s4123_s24 + $0x1] sm:$0xff]  ;;  %v4173_v18 = vmul.f32 %v2883_v25, %v4153_v60  ;;  %v4176_v16 = vmul.f32 %v2883_v25, %v4156_v30  ;;  %v2235_v8 = vld [vmem:[%s4123_s24 + $0x11] sm:$0xff]  ;;  %v4251_v1 = vmul.f32 %v4117_v43, %v4153_v60 }
 0x430   : > { %4974 = vst [vmem:[#allocation18_spill] sm:$0xff] %v4170_v56  ;;  %v2236_v32 = vld [vmem:[%s4123_s24 + $0x21] sm:$0xff]  ;;  %v2237_v19 = vld [vmem:[%s4123_s24 + $0x31] sm:$0xff]  ;;  %v4181_v20 = vmul.f32 %v2885_v57, %v2234_v63  ;;  %4975 = vst [vmem:[#allocation19_spill] sm:$0xff] %v4185_v46  ;;  %v4203_v29 = vmul.f32 %v2885_v57, %v2235_v8  ;;  %v4273_v13 = vmul.f32 %v4117_v43, %v4156_v30  ;;  %s5128_s21 = smov (!%p2951_p4, %s2505_s21), %s5126_s14 }
 0x431   : > { %v4195_v53 = vld [vmem:[%s4123_s24 + $0x41] sm:$0xff]  ;;  %v4198_v61 = vld [vmem:[%s4123_s24 + $0x51] sm:$0xff]  ;;  %v4205_v4 = vmul.f32 %v2885_v57, %v2236_v32  ;;  %v4207_v36 = vmul.f32 %v2885_v57, %v2237_v19  ;;  %4979 = vst [vmem:[#allocation23_spill] sm:$0xff] %v4211_v5  ;;  %4984 = vst [vmem:[#allocation28_spill] sm:$0xff] %v4229_v45  ;;  %v4295_v17 = vmul.f32 %v2907_v44, %v2235_v8 }
 0x432   : > { %s3189_s23 = spop.drf %3188  ;;  %4976 = vst [vmem:[#allocation20_spill] sm:$0xff] %v4195_v53  ;;  %4977 = vst [vmem:[#allocation21_spill] sm:$0xff] %v4198_v61  ;;  %v4201_v14 = vld [vmem:[%s4123_s24 + $0x61] sm:$0xff]  ;;  %v4214_v10 = vld [vmem:[%s4123_s24 + $0x71] sm:$0xff]  ;;  %v4217_v41 = vmul.f32 %v2885_v57, %v4195_v53  ;;  %v4220_v27 = vmul.f32 %v2885_v57, %v4198_v61  ;;  %v4306_v26 = vmul.f32 %v2907_v44, %v2237_v19 }
 0x433   : > { %s1591_s11 = ssub.s32 0, %s3189_s23  ;;  %4978 = vst [vmem:[#allocation22_spill] sm:$0xff] %v4201_v14  ;;  %4980 = vst [vmem:[#allocation24_spill] sm:$0xff] %v4214_v10  ;;  %v4223_v34 = vmul.f32 %v2885_v57, %v4201_v14  ;;  %v2266_v38 = vld [vmem:[%s4123_s24 + $0x2] sm:$0xff]  ;;  %v2267_v49 = vld [vmem:[%s4123_s24 + $0x12] sm:$0xff]  ;;  %v4234_v28 = vmul.f32 %v2885_v57, %v4214_v10  ;;  %v4304_v57 = vmul.f32 %v2907_v44, %v2236_v32  ;;  %s4474_s18 = spop.drf %3190 }
 0x434   : > { %s5118_s11 = smov (!%p1586_p0, %s1591_s11), %s3189_s23  ;;  %4981 = vst [vmem:[#allocation25_spill] sm:$0xff] %v4217_v41  ;;  %4982 = vst [vmem:[#allocation26_spill] sm:$0xff] %v4220_v27  ;;  %v4237_v24 = vld [vmem:[%s4123_s24 + $0x22] sm:$0xff]  ;;  %v4240_v50 = vld [vmem:[%s4123_s24 + $0x32] sm:$0xff]  ;;  %v4245_v23 = vmul.f32 %v2887_v42, %v2266_v38  ;;  %v4247_v37 = vmul.f32 %v2887_v42, %v2267_v49  ;;  %v4309_v6 = vmul.f32 %v2907_v44, %v4195_v53  ;;  %s1898_s30 = ssub.s32 0, %s4474_s18 }
 0x435   : > { %4983 = vst [vmem:[#allocation27_spill] sm:$0xff] %v4223_v34  ;;  %p2747_p1 = scmp.lt.s32.totalorder %s5118_s11, 0  ;;  %s1597_s25 = sadd.s32 3, %s5118_s11  ;;  %4985 = vst [vmem:[#allocation29_spill] sm:$0xff] %v4234_v28  ;;  %v4243_v33 = vld [vmem:[%s4123_s24 + $0x42] sm:$0xff]  ;;  %v4254_v31 = vld [vmem:[%s4123_s24 + $0x52] sm:$0xff]  ;;  %v4263_v21 = vmul.f32 %v2887_v42, %v4237_v24  ;;  %v4266_v48 = vmul.f32 %v2887_v42, %v4240_v50  ;;  %v4316_v63 = vmul.f32 %v2907_v44, %v4198_v61 }
 0x436   : > { %4986 = vst [vmem:[#allocation30_spill] sm:$0xff] %v4237_v24  ;;  %4987 = vst [vmem:[#allocation31_spill] sm:$0xff] %v4240_v50  ;;  %v4257_v58 = vld [vmem:[%s4123_s24 + $0x62] sm:$0xff]  ;;  %v4260_v3 = vld [vmem:[%s4123_s24 + $0x72] sm:$0xff]  ;;  %v4269_v35 = vmul.f32 %v2887_v42, %v4243_v33  ;;  %v4281_v15 = vmul.f32 %v2887_v42, %v4254_v31  ;;  %v4319_v8 = vmul.f32 %v2907_v44, %v4201_v14  ;;  %s5122_s30 = smov (!%p1893_p2, %s1898_s30), %s4474_s18 }
 0x437   : > { %4988 = vst [vmem:[#allocation32_spill] sm:$0xff] %v4243_v33  ;;  %4989 = vst [vmem:[#allocation33_spill] sm:$0xff] %v4245_v23  ;;  %s5120_s25 = smov (!%p2747_p1, %s1597_s25), %s5118_s11  ;;  %v4284_v9 = vmul.f32 %v2887_v42, %v4257_v58  ;;  %v4287_v62 = vmul.f32 %v2887_v42, %v4260_v3  ;;  %v4290_v22 = vld [vmem:[%s4123_s24 + $0x80] sm:$0xff]  ;;  %v4322_v38 = vmul.f32 %v2907_v44, %v4214_v10  ;;  %v4330_v32 = vld [vmem:[%s4930_s5 + $0x18] ss:$0 sm:$0xff]  ;;  %p2815_p3 = scmp.lt.s32.totalorder %s5122_s30, 0 }
 0x438   : > { %4990 = vst [vmem:[#allocation34_spill] sm:$0xff] %v4247_v37  ;;  %4991 = vst [vmem:[#allocation35_spill] sm:$0xff] %v4251_v1  ;;  %v4293_v59 = vld [vmem:[%s4123_s24 + $0x81] sm:$0xff]  ;;  %v4302_v25 = vmul.f32 %v4117_v43, %v4290_v22  ;;  %s1599_s28 = smul.u32 160, %s5120_s25  ;;  %v2748_v19 = vld [vmem:[%s4930_s5] ss:$0 sm:$0xff]  ;;  %v4340_v61 = vmul.f32 %v2917_v2, %v2267_v49  ;;  %v4343_v10 = vmul.f32 %v2917_v2, %v4237_v24 }
 0x439   : > { %4992 = vst [vmem:[#allocation36_spill] sm:$0xff] %v4254_v31  ;;  %4993 = vst [vmem:[#allocation37_spill] sm:$0xff] %v4257_v58  ;;  %v4312_v42 = vld [vmem:[%s4123_s24 + $0x82] sm:$0xff]  ;;  %v4325_v43 = vmul.f32 %v2907_v44, %v4293_v59  ;;  %v4346_v44 = vmul.f32 %v2917_v2, %v4240_v50  ;;  %v2743_v53 = vld [vmem:[%s4931_s6] ss:$0 sm:$0xff]  ;;  %v4358_v30 = vmul.f32 %v2917_v2, %v4257_v58  ;;  %s1904_s19 = sadd.s32 3, %s5122_s30 }
 0x43a   : > { %4994 = vst [vmem:[#allocation38_spill] sm:$0xff] %v4260_v3  ;;  %4995 = vst [vmem:[#allocation39_spill] sm:$0xff] %v4263_v21  ;;  %v4338_v14 = vld [vmem:[%s4930_s5 + $0x3] ss:$0 sm:$0xff]  ;;  %v4361_v49 = vmul.f32 %v2917_v2, %v4260_v3  ;;  %v4364_v24 = vmul.f32 %v2917_v2, %v4312_v42  ;;  %s4366_s25 = scalar_lea.vmem [#allocation2], %s1599_s28  ;;  %v4386_v50 = vmul.f32 %v4330_v32, %v4134_v7  ;;  %s5124_s19 = smov (!%p2815_p3, %s1904_s19), %s5122_s30 }
 0x43b   : > { %4996 = vst [vmem:[#allocation40_spill] sm:$0xff] %v4266_v48  ;;  %4997 = vst [vmem:[#allocation41_spill] sm:$0xff] %v4269_v35  ;;  %v4371_v58 = vld [vmem:[%s4366_s25 + $0x20] sm:$0xff]  ;;  %v4390_v60 = vmul.f32 %v4330_v32, %v4137_v0  ;;  %v4409_v0 = vld [vmem:[%s4366_s25 + $0x70] sm:$0xff]  ;;  %s1906_s18 = smul.u32 160, %s5124_s19  ;;  %s2952_s30 = sshll.u32 %s5128_s21, 6 }
 0x43c   : > { %4998 = vst [vmem:[#allocation42_spill] sm:$0xff] %v4273_v13  ;;  %4999 = vst [vmem:[#allocation43_spill] sm:$0xff] %v4281_v15  ;;  %v2750_v3 = vld [vmem:[%s4930_s5 + $0x1] ss:$0 sm:$0xff]  ;;  %v4460_v55 = vld [vmem:[%s4366_s25 + $0x32] sm:$0xff]  ;;  %s2508_s11 = scalar_lea.vmem [#allocation3], %s2952_s30 }
 0x43d   : > { %5000 = vst [vmem:[#allocation44_spill] sm:$0xff] %v4284_v9  ;;  %5001 = vst [vmem:[#allocation45_spill] sm:$0xff] %v4287_v62  ;;  %v4463_v62 = vld [vmem:[%s4366_s25 + $0x42] sm:$0xff]  ;;  %v4466_v9 = vld [vmem:[%s4366_s25 + $0x52] sm:$0xff]  ;;  %s4575_s23 = scalar_lea.vmem [#allocation2], %s1906_s18 }
 0x43e   : > { %5002 = vst [vmem:[#allocation46_spill] sm:$0xff] %v4290_v22  ;;  %5003 = vst [vmem:[#allocation47_spill] sm:$0xff] %v4293_v59  ;;  %v4349_v59 = vmul.f32 %v2917_v2, %v4243_v33  ;;  %v4355_v22 = vmul.f32 %v2917_v2, %v4254_v31  ;;  %v1601_v31 = vld [vmem:[%s4366_s25] sm:$0xff]  ;;  %v1602_v33 = vld [vmem:[%s4366_s25 + $0x10] sm:$0xff]  ;;  %v4378_v2 = vmul.f32 %v4330_v32, %v4128_v54 }
 0x43f   : > { %5004 = vst [vmem:[#allocation48_spill] sm:$0xff] %v4295_v17  ;;  %5005 = vst [vmem:[#allocation49_spill] sm:$0xff] %v4302_v25  ;;  %v1616_v54 = vmul.f32 %v2748_v19, %v1601_v31  ;;  %v4403_v7 = vmul.f32 %v4338_v14, %v1602_v33  ;;  %v4434_v17 = vld [vmem:[%s4366_s25 + $0x51] sm:$0xff]  ;;  %v4469_v37 = vld [vmem:[%s4366_s25 + $0x62] sm:$0xff] }
 0x440   : > { %5006 = vst [vmem:[#allocation50_spill] sm:$0xff] %v4304_v57  ;;  %5007 = vst [vmem:[#allocation51_spill] sm:$0xff] %v4306_v26  ;;  %v4431_v57 = vld [vmem:[%s4366_s25 + $0x41] sm:$0xff]  ;;  %v4440_v25 = vld [vmem:[%s4366_s25 + $0x71] sm:$0xff] }
 0x441   : > { %5008 = vst [vmem:[#allocation52_spill] sm:$0xff] %v4309_v6  ;;  %5009 = vst [vmem:[#allocation53_spill] sm:$0xff] %v4312_v42  ;;  %v4382_v42 = vmul.f32 %v4330_v32, %v4131_v51  ;;  %v1618_v51 = vmul.f32 %v2748_v19, %v4371_v58  ;;  %v1652_v1 = vmul.f32 %v2750_v3, %v4431_v57  ;;  %v4472_v23 = vld [vmem:[%s4366_s25 + $0x72] sm:$0xff] }
 0x442   : > { %5010 = vst [vmem:[#allocation54_spill] sm:$0xff] %v4316_v63  ;;  %5011 = vst [vmem:[#allocation55_spill] sm:$0xff] %v4319_v8  ;;  %v1655_v5 = vmul.f32 %v2750_v3, %v4440_v25 }
 0x443   : > { %5012 = vst [vmem:[#allocation56_spill] sm:$0xff] %v4322_v38  ;;  %5013 = vst [vmem:[#allocation57_spill] sm:$0xff] %v4325_v43  ;;  %v4425_v43 = vld [vmem:[%s4366_s25 + $0x21] sm:$0xff]  ;;  %v4428_v38 = vld [vmem:[%s4366_s25 + $0x31] sm:$0xff]  ;;  %v1626_v8 = vadd.f32 %v2743_v53, %v1618_v51 }
 0x444   : > { %5014 = vst [vmem:[#allocation58_spill] sm:$0xff] %v4330_v32  ;;  %5015 = vst [vmem:[#allocation59_spill] sm:$0xff] %v4340_v61  ;;  %v1632_v32 = vld [vmem:[%s4366_s25 + $0x1] sm:$0xff]  ;;  %v4422_v61 = vld [vmem:[%s4366_s25 + $0x11] sm:$0xff]  ;;  %v1650_v51 = vmul.f32 %v2750_v3, %v4425_v43 }
 0x445   : > { %5016 = vst [vmem:[#allocation60_spill] sm:$0xff] %v4343_v10  ;;  %5017 = vst [vmem:[#allocation61_spill] sm:$0xff] %v4346_v44  ;;  %v1624_v44 = vadd.f32 %v2743_v53, %v1616_v54  ;;  %v1648_v13 = vmul.f32 %v2750_v3, %v1632_v32  ;;  %v4455_v32 = vld [vmem:[%s4366_s25 + $0x22] sm:$0xff] }
 0x446   : > { %5018 = vst [vmem:[#allocation62_spill] sm:$0xff] %v4349_v59  ;;  %5019 = vst [vmem:[#allocation63_spill] sm:$0xff] %v4355_v22  ;;  %v4417_v22 = vmul.f32 %v4338_v14, %v4371_v58  ;;  %v1623_v59 = vmul.f32 %v2748_v19, %v4409_v0  ;;  %v1658_v15 = vadd.f32 %v1650_v51, %v1626_v8 }
 0x447   : > { %5020 = vst [vmem:[#allocation64_spill] sm:$0xff] %v4358_v30  ;;  %5021 = vst [vmem:[#allocation65_spill] sm:$0xff] %v4361_v49  ;;  %v4396_v49 = vld [vmem:[%s4366_s25 + $0x40] sm:$0xff]  ;;  %v4399_v30 = vld [vmem:[%s4366_s25 + $0x50] sm:$0xff]  ;;  %v1656_v46 = vadd.f32 %v1648_v13, %v1624_v44 }
 0x448   : > { %5022 = vst [vmem:[#allocation66_spill] sm:$0xff] %v4364_v24  ;;  %5023 = vst [vmem:[#allocation67_spill] sm:$0xff] %v4378_v2  ;;  %v4393_v24 = vld [vmem:[%s4366_s25 + $0x30] sm:$0xff]  ;;  %v1617_v2 = vmul.f32 %v2748_v19, %v1602_v33  ;;  %v1621_v31 = vmul.f32 %v2748_v19, %v4399_v30  ;;  %v1631_v54 = vadd.f32 %v2743_v53, %v1623_v59  ;;  %v1664_v59 = vld [vmem:[%s4366_s25 + $0x2] sm:$0xff] }
 0x449   : > { %5024 = vst [vmem:[#allocation68_spill] sm:$0xff] %v4382_v42  ;;  %5025 = vst [vmem:[#allocation69_spill] sm:$0xff] %v4386_v50  ;;  %v4406_v50 = vld [vmem:[%s4366_s25 + $0x60] sm:$0xff]  ;;  %v1620_v42 = vmul.f32 %v2748_v19, %v4396_v49  ;;  %v1716_v34 = vmul.f32 %v4338_v14, %v4393_v24 }
 0x44a   : > { %5026 = vst [vmem:[#allocation70_spill] sm:$0xff] %v4390_v60  ;;  %v1619_v60 = vmul.f32 %v2748_v19, %v4393_v24  ;;  %v1622_v33 = vmul.f32 %v2748_v19, %v4406_v50  ;;  %v1625_v10 = vadd.f32 %v2743_v53, %v1617_v2  ;;  %v1629_v26 = vadd.f32 %v2743_v53, %v1621_v31  ;;  %v4437_v19 = vld [vmem:[%s4366_s25 + $0x61] sm:$0xff] }
 0x44b   : > { %v1628_v6 = vadd.f32 %v2743_v53, %v1620_v42  ;;  %v2752_v42 = vld [vmem:[%s4930_s5 + $0x2] ss:$0 sm:$0xff]  ;;  %v1651_v31 = vmul.f32 %v2750_v3, %v4428_v38  ;;  %v1654_v45 = vmul.f32 %v2750_v3, %v4437_v19 }
 0x44c   : > { %v1627_v63 = vadd.f32 %v2743_v53, %v1619_v60  ;;  %v1630_v2 = vadd.f32 %v2743_v53, %v1622_v33  ;;  %v1649_v60 = vmul.f32 %v2750_v3, %v4422_v61  ;;  %v1653_v53 = vmul.f32 %v2750_v3, %v4434_v17  ;;  %v4452_v33 = vld [vmem:[%s4366_s25 + $0x12] sm:$0xff] }
 0x44d   : > { %v1660_v48 = vadd.f32 %v1652_v1, %v1628_v6  ;;  %v1663_v3 = vadd.f32 %v1655_v5, %v1631_v54  ;;  %v1680_v13 = vmul.f32 %v2752_v42, %v1664_v59  ;;  %v1681_v44 = vmul.f32 %v2752_v42, %v4452_v33  ;;  %v4485_v5 = vld [vmem:[%s4366_s25 + $0x80] sm:$0xff] }
 0x44e   : > { %v1657_v56 = vadd.f32 %v1649_v60, %v1625_v10  ;;  %v1659_v35 = vadd.f32 %v1651_v31, %v1627_v63  ;;  %v1661_v21 = vadd.f32 %v1653_v53, %v1629_v26  ;;  %v1662_v10 = vadd.f32 %v1654_v45, %v1630_v2 }
 0x44f   : > { %v1682_v60 = vmul.f32 %v2752_v42, %v4455_v32  ;;  %v1683_v8 = vmul.f32 %v2752_v42, %v4460_v55  ;;  %v1684_v1 = vmul.f32 %v2752_v42, %v4463_v62  ;;  %v1685_v26 = vmul.f32 %v2752_v42, %v4466_v9 }
 0x450   : > { %v1686_v6 = vmul.f32 %v2752_v42, %v4469_v37  ;;  %v1687_v63 = vmul.f32 %v2752_v42, %v4472_v23  ;;  %v1688_v51 = vadd.f32 %v1680_v13, %v1656_v46  ;;  %v1689_v31 = vadd.f32 %v1681_v44, %v1657_v56  ;;  %v4511_v44 = vld [vmem:[%s4366_s25 + $0x81] sm:$0xff] }
 0x451   : > { %v1690_v45 = vadd.f32 %v1682_v60, %v1658_v15  ;;  %v1691_v2 = vadd.f32 %v1683_v8, %v1659_v35  ;;  %v1692_v54 = vadd.f32 %v1684_v1, %v1660_v48  ;;  %v1693_v53 = vadd.f32 %v1685_v26, %v1661_v21  ;;  %v2772_v48 = vld [vmem:[%s4930_s5 + $0x4] ss:$0 sm:$0xff] }
 0x452   : > { %v1694_v59 = vadd.f32 %v1686_v6, %v1662_v10  ;;  %v1695_v28 = vadd.f32 %v1687_v63, %v1663_v3  ;;  %v1717_v42 = vmul.f32 %v4338_v14, %v4396_v49  ;;  %v1718_v56 = vmul.f32 %v4338_v14, %v4399_v30 }
 0x453   : > { %v1719_v46 = vmul.f32 %v4338_v14, %v4406_v50  ;;  %v1720_v35 = vmul.f32 %v4338_v14, %v4409_v0  ;;  %v1721_v21 = vmul.f32 %v4338_v14, %v4485_v5  ;;  %v1722_v15 = vadd.f32 %v4403_v7, %v1688_v51 }
 0x454   : > { %v1723_v10 = vadd.f32 %v4417_v22, %v1689_v31  ;;  %v1724_v3 = vadd.f32 %v1716_v34, %v1690_v45  ;;  %v1725_v13 = vadd.f32 %v1717_v42, %v1691_v2  ;;  %v1726_v60 = vadd.f32 %v1718_v56, %v1692_v54 }
 0x455   : > { %v1727_v8 = vadd.f32 %v1719_v46, %v1693_v53  ;;  %v1728_v1 = vadd.f32 %v1720_v35, %v1694_v59  ;;  %v1729_v14 = vadd.f32 %v1721_v21, %v1695_v28  ;;  %v1746_v26 = vmul.f32 %v2772_v48, %v4422_v61  ;;  %v2782_v28 = vld [vmem:[%s4930_s5 + $0x5] ss:$0 sm:$0xff] }
 0x456   : > { %v1747_v6 = vmul.f32 %v2772_v48, %v4425_v43  ;;  %v1748_v63 = vmul.f32 %v2772_v48, %v4428_v38  ;;  %v1749_v7 = vmul.f32 %v2772_v48, %v4431_v57  ;;  %v1750_v34 = vmul.f32 %v2772_v48, %v4434_v17  ;;  %v4526_v53 = vld [vmem:[%s4366_s25 + $0x82] sm:$0xff] }
 0x457   : > { %v1751_v22 = vmul.f32 %v2772_v48, %v4437_v19  ;;  %v1752_v51 = vmul.f32 %v2772_v48, %v4440_v25  ;;  %v1753_v31 = vmul.f32 %v2772_v48, %v4511_v44  ;;  %v1754_v61 = vadd.f32 %v1746_v26, %v1722_v15 }
 0x458   : > { %v1755_v45 = vadd.f32 %v1747_v6, %v1723_v10  ;;  %v1756_v2 = vadd.f32 %v1748_v63, %v1724_v3  ;;  %v1757_v54 = vadd.f32 %v1749_v7, %v1725_v13  ;;  %v1758_v59 = vadd.f32 %v1750_v34, %v1726_v60  ;;  %v2790_v6 = vld [vmem:[%s4366_s25 + $0x90] sm:$0xff] }
 0x459   : > { %v1759_v42 = vadd.f32 %v1751_v22, %v1727_v8  ;;  %v1760_v56 = vadd.f32 %v1752_v51, %v1728_v1  ;;  %v1761_v46 = vadd.f32 %v1753_v31, %v1729_v14  ;;  %v1778_v35 = vmul.f32 %v2782_v28, %v4452_v33  ;;  %v2792_v8 = vld [vmem:[%s4930_s5 + $0x6] ss:$0 sm:$0xff] }
 0x45a   : > { %v1779_v21 = vmul.f32 %v2782_v28, %v4455_v32  ;;  %v1780_v48 = vmul.f32 %v2782_v28, %v4460_v55  ;;  %v1781_v15 = vmul.f32 %v2782_v28, %v4463_v62  ;;  %v1782_v10 = vmul.f32 %v2782_v28, %v4466_v9 }
 0x45b   : > { %v1783_v3 = vmul.f32 %v2782_v28, %v4469_v37  ;;  %v1784_v13 = vmul.f32 %v2782_v28, %v4472_v23  ;;  %v1785_v60 = vmul.f32 %v2782_v28, %v4526_v53  ;;  %v1786_v33 = vadd.f32 %v1778_v35, %v1754_v61 }
 0x45c   : > { %v1787_v1 = vadd.f32 %v1779_v21, %v1755_v45  ;;  %v1788_v14 = vadd.f32 %v1780_v48, %v1756_v2  ;;  %v1789_v26 = vadd.f32 %v1781_v15, %v1757_v54  ;;  %v1790_v63 = vadd.f32 %v1782_v10, %v1758_v59  ;;  %v2802_v59 = vld [vmem:[%s4930_s5 + $0x7] ss:$0 sm:$0xff] }
 0x45d   : > { %v1791_v7 = vadd.f32 %v1783_v3, %v1759_v42  ;;  %v1792_v34 = vadd.f32 %v1784_v13, %v1760_v56  ;;  %v1793_v22 = vadd.f32 %v1785_v60, %v1761_v46  ;;  %v1812_v51 = vmul.f32 %v2792_v8, %v4371_v58  ;;  %v2800_v46 = vld [vmem:[%s4366_s25 + $0x91] sm:$0xff]  ;;  %v2812_v13 = vld [vmem:[%s4930_s5 + $0x8] ss:$0 sm:$0xff] }
 0x45e   : > { %v1813_v31 = vmul.f32 %v2792_v8, %v4393_v24  ;;  %v1814_v28 = vmul.f32 %v2792_v8, %v4396_v49  ;;  %v1815_v27 = vmul.f32 %v2792_v8, %v4399_v30  ;;  %v1816_v61 = vmul.f32 %v2792_v8, %v4406_v50 }
 0x45f   : > { %v1817_v45 = vmul.f32 %v2792_v8, %v4409_v0  ;;  %v1818_v2 = vmul.f32 %v2792_v8, %v4485_v5  ;;  %v1819_v54 = vmul.f32 %v2792_v8, %v2790_v6  ;;  %v1820_v42 = vadd.f32 %v1812_v51, %v1786_v33  ;;  %v2810_v33 = vld [vmem:[%s4366_s25 + $0x92] sm:$0xff]  ;;  %v1908_v6 = vld [vmem:[%s4575_s23] sm:$0xff] }
 0x460   : > { %v1821_v58 = vadd.f32 %v1813_v31, %v1787_v1  ;;  %v1822_v56 = vadd.f32 %v1814_v28, %v1788_v14  ;;  %v1823_v24 = vadd.f32 %v1815_v27, %v1789_v26  ;;  %v1824_v49 = vadd.f32 %v1816_v61, %v1790_v63  ;;  %v4579_v63 = vld [vmem:[%s4575_s23 + $0x10] sm:$0xff]  ;;  %v4594_v51 = vld [vmem:[%s4575_s23 + $0x40] sm:$0xff] }
 0x461   : > { %v1825_v35 = vadd.f32 %v1817_v45, %v1791_v7  ;;  %v1826_v30 = vadd.f32 %v1818_v2, %v1792_v34  ;;  %v1827_v50 = vadd.f32 %v1819_v54, %v1793_v22  ;;  %v1844_v0 = vmul.f32 %v2802_v59, %v4425_v43  ;;  %v4588_v34 = vld [vmem:[%s4575_s23 + $0x20] sm:$0xff]  ;;  %v4591_v22 = vld [vmem:[%s4575_s23 + $0x30] sm:$0xff] }
 0x462   : > { %v1845_v5 = vmul.f32 %v2802_v59, %v4428_v38  ;;  %v1846_v21 = vmul.f32 %v2802_v59, %v4431_v57  ;;  %v1847_v48 = vmul.f32 %v2802_v59, %v4434_v17  ;;  %v1848_v15 = vmul.f32 %v2802_v59, %v4437_v19  ;;  %v4597_v2 = vld [vmem:[%s4575_s23 + $0x50] sm:$0xff] }
 0x463   : > { %v1849_v10 = vmul.f32 %v2802_v59, %v4440_v25  ;;  %v1850_v27 = vmul.f32 %v2802_v59, %v4511_v44  ;;  %v1851_v3 = vmul.f32 %v2802_v59, %v2800_v46  ;;  %v1852_v60 = vadd.f32 %v1844_v0, %v1820_v42 }
 0x464   : > { %v1853_v43 = vadd.f32 %v1845_v5, %v1821_v58  ;;  %v1854_v8 = vadd.f32 %v1846_v21, %v1822_v56  ;;  %v1855_v38 = vadd.f32 %v1847_v48, %v1823_v24  ;;  %v1856_v57 = vadd.f32 %v1848_v15, %v1824_v49  ;;  %v1940_v49 = vld [vmem:[%s4575_s23 + $0x1] sm:$0xff]  ;;  %v4623_v15 = vld [vmem:[%s4575_s23 + $0x31] sm:$0xff] }
 0x465   : > { %v1857_v1 = vadd.f32 %v1849_v10, %v1825_v35  ;;  %v1858_v17 = vadd.f32 %v1850_v27, %v1826_v30  ;;  %v1859_v14 = vadd.f32 %v1851_v3, %v1827_v50  ;;  %v1876_v19 = vmul.f32 %v2812_v13, %v4455_v32  ;;  %v4610_v35 = vld [vmem:[%s4575_s23 + $0x11] sm:$0xff]  ;;  %v2819_v30 = vld [vmem:[%s4930_s5 + $0xa] ss:$0 sm:$0xff]  ;;  %v4620_v48 = vld [vmem:[%s4575_s23 + $0x21] sm:$0xff] }
 0x466   : > { %v1877_v25 = vmul.f32 %v2812_v13, %v4460_v55  ;;  %v1878_v44 = vmul.f32 %v2812_v13, %v4463_v62  ;;  %v1879_v26 = vmul.f32 %v2812_v13, %v4466_v9  ;;  %v2817_v55 = vld [vmem:[%s4930_s5 + $0x9] ss:$0 sm:$0xff]  ;;  %v1880_v9 = vmul.f32 %v2812_v13, %v4469_v37  ;;  %v4600_v37 = vld [vmem:[%s4575_s23 + $0x60] sm:$0xff] }
 0x467   : > { %v1881_v62 = vmul.f32 %v2812_v13, %v4472_v23  ;;  %v1882_v32 = vmul.f32 %v2812_v13, %v4526_v53  ;;  %v1883_v7 = vmul.f32 %v2812_v13, %v2810_v33  ;;  %v1884_v31 = vadd.f32 %v1876_v19, %v1852_v60  ;;  %v4603_v23 = vld [vmem:[%s4575_s23 + $0x70] sm:$0xff]  ;;  %v4626_v10 = vld [vmem:[%s4575_s23 + $0x41] sm:$0xff] }
 0x468   : > { %v1885_v28 = vadd.f32 %v1877_v25, %v1853_v43  ;;  %v1886_v61 = vadd.f32 %v1878_v44, %v1854_v8  ;;  %v1887_v45 = vadd.f32 %v1879_v26, %v1855_v38  ;;  %v1888_v53 = vadd.f32 %v1880_v9, %v1856_v57  ;;  %v4629_v43 = vld [vmem:[%s4575_s23 + $0x51] sm:$0xff]  ;;  %v4632_v8 = vld [vmem:[%s4575_s23 + $0x61] sm:$0xff] }
 0x469   : > { %v1889_v54 = vadd.f32 %v1881_v62, %v1857_v1  ;;  %v1890_v59 = vadd.f32 %v1882_v32, %v1858_v17  ;;  %v1891_v42 = vadd.f32 %v1883_v7, %v1859_v14  ;;  %v1924_v58 = vmul.f32 %v2817_v55, %v1908_v6  ;;  %v4635_v38 = vld [vmem:[%s4575_s23 + $0x71] sm:$0xff]  ;;  %v1972_v26 = vld [vmem:[%s4575_s23 + $0x2] sm:$0xff] }
 0x46a   : > { %v1925_v56 = vmul.f32 %v2817_v55, %v4579_v63  ;;  %v1926_v24 = vmul.f32 %v2817_v55, %v4588_v34  ;;  %v1927_v46 = vmul.f32 %v2817_v55, %v4591_v22  ;;  %v1928_v50 = vmul.f32 %v2817_v55, %v4594_v51  ;;  %v4642_v6 = vld [vmem:[%s4575_s23 + $0x12] sm:$0xff] }
 0x46b   : > { %v1929_v0 = vmul.f32 %v2817_v55, %v4597_v2  ;;  %v1930_v5 = vmul.f32 %v2817_v55, %v4600_v37  ;;  %v1931_v21 = vmul.f32 %v2817_v55, %v4603_v23  ;;  %v1932_v27 = vadd.f32 %v1924_v58, %v1884_v31  ;;  %v2821_v55 = vld [vmem:[%s4930_s5 + $0xb] ss:$0 sm:$0xff]  ;;  %v4652_v31 = vld [vmem:[%s4575_s23 + $0x22] sm:$0xff] }
 0x46c   : > { %v1933_v3 = vadd.f32 %v1925_v56, %v1885_v28  ;;  %v1934_v13 = vadd.f32 %v1926_v24, %v1886_v61  ;;  %v1935_v60 = vadd.f32 %v1927_v46, %v1887_v45  ;;  %v1936_v33 = vadd.f32 %v1928_v50, %v1888_v53  ;;  %v4655_v28 = vld [vmem:[%s4575_s23 + $0x32] sm:$0xff]  ;;  %v4658_v61 = vld [vmem:[%s4575_s23 + $0x42] sm:$0xff] }
 0x46d   : > { %v1937_v57 = vadd.f32 %v1929_v0, %v1889_v54  ;;  %v1938_v1 = vadd.f32 %v1930_v5, %v1890_v59  ;;  %v1939_v17 = vadd.f32 %v1931_v21, %v1891_v42  ;;  %v1956_v14 = vmul.f32 %v2819_v30, %v1940_v49  ;;  %v4661_v42 = vld [vmem:[%s4575_s23 + $0x52] sm:$0xff]  ;;  %v4664_v58 = vld [vmem:[%s4575_s23 + $0x62] sm:$0xff] }
 0x46e   : > { %v1957_v19 = vmul.f32 %v2819_v30, %v4610_v35  ;;  %v1958_v25 = vmul.f32 %v2819_v30, %v4620_v48  ;;  %v1959_v44 = vmul.f32 %v2819_v30, %v4623_v15  ;;  %v1960_v9 = vmul.f32 %v2819_v30, %v4626_v10  ;;  %v4667_v56 = vld [vmem:[%s4575_s23 + $0x72] sm:$0xff] }
 0x46f   : > { %v1961_v62 = vmul.f32 %v2819_v30, %v4629_v43  ;;  %v1962_v32 = vmul.f32 %v2819_v30, %v4632_v8  ;;  %v1963_v7 = vmul.f32 %v2819_v30, %v4635_v38  ;;  %v1964_v45 = vadd.f32 %v1956_v14, %v1932_v27 }
 0x470   : > { %v1965_v53 = vadd.f32 %v1957_v19, %v1933_v3  ;;  %v1966_v54 = vadd.f32 %v1958_v25, %v1934_v13  ;;  %v1967_v59 = vadd.f32 %v1959_v44, %v1935_v60  ;;  %v1968_v24 = vadd.f32 %v1960_v9, %v1936_v33  ;;  %v2831_v33 = vld [vmem:[%s4930_s5 + $0xc] ss:$0 sm:$0xff]  ;;  %v4680_v19 = vld [vmem:[%s4575_s23 + $0x80] sm:$0xff] }
 0x471   : > { %v1969_v46 = vadd.f32 %v1961_v62, %v1937_v57  ;;  %v1970_v49 = vadd.f32 %v1962_v32, %v1938_v1  ;;  %v1971_v30 = vadd.f32 %v1963_v7, %v1939_v17  ;;  %v1988_v50 = vmul.f32 %v2821_v55, %v1972_v26 }
 0x472   : > { %v1989_v0 = vmul.f32 %v2821_v55, %v4642_v6  ;;  %v1990_v5 = vmul.f32 %v2821_v55, %v4652_v31  ;;  %v1991_v21 = vmul.f32 %v2821_v55, %v4655_v28  ;;  %v1992_v27 = vmul.f32 %v2821_v55, %v4658_v61 }
 0x473   : > { %v1993_v3 = vmul.f32 %v2821_v55, %v4661_v42  ;;  %v1994_v13 = vmul.f32 %v2821_v55, %v4664_v58  ;;  %v1995_v60 = vmul.f32 %v2821_v55, %v4667_v56  ;;  %v1996_v57 = vadd.f32 %v1988_v50, %v1964_v45  ;;  %v4694_v50 = vld [vmem:[%s4575_s23 + $0x81] sm:$0xff] }
 0x474   : > { %v1997_v1 = vadd.f32 %v1989_v0, %v1965_v53  ;;  %v1998_v17 = vadd.f32 %v1990_v5, %v1966_v54  ;;  %v1999_v14 = vadd.f32 %v1991_v21, %v1967_v59  ;;  %v2000_v25 = vadd.f32 %v1992_v27, %v1968_v24  ;;  %v2841_v24 = vld [vmem:[%s4930_s5 + $0xd] ss:$0 sm:$0xff] }
 0x475   : > { %v2001_v44 = vadd.f32 %v1993_v3, %v1969_v46  ;;  %v2002_v26 = vadd.f32 %v1994_v13, %v1970_v49  ;;  %v2003_v9 = vadd.f32 %v1995_v60, %v1971_v30  ;;  %v2022_v62 = vmul.f32 %v2831_v33, %v4579_v63 }
 0x476   : > { %v2023_v32 = vmul.f32 %v2831_v33, %v4588_v34  ;;  %v2024_v55 = vmul.f32 %v2831_v33, %v4591_v22  ;;  %v2025_v7 = vmul.f32 %v2831_v33, %v4594_v51  ;;  %v2026_v45 = vmul.f32 %v2831_v33, %v4597_v2 }
 0x477   : > { %v2027_v53 = vmul.f32 %v2831_v33, %v4600_v37  ;;  %v2028_v54 = vmul.f32 %v2831_v33, %v4603_v23  ;;  %v2029_v59 = vmul.f32 %v2831_v33, %v4680_v19  ;;  %v2030_v46 = vadd.f32 %v2022_v62, %v1996_v57  ;;  %v4708_v62 = vld [vmem:[%s4575_s23 + $0x82] sm:$0xff] }
 0x478   : > { %v2031_v63 = vadd.f32 %v2023_v32, %v1997_v1  ;;  %v2032_v49 = vadd.f32 %v2024_v55, %v1998_v17  ;;  %v2033_v30 = vadd.f32 %v2025_v7, %v1999_v14  ;;  %v2034_v0 = vadd.f32 %v2026_v45, %v2000_v25  ;;  %v2851_v25 = vld [vmem:[%s4930_s5 + $0xe] ss:$0 sm:$0xff] }
 0x479   : > { %v2035_v5 = vadd.f32 %v2027_v53, %v2001_v44  ;;  %v2036_v21 = vadd.f32 %v2028_v54, %v2002_v26  ;;  %v2037_v27 = vadd.f32 %v2029_v59, %v2003_v9  ;;  %v2054_v3 = vmul.f32 %v2841_v24, %v4610_v35 }
 0x47a   : > { %v2055_v13 = vmul.f32 %v2841_v24, %v4620_v48  ;;  %v2056_v60 = vmul.f32 %v2841_v24, %v4623_v15  ;;  %v2057_v33 = vmul.f32 %v2841_v24, %v4626_v10  ;;  %v2058_v57 = vmul.f32 %v2841_v24, %v4629_v43 }
 0x47b   : > { %v2059_v1 = vmul.f32 %v2841_v24, %v4632_v8  ;;  %v2060_v17 = vmul.f32 %v2841_v24, %v4635_v38  ;;  %v2061_v14 = vmul.f32 %v2841_v24, %v4694_v50  ;;  %v2062_v44 = vadd.f32 %v2054_v3, %v2030_v46  ;;  %v2859_v3 = vld [vmem:[%s4575_s23 + $0x90] sm:$0xff] }
 0x47c   : > { %v2063_v35 = vadd.f32 %v2055_v13, %v2031_v63  ;;  %v2064_v26 = vadd.f32 %v2056_v60, %v2032_v49  ;;  %v2065_v9 = vadd.f32 %v2057_v33, %v2033_v30  ;;  %v2066_v32 = vadd.f32 %v2058_v57, %v2034_v0  ;;  %v2861_v0 = vld [vmem:[%s4930_s5 + $0xf] ss:$0 sm:$0xff] }
 0x47d   : > { %v2067_v55 = vadd.f32 %v2059_v1, %v2035_v5  ;;  %v2068_v7 = vadd.f32 %v2060_v17, %v2036_v21  ;;  %v2069_v45 = vadd.f32 %v2061_v14, %v2037_v27  ;;  %v2086_v53 = vmul.f32 %v2851_v25, %v4642_v6 }
 0x47e   : > { %v2087_v54 = vmul.f32 %v2851_v25, %v4652_v31  ;;  %v2088_v59 = vmul.f32 %v2851_v25, %v4655_v28  ;;  %v2089_v24 = vmul.f32 %v2851_v25, %v4658_v61  ;;  %v2090_v46 = vmul.f32 %v2851_v25, %v4661_v42 }
 0x47f   : > { %v2091_v63 = vmul.f32 %v2851_v25, %v4664_v58  ;;  %v2092_v49 = vmul.f32 %v2851_v25, %v4667_v56  ;;  %v2093_v30 = vmul.f32 %v2851_v25, %v4708_v62  ;;  %v2094_v5 = vadd.f32 %v2086_v53, %v2062_v44 }
 0x480   : > { %v2095_v6 = vadd.f32 %v2087_v54, %v2063_v35  ;;  %v2096_v21 = vadd.f32 %v2088_v59, %v2064_v26  ;;  %v2097_v27 = vadd.f32 %v2089_v24, %v2065_v9  ;;  %v2098_v13 = vadd.f32 %v2090_v46, %v2066_v32  ;;  %v2871_v9 = vld [vmem:[%s4930_s5 + $0x10] ss:$0 sm:$0xff] }
 0x481   : > { %v2099_v60 = vadd.f32 %v2091_v63, %v2067_v55  ;;  %v2100_v33 = vadd.f32 %v2092_v49, %v2068_v7  ;;  %v2101_v57 = vadd.f32 %v2093_v30, %v2069_v45  ;;  %v2120_v1 = vmul.f32 %v2861_v0, %v4588_v34  ;;  %v2881_v63 = vld [vmem:[%s4930_s5 + $0x11] ss:$0 sm:$0xff] }
 0x482   : > { %v2121_v17 = vmul.f32 %v2861_v0, %v4591_v22  ;;  %v2122_v14 = vmul.f32 %v2861_v0, %v4594_v51  ;;  %v2123_v25 = vmul.f32 %v2861_v0, %v4597_v2  ;;  %v2124_v41 = vmul.f32 %v2861_v0, %v4600_v37  ;;  %v2869_v22 = vld [vmem:[%s4575_s23 + $0x91] sm:$0xff] }
 0x483   : > { %v2125_v44 = vmul.f32 %v2861_v0, %v4603_v23  ;;  %v2126_v35 = vmul.f32 %v2861_v0, %v4680_v19  ;;  %v2127_v26 = vmul.f32 %v2861_v0, %v2859_v3  ;;  %v2128_v32 = vadd.f32 %v2120_v1, %v2094_v5  ;;  %v2879_v0 = vld [vmem:[%s4575_s23 + $0x92] sm:$0xff] }
 0x484   : > { %v2129_v55 = vadd.f32 %v2121_v17, %v2095_v6  ;;  %v2130_v34 = vadd.f32 %v2122_v14, %v2096_v21  ;;  %v2131_v7 = vadd.f32 %v2123_v25, %v2097_v27  ;;  %v2132_v45 = vadd.f32 %v2124_v41, %v2098_v13 }
 0x485   : > { %v2133_v51 = vadd.f32 %v2125_v44, %v2099_v60  ;;  %v2134_v2 = vadd.f32 %v2126_v35, %v2100_v33  ;;  %v2135_v53 = vadd.f32 %v2127_v26, %v2101_v57  ;;  %v2152_v37 = vmul.f32 %v2871_v9, %v4620_v48 }
 0x486   : > { %v2153_v23 = vmul.f32 %v2871_v9, %v4623_v15  ;;  %v2154_v19 = vmul.f32 %v2871_v9, %v4626_v10  ;;  %v2155_v54 = vmul.f32 %v2871_v9, %v4629_v43  ;;  %v2156_v59 = vmul.f32 %v2871_v9, %v4632_v8 }
 0x487   : > { %v2157_v24 = vmul.f32 %v2871_v9, %v4635_v38  ;;  %v2158_v46 = vmul.f32 %v2871_v9, %v4694_v50  ;;  %v2159_v41 = vmul.f32 %v2871_v9, %v2869_v22  ;;  %v2160_v49 = vadd.f32 %v2152_v37, %v2128_v32  ;;  %v5028_v32 = vld [vmem:[#allocation26_spill] sm:$0xff] }
 0x488   : > { %v2161_v48 = vadd.f32 %v2153_v23, %v2129_v55  ;;  %v2162_v30 = vadd.f32 %v2154_v19, %v2130_v34  ;;  %v2163_v15 = vadd.f32 %v2155_v54, %v2131_v7  ;;  %v2164_v10 = vadd.f32 %v2156_v59, %v2132_v45  ;;  %v5029_v55 = vld [vmem:[#allocation27_spill] sm:$0xff]  ;;  %v5031_v7 = vld [vmem:[#allocation33_spill] sm:$0xff]  ;;  %v5032_v45 = vld [vmem:[#allocation34_spill] sm:$0xff] }
 0x489   : > { %v2165_v5 = vadd.f32 %v2157_v24, %v2133_v51  ;;  %v2166_v6 = vadd.f32 %v2158_v46, %v2134_v2  ;;  %v2167_v43 = vadd.f32 %v2159_v41, %v2135_v53  ;;  %v2184_v8 = vmul.f32 %v2881_v63, %v4652_v31  ;;  %v5033_v51 = vld [vmem:[#allocation39_spill] sm:$0xff]  ;;  %v5037_v19 = vld [vmem:[#allocation44_spill] sm:$0xff]  ;;  %v5038_v59 = vld [vmem:[#allocation45_spill] sm:$0xff] }
 0x48a   : > { %v2185_v38 = vmul.f32 %v2881_v63, %v4655_v28  ;;  %v2186_v50 = vmul.f32 %v2881_v63, %v4658_v61  ;;  %v2187_v21 = vmul.f32 %v2881_v63, %v4661_v42  ;;  %v2188_v27 = vmul.f32 %v2881_v63, %v4664_v58  ;;  %v5039_v46 = vld [vmem:[#allocation15_spill] sm:$0xff] }
 0x48b   : > { %v2189_v3 = vmul.f32 %v2881_v63, %v4667_v56  ;;  %v2190_v13 = vmul.f32 %v2881_v63, %v4708_v62  ;;  %v2191_v60 = vmul.f32 %v2881_v63, %v2879_v0  ;;  %v2192_v33 = vadd.f32 %v2184_v8, %v2160_v49  ;;  %v5040_v63 = vld [vmem:[#allocation18_spill] sm:$0xff] }
 0x48c   : > { %v2193_v57 = vadd.f32 %v2185_v38, %v2161_v48  ;;  %v2194_v1 = vadd.f32 %v2186_v50, %v2162_v30  ;;  %v2195_v17 = vadd.f32 %v2187_v21, %v2163_v15  ;;  %v2196_v31 = vadd.f32 %v2188_v27, %v2164_v10  ;;  %v5041_v48 = vld [vmem:[#allocation19_spill] sm:$0xff]  ;;  %v5043_v10 = vld [vmem:[#allocation28_spill] sm:$0xff]  ;;  %v5045_v8 = vld [vmem:[#allocation42_spill] sm:$0xff] }
 0x48d   : > { %v2197_v14 = vadd.f32 %v2189_v3, %v2165_v5  ;;  %v2198_v28 = vadd.f32 %v2190_v13, %v2166_v6  ;;  %v2199_v25 = vadd.f32 %v2191_v60, %v2167_v43  ;;  %v2226_v61 = vadd.f32 %v4139_v52, %v2192_v33  ;;  %v5042_v15 = vld [vmem:[#allocation23_spill] sm:$0xff]  ;;  %v5046_v50 = vld [vmem:[#allocation49_spill] sm:$0xff]  ;;  %v5047_v27 = vld [vmem:[#allocation48_spill] sm:$0xff] }
 0x48e   : > { %v2227_v42 = vadd.f32 %v4141_v11, %v2193_v57  ;;  %v2228_v58 = vadd.f32 %v4144_v47, %v2194_v1  ;;  %v2229_v56 = vadd.f32 %v4159_v12, %v2195_v17  ;;  %v2230_v62 = vadd.f32 %v4162_v39, %v2196_v31  ;;  %v5027_v12 = vld [vmem:[#allocation25_spill] sm:$0xff]  ;;  %v5044_v6 = vld [vmem:[#allocation35_spill] sm:$0xff]  ;;  %v5048_v13 = vld [vmem:[#allocation50_spill] sm:$0xff] }
 0x48f   : > { %v2231_v44 = vadd.f32 %v4165_v40, %v2197_v14  ;;  %v2232_v35 = vadd.f32 %v4173_v18, %v2198_v28  ;;  %v2233_v26 = vadd.f32 %v4176_v16, %v2199_v25  ;;  %v2258_v9 = vadd.f32 %v4181_v20, %v2226_v61  ;;  %v5030_v16 = vld [vmem:[#allocation29_spill] sm:$0xff]  ;;  %v5049_v33 = vld [vmem:[#allocation51_spill] sm:$0xff]  ;;  %v5050_v1 = vld [vmem:[#allocation52_spill] sm:$0xff] }
 0x490   : > { %v2259_v52 = vadd.f32 %v4203_v29, %v2227_v42  ;;  %v2260_v11 = vadd.f32 %v4205_v4, %v2228_v58  ;;  %v2261_v47 = vadd.f32 %v4207_v36, %v2229_v56  ;;  %v2262_v39 = vadd.f32 %v5027_v12, %v2230_v62  ;;  %v5034_v29 = vld [vmem:[#allocation40_spill] sm:$0xff]  ;;  %v5035_v4 = vld [vmem:[#allocation41_spill] sm:$0xff]  ;;  %v5036_v36 = vld [vmem:[#allocation43_spill] sm:$0xff] }
 0x491   : > { %v2263_v40 = vadd.f32 %v5028_v32, %v2231_v44  ;;  %v2264_v18 = vadd.f32 %v5029_v55, %v2232_v35  ;;  %v2265_v34 = vadd.f32 %v5030_v16, %v2233_v26  ;;  %v2290_v22 = vadd.f32 %v5031_v7, %v2258_v9  ;;  %v5051_v31 = vld [vmem:[#allocation54_spill] sm:$0xff]  ;;  %v5052_v28 = vld [vmem:[#allocation55_spill] sm:$0xff]  ;;  %v5053_v61 = vld [vmem:[#allocation56_spill] sm:$0xff] }
 0x492   : > { %v2291_v20 = vadd.f32 %v5032_v45, %v2259_v52  ;;  %v2292_v2 = vadd.f32 %v5033_v51, %v2260_v11  ;;  %v2293_v53 = vadd.f32 %v5034_v29, %v2261_v47  ;;  %v2294_v37 = vadd.f32 %v5035_v4, %v2262_v39  ;;  %v5054_v58 = vld [vmem:[#allocation57_spill] sm:$0xff]  ;;  %v5055_v44 = vld [vmem:[#allocation59_spill] sm:$0xff]  ;;  %v5056_v26 = vld [vmem:[#allocation60_spill] sm:$0xff] }
 0x493   : > { %v2295_v23 = vadd.f32 %v5036_v36, %v2263_v40  ;;  %v2296_v54 = vadd.f32 %v5037_v19, %v2264_v18  ;;  %v2297_v24 = vadd.f32 %v5038_v59, %v2265_v34  ;;  %v2324_v41 = vadd.f32 %v5039_v46, %v2290_v22  ;;  %v2925_v62 = vld [vmem:[%s4123_s24 + $0x90] sm:$0xff]  ;;  %v5058_v47 = vld [vmem:[#allocation62_spill] sm:$0xff]  ;;  %v5059_v39 = vld [vmem:[#allocation63_spill] sm:$0xff] }
 0x494   : > { %v2325_v49 = vadd.f32 %v5040_v63, %v2291_v20  ;;  %v2326_v30 = vadd.f32 %v5041_v48, %v2292_v2  ;;  %v2327_v0 = vadd.f32 %v5042_v15, %v2293_v53  ;;  %v2328_v5 = vadd.f32 %v5043_v10, %v2294_v37  ;;  %v5057_v52 = vld [vmem:[#allocation61_spill] sm:$0xff]  ;;  %v5060_v40 = vld [vmem:[#allocation64_spill] sm:$0xff]  ;;  %v5062_v34 = vld [vmem:[#allocation66_spill] sm:$0xff] }
 0x495   : > { %v2329_v43 = vadd.f32 %v5044_v6, %v2295_v23  ;;  %v2330_v38 = vadd.f32 %v5045_v8, %v2296_v54  ;;  %v2331_v21 = vadd.f32 %v5046_v50, %v2297_v24  ;;  %v2356_v3 = vadd.f32 %v5047_v27, %v2324_v41  ;;  %v5061_v18 = vld [vmem:[#allocation65_spill] sm:$0xff]  ;;  %v5063_v22 = vld [vmem:[#allocation16_spill] sm:$0xff]  ;;  %v5064_v45 = vld [vmem:[#allocation58_spill] sm:$0xff] }
 0x496   : > { %v2357_v60 = vadd.f32 %v5048_v13, %v2325_v49  ;;  %v2358_v57 = vadd.f32 %v5049_v33, %v2326_v30  ;;  %v2359_v17 = vadd.f32 %v5050_v1, %v2327_v0  ;;  %v2360_v14 = vadd.f32 %v5051_v31, %v2328_v5  ;;  %v5065_v51 = vld [vmem:[#allocation17_spill] sm:$0xff]  ;;  %v5066_v29 = vld [vmem:[#allocation46_spill] sm:$0xff]  ;;  %v5067_v36 = vld [vmem:[#allocation67_spill] sm:$0xff] }
 0x497   : > { %v2361_v25 = vadd.f32 %v5052_v28, %v2329_v43  ;;  %v2362_v42 = vadd.f32 %v5053_v61, %v2330_v38  ;;  %v2363_v56 = vadd.f32 %v5054_v58, %v2331_v21  ;;  %v2388_v35 = vadd.f32 %v5055_v44, %v2356_v3  ;;  %v2937_v37 = vld [vmem:[%s4930_s5 + $0x19] ss:$0 sm:$0xff]  ;;  %v5068_v19 = vld [vmem:[#allocation68_spill] sm:$0xff]  ;;  %v5069_v59 = vld [vmem:[#allocation69_spill] sm:$0xff] }
 0x498   : > { %v2389_v9 = vadd.f32 %v5056_v26, %v2357_v60  ;;  %v2390_v11 = vadd.f32 %v5057_v52, %v2358_v57  ;;  %v2391_v12 = vadd.f32 %v5058_v47, %v2359_v17  ;;  %v2392_v32 = vadd.f32 %v5059_v39, %v2360_v14  ;;  %v5070_v46 = vld [vmem:[#allocation70_spill] sm:$0xff]  ;;  %v3192_v0 = vld [vmem:[%s4123_s24 + $0x21] sm:$0xff]  ;;  %v5072_v38 = vld [vmem:[#allocation21_spill] sm:$0xff] }
 0x499   : > { %v2393_v55 = vadd.f32 %v5060_v40, %v2361_v25  ;;  %v2394_v16 = vadd.f32 %v5061_v18, %v2362_v42  ;;  %v2395_v7 = vadd.f32 %v5062_v34, %v2363_v56  ;;  %v2418_v20 = vmul.f32 %v5064_v45, %v5063_v22  ;;  %v2935_v63 = vld [vmem:[%s4123_s24 + $0x91] sm:$0xff]  ;;  %v5071_v43 = vld [vmem:[#allocation20_spill] sm:$0xff]  ;;  %v5075_v60 = vld [vmem:[#allocation47_spill] sm:$0xff] }
 0x49a   : > { %v2419_v2 = vmul.f32 %v5064_v45, %v5065_v51  ;;  %v2420_v53 = vmul.f32 %v5064_v45, %v5066_v29  ;;  %v2421_v4 = vmul.f32 %v5064_v45, %v2925_v62  ;;  %v2422_v23 = vadd.f32 %v5067_v36, %v2388_v35  ;;  %v3193_v5 = vld [vmem:[%s4123_s24 + $0x31] sm:$0xff]  ;;  %v5074_v3 = vld [vmem:[#allocation24_spill] sm:$0xff]  ;;  %v2947_v1 = vld [vmem:[%s4930_s5 + $0x1a] ss:$0 sm:$0xff] }
 0x49b   : > { %v2423_v54 = vadd.f32 %v5068_v19, %v2389_v9  ;;  %v2424_v24 = vadd.f32 %v5069_v59, %v2390_v11  ;;  %v2425_v41 = vadd.f32 %v5070_v46, %v2391_v12  ;;  %v2426_v49 = vadd.f32 %v2418_v20, %v2392_v32  ;;  %v5073_v21 = vld [vmem:[#allocation22_spill] sm:$0xff]  ;;  %v5077_v35 = vld [vmem:[#allocation31_spill] sm:$0xff]  ;;  %v5078_v9 = vld [vmem:[#allocation32_spill] sm:$0xff] }
 0x49c   : > { %v2427_v48 = vadd.f32 %v2419_v2, %v2393_v55  ;;  %v2428_v30 = vadd.f32 %v2420_v53, %v2394_v16  ;;  %v2429_v15 = vadd.f32 %v2421_v4, %v2395_v7  ;;  %v2446_v10 = vmul.f32 %v3192_v0, %v2937_v37  ;;  %v2945_v25 = vld [vmem:[%s4123_s24 + $0x92] sm:$0xff]  ;;  %v5079_v11 = vld [vmem:[#allocation36_spill] sm:$0xff]  ;;  %v2509_v12 = vld [vmem:[%s2508_s11] sm:$0xff] }
 0x49d   : > { %v2447_v6 = vmul.f32 %v3193_v5, %v2937_v37  ;;  %v2448_v8 = vmul.f32 %v2937_v37, %v5071_v43  ;;  %v2449_v50 = vmul.f32 %v2937_v37, %v5072_v38  ;;  %v2450_v27 = vmul.f32 %v2937_v37, %v5073_v21  ;;  %v5076_v62 = vld [vmem:[#allocation30_spill] sm:$0xff]  ;;  %v2510_v39 = vld [vmem:[%s2508_s11 + $0x8] sm:$0xff]  ;;  %v5080_v32 = vld [vmem:[#allocation37_spill] sm:$0xff] }
 0x49e   : > { %v2451_v13 = vmul.f32 %v2937_v37, %v5074_v3  ;;  %v2452_v33 = vmul.f32 %v2937_v37, %v5075_v60  ;;  %v2453_v57 = vmul.f32 %v2937_v37, %v2935_v63  ;;  %v2454_v17 = vadd.f32 %v2446_v10, %v2422_v23  ;;  %v5081_v55 = vld [vmem:[#allocation38_spill] sm:$0xff]  ;;  %v5082_v16 = vld [vmem:[#allocation53_spill] sm:$0xff]  ;;  %v2513_v20 = vld [vmem:[%s2508_s11 + $0x20] sm:$0xff] }
 0x49f   : > { %v2455_v31 = vadd.f32 %v2447_v6, %v2423_v54  ;;  %v2456_v14 = vadd.f32 %v2448_v8, %v2424_v24  ;;  %v2457_v28 = vadd.f32 %v2449_v50, %v2425_v41  ;;  %v2458_v61 = vadd.f32 %v2450_v27, %v2426_v49  ;;  %v2511_v22 = vld [vmem:[%s2508_s11 + $0x10] sm:$0xff]  ;;  %v2512_v45 = vld [vmem:[%s2508_s11 + $0x18] sm:$0xff]  ;;  %v2514_v4 = vld [vmem:[%s2508_s11 + $0x28] sm:$0xff] }
 0x4a0   : > { %v2459_v42 = vadd.f32 %v2451_v13, %v2427_v48  ;;  %v2460_v58 = vadd.f32 %v2452_v33, %v2428_v30  ;;  %v2461_v56 = vadd.f32 %v2453_v57, %v2429_v15  ;;  %v2478_v44 = vmul.f32 %v2947_v1, %v5076_v62  ;;  %v2515_v37 = vld [vmem:[%s2508_s11 + $0x30] sm:$0xff]  ;;  %v2516_v36 = vld [vmem:[%s2508_s11 + $0x38] sm:$0xff] }
 0x4a1   : > { %v2479_v26 = vmul.f32 %v2947_v1, %v5077_v35  ;;  %v2480_v52 = vmul.f32 %v2947_v1, %v5078_v9  ;;  %v2481_v47 = vmul.f32 %v2947_v1, %v5079_v11  ;;  %v2482_v40 = vmul.f32 %v2947_v1, %v5080_v32 }
 0x4a2   : > { %v2483_v18 = vmul.f32 %v2947_v1, %v5081_v55  ;;  %v2484_v34 = vmul.f32 %v2947_v1, %v5082_v16  ;;  %v2485_v7 = vmul.f32 %v2947_v1, %v2945_v25  ;;  %v2486_v51 = vadd.f32 %v2478_v44, %v2454_v17 }
 0x4a3   : > { %v2487_v2 = vadd.f32 %v2479_v26, %v2455_v31  ;;  %v2488_v29 = vadd.f32 %v2480_v52, %v2456_v14  ;;  %v2489_v53 = vadd.f32 %v2481_v47, %v2457_v28  ;;  %v2490_v23 = vadd.f32 %v2482_v40, %v2458_v61 }
 0x4a4   : > { %v2491_v19 = vadd.f32 %v2483_v18, %v2459_v42  ;;  %v2492_v54 = vadd.f32 %v2484_v34, %v2460_v58  ;;  %v2493_v59 = vadd.f32 %v2485_v7, %v2461_v56  ;;  %v2517_v24 = vadd.f32 %v2509_v12, %v2486_v51 }
 0x4a5   : > { %v2518_v46 = vadd.f32 %v2510_v39, %v2487_v2  ;;  %v2519_v41 = vadd.f32 %v2511_v22, %v2488_v29  ;;  %v2520_v63 = vadd.f32 %v2512_v45, %v2489_v53  ;;  %v2521_v49 = vadd.f32 %v2513_v20, %v2490_v23 }
 0x4a6   : > { %v2522_v48 = vadd.f32 %v2514_v4, %v2491_v19  ;;  %v2523_v30 = vadd.f32 %v2515_v37, %v2492_v54  ;;  %v2524_v15 = vadd.f32 %v2516_v36, %v2493_v59  ;;  %2526 = vst.msk [vmem:[%s3447_s22] sm:$0xff] %vm2525_vm7, %v2517_v24 }
 0x4a7   : > { %2527 = vst.msk [vmem:[%s3447_s22 + $0x8] sm:$0xff] %vm2525_vm7, %v2518_v46  ;;  %2528 = vst.msk [vmem:[%s3447_s22 + $0x10] sm:$0xff] %vm2525_vm7, %v2519_v41 }
 0x4a8   : > { %2529 = vst.msk [vmem:[%s3447_s22 + $0x18] sm:$0xff] %vm2525_vm7, %v2520_v63  ;;  %2530 = vst.msk [vmem:[%s3447_s22 + $0x20] sm:$0xff] %vm2525_vm7, %v2521_v49 }
 0x4a9   : > { %2531 = vst.msk [vmem:[%s3447_s22 + $0x28] sm:$0xff] %vm2525_vm7, %v2522_v48  ;;  %2532 = vst.msk [vmem:[%s3447_s22 + $0x30] sm:$0xff] %vm2525_vm7, %v2523_v30 }
 0x4aa   : > { %2533 = vst.msk [vmem:[%s3447_s22 + $0x38] sm:$0xff] %vm2525_vm7, %v2524_v15 }
 0x4ab PF: > { %s2954_s24 = sadd.s32 4294967294, %s3270_s12  ;;  %s2956_s15 = sshll.u32 %s3274_s13, 5 }
 0x4ac   : > { %p2544_p5 = scmp.gt.s32.totalorder %s2954_s24, 0  ;;  %s2555_s19 = sshll.u32 %s3447_s22, 4  ;;  %s4865_s19 = int_to_ptr.vmem [resolvable:$true] %s2555_s19 }
 0x4ad   : > { %s5083_s23 = sand.u32 1, %s3262_s10   ;;  %s3194_s12 = scalar_lea.vmem %s4865_s19, 1024 }
 0x4ae   : > { %s5130_s24 = smov (!%p2544_p5, %s2954_s24), 0  ;;  %s4874_s18 = scalar_lea.sflag [#allocation5], %s5083_s23 }
 0x4af   : > { %s2955_s17 = sshll.u32 %s5130_s24, 3  ;;  %p3195_p6 = scmp.ne.s32.totalorder %s4865_s19, %s3194_s12 }
 0x4b0   : > { %s2552_s20 = sadd.s32 %s2956_s15, %s2955_s17  ;;  %s3291_s13 = smov [#allocation4]  }
 0x4b1   : > { %s2957_s28 = sshll.u32 %s2552_s20, 7  ;;  %p3196_p8 = pnand %p3195_p6, %p3402_p7 }
 0x4b2   : > { %s4870_s21 = scalar_lea.hbm %s4934_s9, %s2957_s28  ;;  %s3198_s22 = sshll.u32 %s3291_s13, 4  ;;  %s3199_s22 = int_to_ptr.vmem [resolvable:$false] %s3198_s22 }
 0x4b3   : > { %p3197_p9 = pneg %p3196_p8  ;;  %s3200_s30 = scalar_lea.vmem %s3199_s22, 2048 }
 0x4b4   : > { %p3201_p10 = scmp.lt.s32.totalorder %s4865_s19, %s3199_s22  ;;  %p3202_p11 = scmp.lt.s32.totalorder %s3200_s30, %s3194_s12 }
 0x4b6   : > { %p3203_p13 = por %p3202_p11, %p3201_p10 }
 0x4b8   : > { %p3204_p0 = pnand %p3203_p13, %p3197_p9 }
 0x4ba   : > { %3207 = shalt.err (!%p3204_p0)
}
 0x4bb   : > { %s3208_s26 = scalar_lea.hbm %s4870_s21, 1024  ;;  %s3212_s24 = scalar_lea.hbm %s4934_s9, 8192 }
 0x4bc   : > { %p3209_p1 = scmp.ne.s32.totalorder %s4870_s21, %s3208_s26  ;;  %p3213_p4 = scmp.lt.s32.totalorder %s4870_s21, %s4934_s9 }
 0x4bd   : > { %p3214_p5 = scmp.lt.s32.totalorder %s3212_s24, %s3208_s26 }
 0x4be   : > { %p3210_p2 = pnand %p3209_p1, %p3402_p7 }
 0x4bf   : > { %p3215_p6 = por %p3214_p5, %p3213_p4 }
 0x4c0   : > { %p3211_p3 = pneg %p3210_p2 }
 0x4c2   : > { %p3216_p8 = pnand %p3215_p6, %p3211_p3 }
 0x4c4   : > { %3219 = shalt.err (!%p3216_p8)
}
 0x4c5   : > { %s3292_s20 = smov 128   ;;  %s3293_s28 = smov 8  }
 0x4c6   : > { %3012 = dma.vmem_to_hbm [thread:$0]  (%p3402_p7), %s4865_s19, 1024, %s4870_s21, %s4874_s18, %s3292_s20, %s3292_s20, %s3293_s28  }
 0x4c7 PF: > { %s5084_s29 = sld [smem:[#allocation7_spill]]  ;;  %p3018_p9 = scmp.ge.s32.totalorder %s3286_s16, 2 }
 0x4c9   : > { %p3015_p10 = pnand %p3018_p9, %p3411_p12 }
 0x4cb   : > { %p3016_p11 = pneg %p3015_p10 }
 0x4cd   : > { %s2570_s23 = sand.u32 1, %s5084_s29  }
 0x4ce   : > { %s2571_s12 = scalar_lea.sflag [#allocation5], %s2570_s23 }
 0x4cf   : > { %3253 = dma.done.wait (%p3016_p11), %s2571_s12, 1024  }
 0x4d0   : > { %3255 = vsyncadd (%p3016_p11), %s2571_s12, 4294966272  ;;  %s22_s16 = sadd.s32 1, %s3286_s16   ;;  %s5086_s13 = sld [smem:[#allocation8_spill]] }
 0x4d1   : > { %p19_p13 = scmp.ge.s32.totalorder %s22_s16, 14   ;;  %s5087_s11 = sld [smem:[#allocation13_spill]] }
 0x4d2   : > { %s5088_s12 = sld [smem:[#allocation9_spill]]  ;;  %s5092_s30 = smov %s3262_s10 }
 0x4d3   : > { %s5089_s27 = sld [smem:[#allocation10_spill]] }
 0x4d4   : > { %s5090_s14 = sld [smem:[#allocation11_spill]] }
 0x4d5   : > { %s5091_s15 = sld [smem:[#allocation12_spill]]  ;;  %21 = sbr.rel (!%p19_p13) target bundleno = 5 (0x5), region = 146 }
 0x4d6   : > { %s5093_s10 = smov %s5086_s13 }
 0x4d9   : > { %s5094_s13 = smov %s5089_s27 }
 0x4da   :  { %2576 = vsyncpa [#allocation5], 1 }
 0x4db   :  { %2578 = vsyncpa [#allocation5 + $0x1], 1 }

</bundles_post_ra>
